<compile_context>
chip_gen: v7x
topology: tpu7x:2x2x1
jax: 0.10.0
libtpu: 0.0.40
codegen_flags: <defaults>
</compile_context>

<pallas_src>
import functools

import jax
import jax.numpy as jnp
from jax import lax
from jax.experimental import pallas as pl
from jax.experimental.pallas import tpu as pltpu


def _round_up(x, m):
    return (x + m - 1) // m * m


# ----------------------------------------------------------------------------
# Fused kernel: GRU stack -> last step -> fc1 -> BN(batch stats) -> ReLU -> fc2
# ----------------------------------------------------------------------------
def _fused_rnn_head_kernel(num_layers, T, B, Hp, x_ref, *refs):
    """x_ref: (T*B, D_in) time-major flattened input (f32).

    refs = [wih_t, whh_t, bih, bhhn] * num_layers          (f32, VMEM)
           + [w1_t, b1, gamma, beta, b2]                   (f32, VMEM)
           + [w2_hbm]                                      (bf16, memory_space=ANY)
           + [out_ref]                                     (B, Op) f32 output
           + [w2_vmem, w2_sem]                             scratch
    Shapes (Hp = hidden padded to multiple of 128, Op = output padded):
      wih_t : (D_in, 3*Hp)   whh_t : (Hp, 3*Hp)
      bih   : (1, 3*Hp)  (b_ih with b_hh_r / b_hh_z folded in)
      bhhn  : (1, Hp)
      w1_t  : (Hp, F1)   b1/gamma/beta : (1, F1)
      w2    : (F1, Op) bf16    b2 : (1, Op)
    """
    n_in = 4 * num_layers + 6
    layer_refs = refs[: 4 * num_layers]
    (w1_ref, b1_ref, gamma_ref, beta_ref, b2_ref,
     w2_hbm_ref) = refs[4 * num_layers: n_in]
    out_ref = refs[n_in]
    w2_vmem = refs[n_in + 1]
    w2_sem = refs[n_in + 2]

    # --- (1) start the fc2 weight DMA immediately; it overlaps the GRU chain.
    w2_copy = pltpu.make_async_copy(w2_hbm_ref, w2_vmem, w2_sem)
    w2_copy.start()

    # seq_cat: (T*B, feat) time-major input to the current layer.
    seq_cat = x_ref[...]

    h = None
    for l in range(num_layers):
        wih = layer_refs[4 * l + 0][...]
        whh = layer_refs[4 * l + 1][...]
        bih = layer_refs[4 * l + 2][...]     # (1, 3*Hp)
        bhhn = layer_refs[4 * l + 3][...]    # (1, Hp)

        # One batched input projection per layer (M = T*B rows): fewer MXU
        # RHS pushes than T separate M=B matmuls, and it is off the serial
        # critical path so the scheduler can overlap it with the recurrence.
        gx_all = jnp.dot(seq_cat, wih, preferred_element_type=jnp.float32) + bih

        # Hoist the per-step broadcast of b_hh_n out of the recurrence.
        bhhn_b = jnp.broadcast_to(bhhn, (B, Hp))

        h = jnp.zeros((B, Hp), jnp.float32)
        new_seq = []
        for t in range(T):
            gx = gx_all[t * B:(t + 1) * B, :]          # static sublane slice
            gh = jnp.dot(h, whh, preferred_element_type=jnp.float32)
            # Lane-aligned gate slabs (each Hp lanes, Hp % 128 == 0).
            r = jax.nn.sigmoid(gx[:, :Hp] + gh[:, :Hp])
            z = jax.nn.sigmoid(gx[:, Hp:2 * Hp] + gh[:, Hp:2 * Hp])
            n = jnp.tanh(gx[:, 2 * Hp:] + r * (gh[:, 2 * Hp:] + bhhn_b))
            h = (1.0 - z) * n + z * h
            if l < num_layers - 1:                     # last layer: only h needed
                new_seq.append(h)
        if l < num_layers - 1:
            seq_cat = jnp.concatenate(new_seq, axis=0)  # (T*B, Hp)

    h_last = h                                          # (B, Hp)

    # ---- head: fc1 -> BatchNorm1d (batch statistics) -> ReLU -> fc2 ----
    y = jnp.dot(h_last, w1_ref[...], preferred_element_type=jnp.float32) \
        + b1_ref[...]
    mean = jnp.mean(y, axis=0, keepdims=True)
    var = jnp.mean((y - mean) ** 2, axis=0, keepdims=True)   # biased variance
    y = (y - mean) * lax.rsqrt(var + 1e-5) * gamma_ref[...] + beta_ref[...]
    y = jnp.maximum(y, 0.0)

    # --- (2) only now block on the fc2 weight DMA, then bf16 MXU matmul.
    w2_copy.wait()
    out = jnp.dot(y.astype(jnp.bfloat16), w2_vmem[...],
                  preferred_element_type=jnp.float32) + b2_ref[...]
    out_ref[...] = out.astype(out_ref.dtype)                  # lane-dense store


# ----------------------------------------------------------------------------
# Wrapper
# ----------------------------------------------------------------------------
def _full_spec(shape):
    n = len(shape)
    return pl.BlockSpec(shape, lambda i, n=n: (0,) * n)


@functools.partial(jax.jit, static_argnames=("output_size",))
def rnn_predictor_forward(params, x, *, output_size):
    """params: output of pack_params(); x: (B, T, input_size) float32."""
    B, T, D = x.shape
    num_layers = len(params["gru"])
    Hp = params["gru"][0]["whh_t"].shape[0]
    F1 = params["fc1_w_t"].shape[1]
    Op = params["fc2_w_t"].shape[1]

    # Time-major, flattened to (T*B, D): one batched input projection in-kernel.
    x_tb = jnp.transpose(x, (1, 0, 2)).reshape(T * B, D).astype(jnp.float32)

    inputs = [x_tb]
    for layer in params["gru"]:
        inputs += [layer["wih_t"], layer["whh_t"], layer["bih"], layer["bhhn"]]
    inputs += [params["fc1_w_t"], params["fc1_b"], params["bn_gamma"],
               params["bn_beta"], params["fc2_b"], params["fc2_w_t"]]

    # All small arrays go through auto-pipelined VMEM BlockSpecs; the large
    # fc2 matrix (last input) stays in HBM (pl.ANY) and is DMA'd manually.
    in_specs = [_full_spec(a.shape) for a in inputs[:-1]]
    in_specs.append(pl.BlockSpec(memory_space=pl.ANY))

    # Advisory cost estimate for XLA's scheduler.
    flops = 0
    for layer in params["gru"]:
        din, g3 = layer["wih_t"].shape
        flops += 2 * B * T * (din * g3 + Hp * g3)
    flops += 2 * B * (Hp * F1 + F1 * Op)
    transcendentals = 3 * B * T * Hp * num_layers + 2 * B * F1
    bytes_accessed = sum(int(a.size) * a.dtype.itemsize for a in inputs) \
        + B * Op * 4

    kernel = functools.partial(_fused_rnn_head_kernel, num_layers, T, B, Hp)

    out = pl.pallas_call(
        kernel,
        grid=(1,),
        in_specs=in_specs,
        out_specs=_full_spec((B, Op)),
        out_shape=jax.ShapeDtypeStruct((B, Op), jnp.float32),
        scratch_shapes=[pltpu.VMEM((F1, Op), jnp.bfloat16),
                        pltpu.SemaphoreType.DMA],
        compiler_params=pltpu.CompilerParams(
            dimension_semantics=("arbitrary",),
            vmem_limit_bytes=32 * 1024 * 1024),
        cost_estimate=pl.CostEstimate(
            flops=int(flops),
            transcendentals=int(transcendentals),
            bytes_accessed=int(bytes_accessed)),
    )(*inputs)
    # Drop the lane-padding columns (Op -> output_size).
    return out[:, :output_size]


# ----------------------------------------------------------------------------
# Parameter packing: PyTorch-layout raw params -> padded / transposed / folded
# ----------------------------------------------------------------------------
def pack_params(raw, input_size, hidden_size, output_size, fc1_size=1024):
    H = hidden_size
    Hp = _round_up(H, 128)
    Op = _round_up(output_size, 128)

    def pad_gate_cols(w_t):                     # (D_in, 3H) -> (D_in, 3Hp)
        d = w_t.shape[0]
        w3 = jnp.pad(w_t.reshape(d, 3, H), ((0, 0), (0, 0), (0, Hp - H)))
        return w3.reshape(d, 3 * Hp)

    gru = []
    for li, lr in enumerate(raw["gru"]):
        wih_t = pad_gate_cols(lr["w_ih"].T)     # (D_in, 3Hp)
        if li > 0:                              # incoming h is (B, Hp)
            wih_t = jnp.pad(wih_t, ((0, Hp - H), (0, 0)))
        whh_t = pad_gate_cols(lr["w_hh"].T)     # (H, 3Hp)
        whh_t = jnp.pad(whh_t, ((0, Hp - H), (0, 0)))           # (Hp, 3Hp)

        bih3 = lr["b_ih"].reshape(3, H)
        bhh3 = lr["b_hh"].reshape(3, H)
        # Fold b_hh_r, b_hh_z into the input bias; keep b_hh_n separate.
        bih_f = jnp.stack([bih3[0] + bhh3[0], bih3[1] + bhh3[1], bih3[2]])
        bih = jnp.pad(bih_f, ((0, 0), (0, Hp - H))).reshape(1, 3 * Hp)
        bhhn = jnp.pad(bhh3[2], (0, Hp - H)).reshape(1, Hp)
        gru.append(dict(wih_t=wih_t, whh_t=whh_t, bih=bih, bhhn=bhhn))

    fc1_w_t = jnp.pad(raw["fc1_w"].T, ((0, Hp - H), (0, 0)))    # (Hp, F1) f32
    # fc2 is the dominant weight (F1 x Op): store bf16 in HBM, DMA'd manually.
    fc2_w_t = jnp.pad(raw["fc2_w"].T,
                      ((0, 0), (0, Op - output_size))).astype(jnp.bfloat16)
    return dict(
        gru=gru,
        fc1_w_t=fc1_w_t,
        fc1_b=raw["fc1_b"].reshape(1, fc1_size),
        bn_gamma=raw["bn_gamma"].reshape(1, fc1_size),
        bn_beta=raw["bn_beta"].reshape(1, fc1_size),
        fc2_w_t=fc2_w_t,                                        # (F1, Op) bf16
        fc2_b=jnp.pad(raw["fc2_b"], (0, Op - output_size)).reshape(1, Op),
    )


# ----------------------------------------------------------------------------
# Deterministic PyTorch-layout parameter init (shapes from RNNPredictor)
# ----------------------------------------------------------------------------
def init_raw_params(key, input_size, hidden_size, num_layers, output_size,
                    fc1_size=1024):
    H = hidden_size
    keys = iter(jax.random.split(key, 4 * num_layers + 6))

    def u(k, shape, scale):
        return jax.random.uniform(k, shape, jnp.float32, -scale, scale)

    s = 1.0 / (H ** 0.5)
    gru = []
    d_in = input_size
    for _ in range(num_layers):
        gru.append(dict(
            w_ih=u(next(keys), (3 * H, d_in), s),
            w_hh=u(next(keys), (3 * H, H), s),
            b_ih=u(next(keys), (3 * H,), s),
            b_hh=u(next(keys), (3 * H,), s),
        ))
        d_in = H

    s1 = 1.0 / (H ** 0.5)
    s2 = 1.0 / (fc1_size ** 0.5)
    return dict(
        hidden_size=H,
        gru=gru,
        fc1_w=u(next(keys), (fc1_size, H), s1),
        fc1_b=u(next(keys), (fc1_size,), s1),
        # Non-trivial BN affine params so the BN path is actually exercised.
        bn_gamma=1.0 + 0.1 * jax.random.normal(next(keys), (fc1_size,), jnp.float32),
        bn_beta=0.1 * jax.random.normal(next(keys), (fc1_size,), jnp.float32),
        fc2_w=u(next(keys), (output_size, fc1_size), s2),
        fc2_b=u(next(keys), (output_size,), s2),
    )


# ----------------------------------------------------------------------------
# Pure-JAX reference (unpadded PyTorch layout, full f32) for correctness check
# ----------------------------------------------------------------------------
def _forward_ref(raw, x):
    H = raw["hidden_size"]
    h_seq = x
    for lr in raw["gru"]:
        B, T, _ = h_seq.shape
        h = jnp.zeros((B, H), jnp.float32)
        outs = []
        for t in range(T):
            gx = h_seq[:, t, :] @ lr["w_ih"].T + lr["b_ih"]
            gh = h @ lr["w_hh"].T + lr["b_hh"]
            r = jax.nn.sigmoid(gx[:, :H] + gh[:, :H])
            z = jax.nn.sigmoid(gx[:, H:2 * H] + gh[:, H:2 * H])
            n = jnp.tanh(gx[:, 2 * H:] + r * gh[:, 2 * H:])
            h = (1.0 - z) * n + z * h
            outs.append(h)
        h_seq = jnp.stack(outs, axis=1)
    y = h_seq[:, -1, :] @ raw["fc1_w"].T + raw["fc1_b"]
    mean = jnp.mean(y, axis=0, keepdims=True)
    var = jnp.mean((y - mean) ** 2, axis=0, keepdims=True)
    y = (y - mean) * lax.rsqrt(var + 1e-5) * raw["bn_gamma"] + raw["bn_beta"]
    y = jnp.maximum(y, 0.0)
    return y @ raw["fc2_w"].T + raw["fc2_b"]


# ----------------------------------------------------------------------------
if __name__ == "__main__":
    B, T = 2, 8
    INPUT_SIZE, HIDDEN, NUM_LAYERS, OUTPUT_SIZE = 16, 128, 2, 960

    root = jax.random.PRNGKey(0)
    k_param, k_x = jax.random.split(root)
    raw = init_raw_params(k_param, INPUT_SIZE, HIDDEN, NUM_LAYERS, OUTPUT_SIZE)
    params = pack_params(raw, INPUT_SIZE, HIDDEN, OUTPUT_SIZE)
    x = jax.random.normal(k_x, (B, T, INPUT_SIZE), jnp.float32)

    out = rnn_predictor_forward(params, x, output_size=OUTPUT_SIZE)
    out = jax.block_until_ready(out)
    assert out.shape == (B, OUTPUT_SIZE), out.shape

    ref = jax.block_until_ready(_forward_ref(raw, x))
    # Tolerance widened vs. the all-f32 version because the fc2 weight is
    # stored/consumed in bf16 (reference stays full f32 / PyTorch semantics).
    assert jnp.allclose(out, ref, atol=1e-2, rtol=1e-2), (
        float(jnp.max(jnp.abs(out - ref))))

    print("KERNEL_OK")
</pallas_src>

<mosaic_0001>
module attributes {stable_mosaic.version = 11 : i64} {
  func.func @_fused_rnn_head_kernel(%arg0: i32, %arg1: memref<16x16xf32, #tpu.memory_space<vmem>>, %arg2: memref<16x384xf32, #tpu.memory_space<vmem>>, %arg3: memref<128x384xf32, #tpu.memory_space<vmem>>, %arg4: memref<1x384xf32, #tpu.memory_space<vmem>>, %arg5: memref<1x128xf32, #tpu.memory_space<vmem>>, %arg6: memref<128x384xf32, #tpu.memory_space<vmem>>, %arg7: memref<128x384xf32, #tpu.memory_space<vmem>>, %arg8: memref<1x384xf32, #tpu.memory_space<vmem>>, %arg9: memref<1x128xf32, #tpu.memory_space<vmem>>, %arg10: memref<128x1024xf32, #tpu.memory_space<vmem>>, %arg11: memref<1x1024xf32, #tpu.memory_space<vmem>>, %arg12: memref<1x1024xf32, #tpu.memory_space<vmem>>, %arg13: memref<1x1024xf32, #tpu.memory_space<vmem>>, %arg14: memref<1x1024xf32, #tpu.memory_space<vmem>>, %arg15: memref<1024x1024xbf16, #tpu.memory_space<any>>, %arg16: memref<2x1024xf32, #tpu.memory_space<vmem>>, %arg17: memref<1024x1024xbf16, #tpu.memory_space<vmem>>, %arg18: memref<!tpu.dma_semaphore, #tpu.memory_space<semaphore_mem>>) attributes {dimension_semantics = [#tpu.dimension_semantics<arbitrary>], iteration_bounds = array<i64: 1>, scalar_prefetch = 0 : i64, scratch_operands = 2 : i64, tpu.core_type = #tpu.core_type<tc>, window_params = [{pipeline_mode = #tpu.pipeline_mode<synchronous>, transform_indices = @transform_0, window_bounds = array<i64: 16, 16>}, {pipeline_mode = #tpu.pipeline_mode<synchronous>, transform_indices = @transform_1, window_bounds = array<i64: 16, 384>}, {pipeline_mode = #tpu.pipeline_mode<synchronous>, transform_indices = @transform_2, window_bounds = array<i64: 128, 384>}, {pipeline_mode = #tpu.pipeline_mode<synchronous>, transform_indices = @transform_3, window_bounds = array<i64: 1, 384>}, {pipeline_mode = #tpu.pipeline_mode<synchronous>, transform_indices = @transform_4, window_bounds = array<i64: 1, 128>}, {pipeline_mode = #tpu.pipeline_mode<synchronous>, transform_indices = @transform_5, window_bounds = array<i64: 128, 384>}, {pipeline_mode = #tpu.pipeline_mode<synchronous>, transform_indices = @transform_6, window_bounds = array<i64: 128, 384>}, {pipeline_mode = #tpu.pipeline_mode<synchronous>, transform_indices = @transform_7, window_bounds = array<i64: 1, 384>}, {pipeline_mode = #tpu.pipeline_mode<synchronous>, transform_indices = @transform_8, window_bounds = array<i64: 1, 128>}, {pipeline_mode = #tpu.pipeline_mode<synchronous>, transform_indices = @transform_9, window_bounds = array<i64: 128, 1024>}, {pipeline_mode = #tpu.pipeline_mode<synchronous>, transform_indices = @transform_10, window_bounds = array<i64: 1, 1024>}, {pipeline_mode = #tpu.pipeline_mode<synchronous>, transform_indices = @transform_11, window_bounds = array<i64: 1, 1024>}, {pipeline_mode = #tpu.pipeline_mode<synchronous>, transform_indices = @transform_12, window_bounds = array<i64: 1, 1024>}, {pipeline_mode = #tpu.pipeline_mode<synchronous>, transform_indices = @transform_13, window_bounds = array<i64: 1, 1024>}, {}, {pipeline_mode = #tpu.pipeline_mode<synchronous>, transform_indices = @transform_15, window_bounds = array<i64: 2, 1024>}]} {
    tpu.enqueue_dma source(%arg15 : memref<1024x1024xbf16, #tpu.memory_space<any>>) target(%arg17 : memref<1024x1024xbf16, #tpu.memory_space<vmem>>) target_semaphore(%arg18 : memref<!tpu.dma_semaphore, #tpu.memory_space<semaphore_mem>>)
    %c0 = arith.constant 0 : index
    %c0_0 = arith.constant 0 : index
    %0 = vector.load %arg1[%c0, %c0_0] : memref<16x16xf32, #tpu.memory_space<vmem>>, vector<16x16xf32>
    %c0_1 = arith.constant 0 : index
    %c0_2 = arith.constant 0 : index
    %1 = vector.load %arg2[%c0_1, %c0_2] : memref<16x384xf32, #tpu.memory_space<vmem>>, vector<16x384xf32>
    %c0_3 = arith.constant 0 : index
    %c0_4 = arith.constant 0 : index
    %2 = vector.load %arg3[%c0_3, %c0_4] : memref<128x384xf32, #tpu.memory_space<vmem>>, vector<128x384xf32>
    %c0_5 = arith.constant 0 : index
    %c0_6 = arith.constant 0 : index
    %3 = vector.load %arg4[%c0_5, %c0_6] : memref<1x384xf32, #tpu.memory_space<vmem>>, vector<1x384xf32>
    %c0_7 = arith.constant 0 : index
    %c0_8 = arith.constant 0 : index
    %4 = vector.load %arg5[%c0_7, %c0_8] : memref<1x128xf32, #tpu.memory_space<vmem>>, vector<1x128xf32>
    %cst = arith.constant dense<0.000000e+00> : vector<16x384xf32>
    %5 = tpu.matmul %0, %1, %cst {dimension_numbers = #tpu.dot_dimension_numbers<[1], [0], [0], [1], [0, 0, 1, 1], [], []>} : vector<16x16xf32>, vector<16x384xf32>, vector<16x384xf32> -> vector<16x384xf32>
    %6 = vector.broadcast %3 : vector<1x384xf32> to vector<16x384xf32>
    %7 = arith.addf %5, %6 : vector<16x384xf32>
    %8 = vector.shape_cast %4 : vector<1x128xf32> to vector<1x128xf32>
    %9 = vector.broadcast %8 : vector<1x128xf32> to vector<2x128xf32>
    %cst_9 = arith.constant 0.000000e+00 : f32
    %10 = vector.broadcast %cst_9 : f32 to vector<2x128xf32>
    %11 = vector.extract_strided_slice %7 {offsets = [0, 0], sizes = [2, 384], strides = [1, 1]} : vector<16x384xf32> to vector<2x384xf32>
    %cst_10 = arith.constant dense<0.000000e+00> : vector<2x384xf32>
    %12 = tpu.matmul %10, %2, %cst_10 {dimension_numbers = #tpu.dot_dimension_numbers<[1], [0], [0], [1], [0, 0, 1, 1], [], []>} : vector<2x128xf32>, vector<128x384xf32>, vector<2x384xf32> -> vector<2x384xf32>
    %13 = vector.extract_strided_slice %11 {offsets = [0, 0], sizes = [2, 128], strides = [1, 1]} : vector<2x384xf32> to vector<2x128xf32>
    %14 = vector.extract_strided_slice %12 {offsets = [0, 0], sizes = [2, 128], strides = [1, 1]} : vector<2x384xf32> to vector<2x128xf32>
    %15 = arith.addf %13, %14 : vector<2x128xf32>
    %16 = arith.negf %15 : vector<2x128xf32>
    %17 = math.exp %16 : vector<2x128xf32>
    %cst_11 = arith.constant 1.000000e+00 : f32
    %18 = vector.broadcast %cst_11 : f32 to vector<2x128xf32>
    %19 = arith.addf %18, %17 : vector<2x128xf32>
    %20 = arith.divf %18, %19 : vector<2x128xf32>
    %21 = vector.extract_strided_slice %11 {offsets = [0, 128], sizes = [2, 128], strides = [1, 1]} : vector<2x384xf32> to vector<2x128xf32>
    %22 = vector.extract_strided_slice %12 {offsets = [0, 128], sizes = [2, 128], strides = [1, 1]} : vector<2x384xf32> to vector<2x128xf32>
    %23 = arith.addf %21, %22 : vector<2x128xf32>
    %24 = arith.negf %23 : vector<2x128xf32>
    %25 = math.exp %24 : vector<2x128xf32>
    %cst_12 = arith.constant 1.000000e+00 : f32
    %26 = vector.broadcast %cst_12 : f32 to vector<2x128xf32>
    %27 = arith.addf %26, %25 : vector<2x128xf32>
    %28 = arith.divf %26, %27 : vector<2x128xf32>
    %29 = vector.extract_strided_slice %11 {offsets = [0, 256], sizes = [2, 128], strides = [1, 1]} : vector<2x384xf32> to vector<2x128xf32>
    %30 = vector.extract_strided_slice %12 {offsets = [0, 256], sizes = [2, 128], strides = [1, 1]} : vector<2x384xf32> to vector<2x128xf32>
    %31 = arith.addf %30, %9 : vector<2x128xf32>
    %32 = arith.mulf %20, %31 : vector<2x128xf32>
    %33 = arith.addf %29, %32 : vector<2x128xf32>
    %34 = math.tanh %33 : vector<2x128xf32>
    %cst_13 = arith.constant 1.000000e+00 : f32
    %35 = vector.broadcast %cst_13 : f32 to vector<2x128xf32>
    %36 = arith.subf %35, %28 : vector<2x128xf32>
    %37 = arith.mulf %36, %34 : vector<2x128xf32>
    %38 = arith.mulf %28, %10 : vector<2x128xf32>
    %39 = arith.addf %37, %38 : vector<2x128xf32>
    %40 = vector.extract_strided_slice %7 {offsets = [2, 0], sizes = [2, 384], strides = [1, 1]} : vector<16x384xf32> to vector<2x384xf32>
    %cst_14 = arith.constant dense<0.000000e+00> : vector<2x384xf32>
    %41 = tpu.matmul %39, %2, %cst_14 {dimension_numbers = #tpu.dot_dimension_numbers<[1], [0], [0], [1], [0, 0, 1, 1], [], []>} : vector<2x128xf32>, vector<128x384xf32>, vector<2x384xf32> -> vector<2x384xf32>
    %42 = vector.extract_strided_slice %40 {offsets = [0, 0], sizes = [2, 128], strides = [1, 1]} : vector<2x384xf32> to vector<2x128xf32>
    %43 = vector.extract_strided_slice %41 {offsets = [0, 0], sizes = [2, 128], strides = [1, 1]} : vector<2x384xf32> to vector<2x128xf32>
    %44 = arith.addf %42, %43 : vector<2x128xf32>
    %45 = arith.negf %44 : vector<2x128xf32>
    %46 = math.exp %45 : vector<2x128xf32>
    %cst_15 = arith.constant 1.000000e+00 : f32
    %47 = vector.broadcast %cst_15 : f32 to vector<2x128xf32>
    %48 = arith.addf %47, %46 : vector<2x128xf32>
    %49 = arith.divf %47, %48 : vector<2x128xf32>
    %50 = vector.extract_strided_slice %40 {offsets = [0, 128], sizes = [2, 128], strides = [1, 1]} : vector<2x384xf32> to vector<2x128xf32>
    %51 = vector.extract_strided_slice %41 {offsets = [0, 128], sizes = [2, 128], strides = [1, 1]} : vector<2x384xf32> to vector<2x128xf32>
    %52 = arith.addf %50, %51 : vector<2x128xf32>
    %53 = arith.negf %52 : vector<2x128xf32>
    %54 = math.exp %53 : vector<2x128xf32>
    %cst_16 = arith.constant 1.000000e+00 : f32
    %55 = vector.broadcast %cst_16 : f32 to vector<2x128xf32>
    %56 = arith.addf %55, %54 : vector<2x128xf32>
    %57 = arith.divf %55, %56 : vector<2x128xf32>
    %58 = vector.extract_strided_slice %40 {offsets = [0, 256], sizes = [2, 128], strides = [1, 1]} : vector<2x384xf32> to vector<2x128xf32>
    %59 = vector.extract_strided_slice %41 {offsets = [0, 256], sizes = [2, 128], strides = [1, 1]} : vector<2x384xf32> to vector<2x128xf32>
    %60 = arith.addf %59, %9 : vector<2x128xf32>
    %61 = arith.mulf %49, %60 : vector<2x128xf32>
    %62 = arith.addf %58, %61 : vector<2x128xf32>
    %63 = math.tanh %62 : vector<2x128xf32>
    %cst_17 = arith.constant 1.000000e+00 : f32
    %64 = vector.broadcast %cst_17 : f32 to vector<2x128xf32>
    %65 = arith.subf %64, %57 : vector<2x128xf32>
    %66 = arith.mulf %65, %63 : vector<2x128xf32>
    %67 = arith.mulf %57, %39 : vector<2x128xf32>
    %68 = arith.addf %66, %67 : vector<2x128xf32>
    %69 = vector.extract_strided_slice %7 {offsets = [4, 0], sizes = [2, 384], strides = [1, 1]} : vector<16x384xf32> to vector<2x384xf32>
    %cst_18 = arith.constant dense<0.000000e+00> : vector<2x384xf32>
    %70 = tpu.matmul %68, %2, %cst_18 {dimension_numbers = #tpu.dot_dimension_numbers<[1], [0], [0], [1], [0, 0, 1, 1], [], []>} : vector<2x128xf32>, vector<128x384xf32>, vector<2x384xf32> -> vector<2x384xf32>
    %71 = vector.extract_strided_slice %69 {offsets = [0, 0], sizes = [2, 128], strides = [1, 1]} : vector<2x384xf32> to vector<2x128xf32>
    %72 = vector.extract_strided_slice %70 {offsets = [0, 0], sizes = [2, 128], strides = [1, 1]} : vector<2x384xf32> to vector<2x128xf32>
    %73 = arith.addf %71, %72 : vector<2x128xf32>
    %74 = arith.negf %73 : vector<2x128xf32>
    %75 = math.exp %74 : vector<2x128xf32>
    %cst_19 = arith.constant 1.000000e+00 : f32
    %76 = vector.broadcast %cst_19 : f32 to vector<2x128xf32>
    %77 = arith.addf %76, %75 : vector<2x128xf32>
    %78 = arith.divf %76, %77 : vector<2x128xf32>
    %79 = vector.extract_strided_slice %69 {offsets = [0, 128], sizes = [2, 128], strides = [1, 1]} : vector<2x384xf32> to vector<2x128xf32>
    %80 = vector.extract_strided_slice %70 {offsets = [0, 128], sizes = [2, 128], strides = [1, 1]} : vector<2x384xf32> to vector<2x128xf32>
    %81 = arith.addf %79, %80 : vector<2x128xf32>
    %82 = arith.negf %81 : vector<2x128xf32>
    %83 = math.exp %82 : vector<2x128xf32>
    %cst_20 = arith.constant 1.000000e+00 : f32
    %84 = vector.broadcast %cst_20 : f32 to vector<2x128xf32>
    %85 = arith.addf %84, %83 : vector<2x128xf32>
    %86 = arith.divf %84, %85 : vector<2x128xf32>
    %87 = vector.extract_strided_slice %69 {offsets = [0, 256], sizes = [2, 128], strides = [1, 1]} : vector<2x384xf32> to vector<2x128xf32>
    %88 = vector.extract_strided_slice %70 {offsets = [0, 256], sizes = [2, 128], strides = [1, 1]} : vector<2x384xf32> to vector<2x128xf32>
    %89 = arith.addf %88, %9 : vector<2x128xf32>
    %90 = arith.mulf %78, %89 : vector<2x128xf32>
    %91 = arith.addf %87, %90 : vector<2x128xf32>
    %92 = math.tanh %91 : vector<2x128xf32>
    %cst_21 = arith.constant 1.000000e+00 : f32
    %93 = vector.broadcast %cst_21 : f32 to vector<2x128xf32>
    %94 = arith.subf %93, %86 : vector<2x128xf32>
    %95 = arith.mulf %94, %92 : vector<2x128xf32>
    %96 = arith.mulf %86, %68 : vector<2x128xf32>
    %97 = arith.addf %95, %96 : vector<2x128xf32>
    %98 = vector.extract_strided_slice %7 {offsets = [6, 0], sizes = [2, 384], strides = [1, 1]} : vector<16x384xf32> to vector<2x384xf32>
    %cst_22 = arith.constant dense<0.000000e+00> : vector<2x384xf32>
    %99 = tpu.matmul %97, %2, %cst_22 {dimension_numbers = #tpu.dot_dimension_numbers<[1], [0], [0], [1], [0, 0, 1, 1], [], []>} : vector<2x128xf32>, vector<128x384xf32>, vector<2x384xf32> -> vector<2x384xf32>
    %100 = vector.extract_strided_slice %98 {offsets = [0, 0], sizes = [2, 128], strides = [1, 1]} : vector<2x384xf32> to vector<2x128xf32>
    %101 = vector.extract_strided_slice %99 {offsets = [0, 0], sizes = [2, 128], strides = [1, 1]} : vector<2x384xf32> to vector<2x128xf32>
    %102 = arith.addf %100, %101 : vector<2x128xf32>
    %103 = arith.negf %102 : vector<2x128xf32>
    %104 = math.exp %103 : vector<2x128xf32>
    %cst_23 = arith.constant 1.000000e+00 : f32
    %105 = vector.broadcast %cst_23 : f32 to vector<2x128xf32>
    %106 = arith.addf %105, %104 : vector<2x128xf32>
    %107 = arith.divf %105, %106 : vector<2x128xf32>
    %108 = vector.extract_strided_slice %98 {offsets = [0, 128], sizes = [2, 128], strides = [1, 1]} : vector<2x384xf32> to vector<2x128xf32>
    %109 = vector.extract_strided_slice %99 {offsets = [0, 128], sizes = [2, 128], strides = [1, 1]} : vector<2x384xf32> to vector<2x128xf32>
    %110 = arith.addf %108, %109 : vector<2x128xf32>
    %111 = arith.negf %110 : vector<2x128xf32>
    %112 = math.exp %111 : vector<2x128xf32>
    %cst_24 = arith.constant 1.000000e+00 : f32
    %113 = vector.broadcast %cst_24 : f32 to vector<2x128xf32>
    %114 = arith.addf %113, %112 : vector<2x128xf32>
    %115 = arith.divf %113, %114 : vector<2x128xf32>
    %116 = vector.extract_strided_slice %98 {offsets = [0, 256], sizes = [2, 128], strides = [1, 1]} : vector<2x384xf32> to vector<2x128xf32>
    %117 = vector.extract_strided_slice %99 {offsets = [0, 256], sizes = [2, 128], strides = [1, 1]} : vector<2x384xf32> to vector<2x128xf32>
    %118 = arith.addf %117, %9 : vector<2x128xf32>
    %119 = arith.mulf %107, %118 : vector<2x128xf32>
    %120 = arith.addf %116, %119 : vector<2x128xf32>
    %121 = math.tanh %120 : vector<2x128xf32>
    %cst_25 = arith.constant 1.000000e+00 : f32
    %122 = vector.broadcast %cst_25 : f32 to vector<2x128xf32>
    %123 = arith.subf %122, %115 : vector<2x128xf32>
    %124 = arith.mulf %123, %121 : vector<2x128xf32>
    %125 = arith.mulf %115, %97 : vector<2x128xf32>
    %126 = arith.addf %124, %125 : vector<2x128xf32>
    %127 = vector.extract_strided_slice %7 {offsets = [8, 0], sizes = [2, 384], strides = [1, 1]} : vector<16x384xf32> to vector<2x384xf32>
    %cst_26 = arith.constant dense<0.000000e+00> : vector<2x384xf32>
    %128 = tpu.matmul %126, %2, %cst_26 {dimension_numbers = #tpu.dot_dimension_numbers<[1], [0], [0], [1], [0, 0, 1, 1], [], []>} : vector<2x128xf32>, vector<128x384xf32>, vector<2x384xf32> -> vector<2x384xf32>
    %129 = vector.extract_strided_slice %127 {offsets = [0, 0], sizes = [2, 128], strides = [1, 1]} : vector<2x384xf32> to vector<2x128xf32>
    %130 = vector.extract_strided_slice %128 {offsets = [0, 0], sizes = [2, 128], strides = [1, 1]} : vector<2x384xf32> to vector<2x128xf32>
    %131 = arith.addf %129, %130 : vector<2x128xf32>
    %132 = arith.negf %131 : vector<2x128xf32>
    %133 = math.exp %132 : vector<2x128xf32>
    %cst_27 = arith.constant 1.000000e+00 : f32
    %134 = vector.broadcast %cst_27 : f32 to vector<2x128xf32>
    %135 = arith.addf %134, %133 : vector<2x128xf32>
    %136 = arith.divf %134, %135 : vector<2x128xf32>
    %137 = vector.extract_strided_slice %127 {offsets = [0, 128], sizes = [2, 128], strides = [1, 1]} : vector<2x384xf32> to vector<2x128xf32>
    %138 = vector.extract_strided_slice %128 {offsets = [0, 128], sizes = [2, 128], strides = [1, 1]} : vector<2x384xf32> to vector<2x128xf32>
    %139 = arith.addf %137, %138 : vector<2x128xf32>
    %140 = arith.negf %139 : vector<2x128xf32>
    %141 = math.exp %140 : vector<2x128xf32>
    %cst_28 = arith.constant 1.000000e+00 : f32
    %142 = vector.broadcast %cst_28 : f32 to vector<2x128xf32>
    %143 = arith.addf %142, %141 : vector<2x128xf32>
    %144 = arith.divf %142, %143 : vector<2x128xf32>
    %145 = vector.extract_strided_slice %127 {offsets = [0, 256], sizes = [2, 128], strides = [1, 1]} : vector<2x384xf32> to vector<2x128xf32>
    %146 = vector.extract_strided_slice %128 {offsets = [0, 256], sizes = [2, 128], strides = [1, 1]} : vector<2x384xf32> to vector<2x128xf32>
    %147 = arith.addf %146, %9 : vector<2x128xf32>
    %148 = arith.mulf %136, %147 : vector<2x128xf32>
    %149 = arith.addf %145, %148 : vector<2x128xf32>
    %150 = math.tanh %149 : vector<2x128xf32>
    %cst_29 = arith.constant 1.000000e+00 : f32
    %151 = vector.broadcast %cst_29 : f32 to vector<2x128xf32>
    %152 = arith.subf %151, %144 : vector<2x128xf32>
    %153 = arith.mulf %152, %150 : vector<2x128xf32>
    %154 = arith.mulf %144, %126 : vector<2x128xf32>
    %155 = arith.addf %153, %154 : vector<2x128xf32>
    %156 = vector.extract_strided_slice %7 {offsets = [10, 0], sizes = [2, 384], strides = [1, 1]} : vector<16x384xf32> to vector<2x384xf32>
    %cst_30 = arith.constant dense<0.000000e+00> : vector<2x384xf32>
    %157 = tpu.matmul %155, %2, %cst_30 {dimension_numbers = #tpu.dot_dimension_numbers<[1], [0], [0], [1], [0, 0, 1, 1], [], []>} : vector<2x128xf32>, vector<128x384xf32>, vector<2x384xf32> -> vector<2x384xf32>
    %158 = vector.extract_strided_slice %156 {offsets = [0, 0], sizes = [2, 128], strides = [1, 1]} : vector<2x384xf32> to vector<2x128xf32>
    %159 = vector.extract_strided_slice %157 {offsets = [0, 0], sizes = [2, 128], strides = [1, 1]} : vector<2x384xf32> to vector<2x128xf32>
    %160 = arith.addf %158, %159 : vector<2x128xf32>
    %161 = arith.negf %160 : vector<2x128xf32>
    %162 = math.exp %161 : vector<2x128xf32>
    %cst_31 = arith.constant 1.000000e+00 : f32
    %163 = vector.broadcast %cst_31 : f32 to vector<2x128xf32>
    %164 = arith.addf %163, %162 : vector<2x128xf32>
    %165 = arith.divf %163, %164 : vector<2x128xf32>
    %166 = vector.extract_strided_slice %156 {offsets = [0, 128], sizes = [2, 128], strides = [1, 1]} : vector<2x384xf32> to vector<2x128xf32>
    %167 = vector.extract_strided_slice %157 {offsets = [0, 128], sizes = [2, 128], strides = [1, 1]} : vector<2x384xf32> to vector<2x128xf32>
    %168 = arith.addf %166, %167 : vector<2x128xf32>
    %169 = arith.negf %168 : vector<2x128xf32>
    %170 = math.exp %169 : vector<2x128xf32>
    %cst_32 = arith.constant 1.000000e+00 : f32
    %171 = vector.broadcast %cst_32 : f32 to vector<2x128xf32>
    %172 = arith.addf %171, %170 : vector<2x128xf32>
    %173 = arith.divf %171, %172 : vector<2x128xf32>
    %174 = vector.extract_strided_slice %156 {offsets = [0, 256], sizes = [2, 128], strides = [1, 1]} : vector<2x384xf32> to vector<2x128xf32>
    %175 = vector.extract_strided_slice %157 {offsets = [0, 256], sizes = [2, 128], strides = [1, 1]} : vector<2x384xf32> to vector<2x128xf32>
    %176 = arith.addf %175, %9 : vector<2x128xf32>
    %177 = arith.mulf %165, %176 : vector<2x128xf32>
    %178 = arith.addf %174, %177 : vector<2x128xf32>
    %179 = math.tanh %178 : vector<2x128xf32>
    %cst_33 = arith.constant 1.000000e+00 : f32
    %180 = vector.broadcast %cst_33 : f32 to vector<2x128xf32>
    %181 = arith.subf %180, %173 : vector<2x128xf32>
    %182 = arith.mulf %181, %179 : vector<2x128xf32>
    %183 = arith.mulf %173, %155 : vector<2x128xf32>
    %184 = arith.addf %182, %183 : vector<2x128xf32>
    %185 = vector.extract_strided_slice %7 {offsets = [12, 0], sizes = [2, 384], strides = [1, 1]} : vector<16x384xf32> to vector<2x384xf32>
    %cst_34 = arith.constant dense<0.000000e+00> : vector<2x384xf32>
    %186 = tpu.matmul %184, %2, %cst_34 {dimension_numbers = #tpu.dot_dimension_numbers<[1], [0], [0], [1], [0, 0, 1, 1], [], []>} : vector<2x128xf32>, vector<128x384xf32>, vector<2x384xf32> -> vector<2x384xf32>
    %187 = vector.extract_strided_slice %185 {offsets = [0, 0], sizes = [2, 128], strides = [1, 1]} : vector<2x384xf32> to vector<2x128xf32>
    %188 = vector.extract_strided_slice %186 {offsets = [0, 0], sizes = [2, 128], strides = [1, 1]} : vector<2x384xf32> to vector<2x128xf32>
    %189 = arith.addf %187, %188 : vector<2x128xf32>
    %190 = arith.negf %189 : vector<2x128xf32>
    %191 = math.exp %190 : vector<2x128xf32>
    %cst_35 = arith.constant 1.000000e+00 : f32
    %192 = vector.broadcast %cst_35 : f32 to vector<2x128xf32>
    %193 = arith.addf %192, %191 : vector<2x128xf32>
    %194 = arith.divf %192, %193 : vector<2x128xf32>
    %195 = vector.extract_strided_slice %185 {offsets = [0, 128], sizes = [2, 128], strides = [1, 1]} : vector<2x384xf32> to vector<2x128xf32>
    %196 = vector.extract_strided_slice %186 {offsets = [0, 128], sizes = [2, 128], strides = [1, 1]} : vector<2x384xf32> to vector<2x128xf32>
    %197 = arith.addf %195, %196 : vector<2x128xf32>
    %198 = arith.negf %197 : vector<2x128xf32>
    %199 = math.exp %198 : vector<2x128xf32>
    %cst_36 = arith.constant 1.000000e+00 : f32
    %200 = vector.broadcast %cst_36 : f32 to vector<2x128xf32>
    %201 = arith.addf %200, %199 : vector<2x128xf32>
    %202 = arith.divf %200, %201 : vector<2x128xf32>
    %203 = vector.extract_strided_slice %185 {offsets = [0, 256], sizes = [2, 128], strides = [1, 1]} : vector<2x384xf32> to vector<2x128xf32>
    %204 = vector.extract_strided_slice %186 {offsets = [0, 256], sizes = [2, 128], strides = [1, 1]} : vector<2x384xf32> to vector<2x128xf32>
    %205 = arith.addf %204, %9 : vector<2x128xf32>
    %206 = arith.mulf %194, %205 : vector<2x128xf32>
    %207 = arith.addf %203, %206 : vector<2x128xf32>
    %208 = math.tanh %207 : vector<2x128xf32>
    %cst_37 = arith.constant 1.000000e+00 : f32
    %209 = vector.broadcast %cst_37 : f32 to vector<2x128xf32>
    %210 = arith.subf %209, %202 : vector<2x128xf32>
    %211 = arith.mulf %210, %208 : vector<2x128xf32>
    %212 = arith.mulf %202, %184 : vector<2x128xf32>
    %213 = arith.addf %211, %212 : vector<2x128xf32>
    %214 = vector.extract_strided_slice %7 {offsets = [14, 0], sizes = [2, 384], strides = [1, 1]} : vector<16x384xf32> to vector<2x384xf32>
    %cst_38 = arith.constant dense<0.000000e+00> : vector<2x384xf32>
    %215 = tpu.matmul %213, %2, %cst_38 {dimension_numbers = #tpu.dot_dimension_numbers<[1], [0], [0], [1], [0, 0, 1, 1], [], []>} : vector<2x128xf32>, vector<128x384xf32>, vector<2x384xf32> -> vector<2x384xf32>
    %216 = vector.extract_strided_slice %214 {offsets = [0, 0], sizes = [2, 128], strides = [1, 1]} : vector<2x384xf32> to vector<2x128xf32>
    %217 = vector.extract_strided_slice %215 {offsets = [0, 0], sizes = [2, 128], strides = [1, 1]} : vector<2x384xf32> to vector<2x128xf32>
    %218 = arith.addf %216, %217 : vector<2x128xf32>
    %219 = arith.negf %218 : vector<2x128xf32>
    %220 = math.exp %219 : vector<2x128xf32>
    %cst_39 = arith.constant 1.000000e+00 : f32
    %221 = vector.broadcast %cst_39 : f32 to vector<2x128xf32>
    %222 = arith.addf %221, %220 : vector<2x128xf32>
    %223 = arith.divf %221, %222 : vector<2x128xf32>
    %224 = vector.extract_strided_slice %214 {offsets = [0, 128], sizes = [2, 128], strides = [1, 1]} : vector<2x384xf32> to vector<2x128xf32>
    %225 = vector.extract_strided_slice %215 {offsets = [0, 128], sizes = [2, 128], strides = [1, 1]} : vector<2x384xf32> to vector<2x128xf32>
    %226 = arith.addf %224, %225 : vector<2x128xf32>
    %227 = arith.negf %226 : vector<2x128xf32>
    %228 = math.exp %227 : vector<2x128xf32>
    %cst_40 = arith.constant 1.000000e+00 : f32
    %229 = vector.broadcast %cst_40 : f32 to vector<2x128xf32>
    %230 = arith.addf %229, %228 : vector<2x128xf32>
    %231 = arith.divf %229, %230 : vector<2x128xf32>
    %232 = vector.extract_strided_slice %214 {offsets = [0, 256], sizes = [2, 128], strides = [1, 1]} : vector<2x384xf32> to vector<2x128xf32>
    %233 = vector.extract_strided_slice %215 {offsets = [0, 256], sizes = [2, 128], strides = [1, 1]} : vector<2x384xf32> to vector<2x128xf32>
    %234 = arith.addf %233, %9 : vector<2x128xf32>
    %235 = arith.mulf %223, %234 : vector<2x128xf32>
    %236 = arith.addf %232, %235 : vector<2x128xf32>
    %237 = math.tanh %236 : vector<2x128xf32>
    %cst_41 = arith.constant 1.000000e+00 : f32
    %238 = vector.broadcast %cst_41 : f32 to vector<2x128xf32>
    %239 = arith.subf %238, %231 : vector<2x128xf32>
    %240 = arith.mulf %239, %237 : vector<2x128xf32>
    %241 = arith.mulf %231, %213 : vector<2x128xf32>
    %242 = arith.addf %240, %241 : vector<2x128xf32>
    %243 = tpu.concatenate %39, %68, %97, %126, %155, %184, %213, %242 in 0 : vector<2x128xf32>, vector<2x128xf32>, vector<2x128xf32>, vector<2x128xf32>, vector<2x128xf32>, vector<2x128xf32>, vector<2x128xf32>, vector<2x128xf32> -> vector<16x128xf32>
    %c0_42 = arith.constant 0 : index
    %c0_43 = arith.constant 0 : index
    %244 = vector.load %arg6[%c0_42, %c0_43] : memref<128x384xf32, #tpu.memory_space<vmem>>, vector<128x384xf32>
    %c0_44 = arith.constant 0 : index
    %c0_45 = arith.constant 0 : index
    %245 = vector.load %arg7[%c0_44, %c0_45] : memref<128x384xf32, #tpu.memory_space<vmem>>, vector<128x384xf32>
    %c0_46 = arith.constant 0 : index
    %c0_47 = arith.constant 0 : index
    %246 = vector.load %arg8[%c0_46, %c0_47] : memref<1x384xf32, #tpu.memory_space<vmem>>, vector<1x384xf32>
    %c0_48 = arith.constant 0 : index
    %c0_49 = arith.constant 0 : index
    %247 = vector.load %arg9[%c0_48, %c0_49] : memref<1x128xf32, #tpu.memory_space<vmem>>, vector<1x128xf32>
    %cst_50 = arith.constant dense<0.000000e+00> : vector<16x384xf32>
    %248 = tpu.matmul %243, %244, %cst_50 {dimension_numbers = #tpu.dot_dimension_numbers<[1], [0], [0], [1], [0, 0, 1, 1], [], []>} : vector<16x128xf32>, vector<128x384xf32>, vector<16x384xf32> -> vector<16x384xf32>
    %249 = vector.broadcast %246 : vector<1x384xf32> to vector<16x384xf32>
    %250 = arith.addf %248, %249 : vector<16x384xf32>
    %251 = vector.shape_cast %247 : vector<1x128xf32> to vector<1x128xf32>
    %252 = vector.broadcast %251 : vector<1x128xf32> to vector<2x128xf32>
    %cst_51 = arith.constant 0.000000e+00 : f32
    %253 = vector.broadcast %cst_51 : f32 to vector<2x128xf32>
    %254 = vector.extract_strided_slice %250 {offsets = [0, 0], sizes = [2, 384], strides = [1, 1]} : vector<16x384xf32> to vector<2x384xf32>
    %cst_52 = arith.constant dense<0.000000e+00> : vector<2x384xf32>
    %255 = tpu.matmul %253, %245, %cst_52 {dimension_numbers = #tpu.dot_dimension_numbers<[1], [0], [0], [1], [0, 0, 1, 1], [], []>} : vector<2x128xf32>, vector<128x384xf32>, vector<2x384xf32> -> vector<2x384xf32>
    %256 = vector.extract_strided_slice %254 {offsets = [0, 0], sizes = [2, 128], strides = [1, 1]} : vector<2x384xf32> to vector<2x128xf32>
    %257 = vector.extract_strided_slice %255 {offsets = [0, 0], sizes = [2, 128], strides = [1, 1]} : vector<2x384xf32> to vector<2x128xf32>
    %258 = arith.addf %256, %257 : vector<2x128xf32>
    %259 = arith.negf %258 : vector<2x128xf32>
    %260 = math.exp %259 : vector<2x128xf32>
    %cst_53 = arith.constant 1.000000e+00 : f32
    %261 = vector.broadcast %cst_53 : f32 to vector<2x128xf32>
    %262 = arith.addf %261, %260 : vector<2x128xf32>
    %263 = arith.divf %261, %262 : vector<2x128xf32>
    %264 = vector.extract_strided_slice %254 {offsets = [0, 128], sizes = [2, 128], strides = [1, 1]} : vector<2x384xf32> to vector<2x128xf32>
    %265 = vector.extract_strided_slice %255 {offsets = [0, 128], sizes = [2, 128], strides = [1, 1]} : vector<2x384xf32> to vector<2x128xf32>
    %266 = arith.addf %264, %265 : vector<2x128xf32>
    %267 = arith.negf %266 : vector<2x128xf32>
    %268 = math.exp %267 : vector<2x128xf32>
    %cst_54 = arith.constant 1.000000e+00 : f32
    %269 = vector.broadcast %cst_54 : f32 to vector<2x128xf32>
    %270 = arith.addf %269, %268 : vector<2x128xf32>
    %271 = arith.divf %269, %270 : vector<2x128xf32>
    %272 = vector.extract_strided_slice %254 {offsets = [0, 256], sizes = [2, 128], strides = [1, 1]} : vector<2x384xf32> to vector<2x128xf32>
    %273 = vector.extract_strided_slice %255 {offsets = [0, 256], sizes = [2, 128], strides = [1, 1]} : vector<2x384xf32> to vector<2x128xf32>
    %274 = arith.addf %273, %252 : vector<2x128xf32>
    %275 = arith.mulf %263, %274 : vector<2x128xf32>
    %276 = arith.addf %272, %275 : vector<2x128xf32>
    %277 = math.tanh %276 : vector<2x128xf32>
    %cst_55 = arith.constant 1.000000e+00 : f32
    %278 = vector.broadcast %cst_55 : f32 to vector<2x128xf32>
    %279 = arith.subf %278, %271 : vector<2x128xf32>
    %280 = arith.mulf %279, %277 : vector<2x128xf32>
    %281 = arith.mulf %271, %253 : vector<2x128xf32>
    %282 = arith.addf %280, %281 : vector<2x128xf32>
    %283 = vector.extract_strided_slice %250 {offsets = [2, 0], sizes = [2, 384], strides = [1, 1]} : vector<16x384xf32> to vector<2x384xf32>
    %cst_56 = arith.constant dense<0.000000e+00> : vector<2x384xf32>
    %284 = tpu.matmul %282, %245, %cst_56 {dimension_numbers = #tpu.dot_dimension_numbers<[1], [0], [0], [1], [0, 0, 1, 1], [], []>} : vector<2x128xf32>, vector<128x384xf32>, vector<2x384xf32> -> vector<2x384xf32>
    %285 = vector.extract_strided_slice %283 {offsets = [0, 0], sizes = [2, 128], strides = [1, 1]} : vector<2x384xf32> to vector<2x128xf32>
    %286 = vector.extract_strided_slice %284 {offsets = [0, 0], sizes = [2, 128], strides = [1, 1]} : vector<2x384xf32> to vector<2x128xf32>
    %287 = arith.addf %285, %286 : vector<2x128xf32>
    %288 = arith.negf %287 : vector<2x128xf32>
    %289 = math.exp %288 : vector<2x128xf32>
    %cst_57 = arith.constant 1.000000e+00 : f32
    %290 = vector.broadcast %cst_57 : f32 to vector<2x128xf32>
    %291 = arith.addf %290, %289 : vector<2x128xf32>
    %292 = arith.divf %290, %291 : vector<2x128xf32>
    %293 = vector.extract_strided_slice %283 {offsets = [0, 128], sizes = [2, 128], strides = [1, 1]} : vector<2x384xf32> to vector<2x128xf32>
    %294 = vector.extract_strided_slice %284 {offsets = [0, 128], sizes = [2, 128], strides = [1, 1]} : vector<2x384xf32> to vector<2x128xf32>
    %295 = arith.addf %293, %294 : vector<2x128xf32>
    %296 = arith.negf %295 : vector<2x128xf32>
    %297 = math.exp %296 : vector<2x128xf32>
    %cst_58 = arith.constant 1.000000e+00 : f32
    %298 = vector.broadcast %cst_58 : f32 to vector<2x128xf32>
    %299 = arith.addf %298, %297 : vector<2x128xf32>
    %300 = arith.divf %298, %299 : vector<2x128xf32>
    %301 = vector.extract_strided_slice %283 {offsets = [0, 256], sizes = [2, 128], strides = [1, 1]} : vector<2x384xf32> to vector<2x128xf32>
    %302 = vector.extract_strided_slice %284 {offsets = [0, 256], sizes = [2, 128], strides = [1, 1]} : vector<2x384xf32> to vector<2x128xf32>
    %303 = arith.addf %302, %252 : vector<2x128xf32>
    %304 = arith.mulf %292, %303 : vector<2x128xf32>
    %305 = arith.addf %301, %304 : vector<2x128xf32>
    %306 = math.tanh %305 : vector<2x128xf32>
    %cst_59 = arith.constant 1.000000e+00 : f32
    %307 = vector.broadcast %cst_59 : f32 to vector<2x128xf32>
    %308 = arith.subf %307, %300 : vector<2x128xf32>
    %309 = arith.mulf %308, %306 : vector<2x128xf32>
    %310 = arith.mulf %300, %282 : vector<2x128xf32>
    %311 = arith.addf %309, %310 : vector<2x128xf32>
    %312 = vector.extract_strided_slice %250 {offsets = [4, 0], sizes = [2, 384], strides = [1, 1]} : vector<16x384xf32> to vector<2x384xf32>
    %cst_60 = arith.constant dense<0.000000e+00> : vector<2x384xf32>
    %313 = tpu.matmul %311, %245, %cst_60 {dimension_numbers = #tpu.dot_dimension_numbers<[1], [0], [0], [1], [0, 0, 1, 1], [], []>} : vector<2x128xf32>, vector<128x384xf32>, vector<2x384xf32> -> vector<2x384xf32>
    %314 = vector.extract_strided_slice %312 {offsets = [0, 0], sizes = [2, 128], strides = [1, 1]} : vector<2x384xf32> to vector<2x128xf32>
    %315 = vector.extract_strided_slice %313 {offsets = [0, 0], sizes = [2, 128], strides = [1, 1]} : vector<2x384xf32> to vector<2x128xf32>
    %316 = arith.addf %314, %315 : vector<2x128xf32>
    %317 = arith.negf %316 : vector<2x128xf32>
    %318 = math.exp %317 : vector<2x128xf32>
    %cst_61 = arith.constant 1.000000e+00 : f32
    %319 = vector.broadcast %cst_61 : f32 to vector<2x128xf32>
    %320 = arith.addf %319, %318 : vector<2x128xf32>
    %321 = arith.divf %319, %320 : vector<2x128xf32>
    %322 = vector.extract_strided_slice %312 {offsets = [0, 128], sizes = [2, 128], strides = [1, 1]} : vector<2x384xf32> to vector<2x128xf32>
    %323 = vector.extract_strided_slice %313 {offsets = [0, 128], sizes = [2, 128], strides = [1, 1]} : vector<2x384xf32> to vector<2x128xf32>
    %324 = arith.addf %322, %323 : vector<2x128xf32>
    %325 = arith.negf %324 : vector<2x128xf32>
    %326 = math.exp %325 : vector<2x128xf32>
    %cst_62 = arith.constant 1.000000e+00 : f32
    %327 = vector.broadcast %cst_62 : f32 to vector<2x128xf32>
    %328 = arith.addf %327, %326 : vector<2x128xf32>
    %329 = arith.divf %327, %328 : vector<2x128xf32>
    %330 = vector.extract_strided_slice %312 {offsets = [0, 256], sizes = [2, 128], strides = [1, 1]} : vector<2x384xf32> to vector<2x128xf32>
    %331 = vector.extract_strided_slice %313 {offsets = [0, 256], sizes = [2, 128], strides = [1, 1]} : vector<2x384xf32> to vector<2x128xf32>
    %332 = arith.addf %331, %252 : vector<2x128xf32>
    %333 = arith.mulf %321, %332 : vector<2x128xf32>
    %334 = arith.addf %330, %333 : vector<2x128xf32>
    %335 = math.tanh %334 : vector<2x128xf32>
    %cst_63 = arith.constant 1.000000e+00 : f32
    %336 = vector.broadcast %cst_63 : f32 to vector<2x128xf32>
    %337 = arith.subf %336, %329 : vector<2x128xf32>
    %338 = arith.mulf %337, %335 : vector<2x128xf32>
    %339 = arith.mulf %329, %311 : vector<2x128xf32>
    %340 = arith.addf %338, %339 : vector<2x128xf32>
    %341 = vector.extract_strided_slice %250 {offsets = [6, 0], sizes = [2, 384], strides = [1, 1]} : vector<16x384xf32> to vector<2x384xf32>
    %cst_64 = arith.constant dense<0.000000e+00> : vector<2x384xf32>
    %342 = tpu.matmul %340, %245, %cst_64 {dimension_numbers = #tpu.dot_dimension_numbers<[1], [0], [0], [1], [0, 0, 1, 1], [], []>} : vector<2x128xf32>, vector<128x384xf32>, vector<2x384xf32> -> vector<2x384xf32>
    %343 = vector.extract_strided_slice %341 {offsets = [0, 0], sizes = [2, 128], strides = [1, 1]} : vector<2x384xf32> to vector<2x128xf32>
    %344 = vector.extract_strided_slice %342 {offsets = [0, 0], sizes = [2, 128], strides = [1, 1]} : vector<2x384xf32> to vector<2x128xf32>
    %345 = arith.addf %343, %344 : vector<2x128xf32>
    %346 = arith.negf %345 : vector<2x128xf32>
    %347 = math.exp %346 : vector<2x128xf32>
    %cst_65 = arith.constant 1.000000e+00 : f32
    %348 = vector.broadcast %cst_65 : f32 to vector<2x128xf32>
    %349 = arith.addf %348, %347 : vector<2x128xf32>
    %350 = arith.divf %348, %349 : vector<2x128xf32>
    %351 = vector.extract_strided_slice %341 {offsets = [0, 128], sizes = [2, 128], strides = [1, 1]} : vector<2x384xf32> to vector<2x128xf32>
    %352 = vector.extract_strided_slice %342 {offsets = [0, 128], sizes = [2, 128], strides = [1, 1]} : vector<2x384xf32> to vector<2x128xf32>
    %353 = arith.addf %351, %352 : vector<2x128xf32>
    %354 = arith.negf %353 : vector<2x128xf32>
    %355 = math.exp %354 : vector<2x128xf32>
    %cst_66 = arith.constant 1.000000e+00 : f32
    %356 = vector.broadcast %cst_66 : f32 to vector<2x128xf32>
    %357 = arith.addf %356, %355 : vector<2x128xf32>
    %358 = arith.divf %356, %357 : vector<2x128xf32>
    %359 = vector.extract_strided_slice %341 {offsets = [0, 256], sizes = [2, 128], strides = [1, 1]} : vector<2x384xf32> to vector<2x128xf32>
    %360 = vector.extract_strided_slice %342 {offsets = [0, 256], sizes = [2, 128], strides = [1, 1]} : vector<2x384xf32> to vector<2x128xf32>
    %361 = arith.addf %360, %252 : vector<2x128xf32>
    %362 = arith.mulf %350, %361 : vector<2x128xf32>
    %363 = arith.addf %359, %362 : vector<2x128xf32>
    %364 = math.tanh %363 : vector<2x128xf32>
    %cst_67 = arith.constant 1.000000e+00 : f32
    %365 = vector.broadcast %cst_67 : f32 to vector<2x128xf32>
    %366 = arith.subf %365, %358 : vector<2x128xf32>
    %367 = arith.mulf %366, %364 : vector<2x128xf32>
    %368 = arith.mulf %358, %340 : vector<2x128xf32>
    %369 = arith.addf %367, %368 : vector<2x128xf32>
    %370 = vector.extract_strided_slice %250 {offsets = [8, 0], sizes = [2, 384], strides = [1, 1]} : vector<16x384xf32> to vector<2x384xf32>
    %cst_68 = arith.constant dense<0.000000e+00> : vector<2x384xf32>
    %371 = tpu.matmul %369, %245, %cst_68 {dimension_numbers = #tpu.dot_dimension_numbers<[1], [0], [0], [1], [0, 0, 1, 1], [], []>} : vector<2x128xf32>, vector<128x384xf32>, vector<2x384xf32> -> vector<2x384xf32>
    %372 = vector.extract_strided_slice %370 {offsets = [0, 0], sizes = [2, 128], strides = [1, 1]} : vector<2x384xf32> to vector<2x128xf32>
    %373 = vector.extract_strided_slice %371 {offsets = [0, 0], sizes = [2, 128], strides = [1, 1]} : vector<2x384xf32> to vector<2x128xf32>
    %374 = arith.addf %372, %373 : vector<2x128xf32>
    %375 = arith.negf %374 : vector<2x128xf32>
    %376 = math.exp %375 : vector<2x128xf32>
    %cst_69 = arith.constant 1.000000e+00 : f32
    %377 = vector.broadcast %cst_69 : f32 to vector<2x128xf32>
    %378 = arith.addf %377, %376 : vector<2x128xf32>
    %379 = arith.divf %377, %378 : vector<2x128xf32>
    %380 = vector.extract_strided_slice %370 {offsets = [0, 128], sizes = [2, 128], strides = [1, 1]} : vector<2x384xf32> to vector<2x128xf32>
    %381 = vector.extract_strided_slice %371 {offsets = [0, 128], sizes = [2, 128], strides = [1, 1]} : vector<2x384xf32> to vector<2x128xf32>
    %382 = arith.addf %380, %381 : vector<2x128xf32>
    %383 = arith.negf %382 : vector<2x128xf32>
    %384 = math.exp %383 : vector<2x128xf32>
    %cst_70 = arith.constant 1.000000e+00 : f32
    %385 = vector.broadcast %cst_70 : f32 to vector<2x128xf32>
    %386 = arith.addf %385, %384 : vector<2x128xf32>
    %387 = arith.divf %385, %386 : vector<2x128xf32>
    %388 = vector.extract_strided_slice %370 {offsets = [0, 256], sizes = [2, 128], strides = [1, 1]} : vector<2x384xf32> to vector<2x128xf32>
    %389 = vector.extract_strided_slice %371 {offsets = [0, 256], sizes = [2, 128], strides = [1, 1]} : vector<2x384xf32> to vector<2x128xf32>
    %390 = arith.addf %389, %252 : vector<2x128xf32>
    %391 = arith.mulf %379, %390 : vector<2x128xf32>
    %392 = arith.addf %388, %391 : vector<2x128xf32>
    %393 = math.tanh %392 : vector<2x128xf32>
    %cst_71 = arith.constant 1.000000e+00 : f32
    %394 = vector.broadcast %cst_71 : f32 to vector<2x128xf32>
    %395 = arith.subf %394, %387 : vector<2x128xf32>
    %396 = arith.mulf %395, %393 : vector<2x128xf32>
    %397 = arith.mulf %387, %369 : vector<2x128xf32>
    %398 = arith.addf %396, %397 : vector<2x128xf32>
    %399 = vector.extract_strided_slice %250 {offsets = [10, 0], sizes = [2, 384], strides = [1, 1]} : vector<16x384xf32> to vector<2x384xf32>
    %cst_72 = arith.constant dense<0.000000e+00> : vector<2x384xf32>
    %400 = tpu.matmul %398, %245, %cst_72 {dimension_numbers = #tpu.dot_dimension_numbers<[1], [0], [0], [1], [0, 0, 1, 1], [], []>} : vector<2x128xf32>, vector<128x384xf32>, vector<2x384xf32> -> vector<2x384xf32>
    %401 = vector.extract_strided_slice %399 {offsets = [0, 0], sizes = [2, 128], strides = [1, 1]} : vector<2x384xf32> to vector<2x128xf32>
    %402 = vector.extract_strided_slice %400 {offsets = [0, 0], sizes = [2, 128], strides = [1, 1]} : vector<2x384xf32> to vector<2x128xf32>
    %403 = arith.addf %401, %402 : vector<2x128xf32>
    %404 = arith.negf %403 : vector<2x128xf32>
    %405 = math.exp %404 : vector<2x128xf32>
    %cst_73 = arith.constant 1.000000e+00 : f32
    %406 = vector.broadcast %cst_73 : f32 to vector<2x128xf32>
    %407 = arith.addf %406, %405 : vector<2x128xf32>
    %408 = arith.divf %406, %407 : vector<2x128xf32>
    %409 = vector.extract_strided_slice %399 {offsets = [0, 128], sizes = [2, 128], strides = [1, 1]} : vector<2x384xf32> to vector<2x128xf32>
    %410 = vector.extract_strided_slice %400 {offsets = [0, 128], sizes = [2, 128], strides = [1, 1]} : vector<2x384xf32> to vector<2x128xf32>
    %411 = arith.addf %409, %410 : vector<2x128xf32>
    %412 = arith.negf %411 : vector<2x128xf32>
    %413 = math.exp %412 : vector<2x128xf32>
    %cst_74 = arith.constant 1.000000e+00 : f32
    %414 = vector.broadcast %cst_74 : f32 to vector<2x128xf32>
    %415 = arith.addf %414, %413 : vector<2x128xf32>
    %416 = arith.divf %414, %415 : vector<2x128xf32>
    %417 = vector.extract_strided_slice %399 {offsets = [0, 256], sizes = [2, 128], strides = [1, 1]} : vector<2x384xf32> to vector<2x128xf32>
    %418 = vector.extract_strided_slice %400 {offsets = [0, 256], sizes = [2, 128], strides = [1, 1]} : vector<2x384xf32> to vector<2x128xf32>
    %419 = arith.addf %418, %252 : vector<2x128xf32>
    %420 = arith.mulf %408, %419 : vector<2x128xf32>
    %421 = arith.addf %417, %420 : vector<2x128xf32>
    %422 = math.tanh %421 : vector<2x128xf32>
    %cst_75 = arith.constant 1.000000e+00 : f32
    %423 = vector.broadcast %cst_75 : f32 to vector<2x128xf32>
    %424 = arith.subf %423, %416 : vector<2x128xf32>
    %425 = arith.mulf %424, %422 : vector<2x128xf32>
    %426 = arith.mulf %416, %398 : vector<2x128xf32>
    %427 = arith.addf %425, %426 : vector<2x128xf32>
    %428 = vector.extract_strided_slice %250 {offsets = [12, 0], sizes = [2, 384], strides = [1, 1]} : vector<16x384xf32> to vector<2x384xf32>
    %cst_76 = arith.constant dense<0.000000e+00> : vector<2x384xf32>
    %429 = tpu.matmul %427, %245, %cst_76 {dimension_numbers = #tpu.dot_dimension_numbers<[1], [0], [0], [1], [0, 0, 1, 1], [], []>} : vector<2x128xf32>, vector<128x384xf32>, vector<2x384xf32> -> vector<2x384xf32>
    %430 = vector.extract_strided_slice %428 {offsets = [0, 0], sizes = [2, 128], strides = [1, 1]} : vector<2x384xf32> to vector<2x128xf32>
    %431 = vector.extract_strided_slice %429 {offsets = [0, 0], sizes = [2, 128], strides = [1, 1]} : vector<2x384xf32> to vector<2x128xf32>
    %432 = arith.addf %430, %431 : vector<2x128xf32>
    %433 = arith.negf %432 : vector<2x128xf32>
    %434 = math.exp %433 : vector<2x128xf32>
    %cst_77 = arith.constant 1.000000e+00 : f32
    %435 = vector.broadcast %cst_77 : f32 to vector<2x128xf32>
    %436 = arith.addf %435, %434 : vector<2x128xf32>
    %437 = arith.divf %435, %436 : vector<2x128xf32>
    %438 = vector.extract_strided_slice %428 {offsets = [0, 128], sizes = [2, 128], strides = [1, 1]} : vector<2x384xf32> to vector<2x128xf32>
    %439 = vector.extract_strided_slice %429 {offsets = [0, 128], sizes = [2, 128], strides = [1, 1]} : vector<2x384xf32> to vector<2x128xf32>
    %440 = arith.addf %438, %439 : vector<2x128xf32>
    %441 = arith.negf %440 : vector<2x128xf32>
    %442 = math.exp %441 : vector<2x128xf32>
    %cst_78 = arith.constant 1.000000e+00 : f32
    %443 = vector.broadcast %cst_78 : f32 to vector<2x128xf32>
    %444 = arith.addf %443, %442 : vector<2x128xf32>
    %445 = arith.divf %443, %444 : vector<2x128xf32>
    %446 = vector.extract_strided_slice %428 {offsets = [0, 256], sizes = [2, 128], strides = [1, 1]} : vector<2x384xf32> to vector<2x128xf32>
    %447 = vector.extract_strided_slice %429 {offsets = [0, 256], sizes = [2, 128], strides = [1, 1]} : vector<2x384xf32> to vector<2x128xf32>
    %448 = arith.addf %447, %252 : vector<2x128xf32>
    %449 = arith.mulf %437, %448 : vector<2x128xf32>
    %450 = arith.addf %446, %449 : vector<2x128xf32>
    %451 = math.tanh %450 : vector<2x128xf32>
    %cst_79 = arith.constant 1.000000e+00 : f32
    %452 = vector.broadcast %cst_79 : f32 to vector<2x128xf32>
    %453 = arith.subf %452, %445 : vector<2x128xf32>
    %454 = arith.mulf %453, %451 : vector<2x128xf32>
    %455 = arith.mulf %445, %427 : vector<2x128xf32>
    %456 = arith.addf %454, %455 : vector<2x128xf32>
    %457 = vector.extract_strided_slice %250 {offsets = [14, 0], sizes = [2, 384], strides = [1, 1]} : vector<16x384xf32> to vector<2x384xf32>
    %cst_80 = arith.constant dense<0.000000e+00> : vector<2x384xf32>
    %458 = tpu.matmul %456, %245, %cst_80 {dimension_numbers = #tpu.dot_dimension_numbers<[1], [0], [0], [1], [0, 0, 1, 1], [], []>} : vector<2x128xf32>, vector<128x384xf32>, vector<2x384xf32> -> vector<2x384xf32>
    %459 = vector.extract_strided_slice %457 {offsets = [0, 0], sizes = [2, 128], strides = [1, 1]} : vector<2x384xf32> to vector<2x128xf32>
    %460 = vector.extract_strided_slice %458 {offsets = [0, 0], sizes = [2, 128], strides = [1, 1]} : vector<2x384xf32> to vector<2x128xf32>
    %461 = arith.addf %459, %460 : vector<2x128xf32>
    %462 = arith.negf %461 : vector<2x128xf32>
    %463 = math.exp %462 : vector<2x128xf32>
    %cst_81 = arith.constant 1.000000e+00 : f32
    %464 = vector.broadcast %cst_81 : f32 to vector<2x128xf32>
    %465 = arith.addf %464, %463 : vector<2x128xf32>
    %466 = arith.divf %464, %465 : vector<2x128xf32>
    %467 = vector.extract_strided_slice %457 {offsets = [0, 128], sizes = [2, 128], strides = [1, 1]} : vector<2x384xf32> to vector<2x128xf32>
    %468 = vector.extract_strided_slice %458 {offsets = [0, 128], sizes = [2, 128], strides = [1, 1]} : vector<2x384xf32> to vector<2x128xf32>
    %469 = arith.addf %467, %468 : vector<2x128xf32>
    %470 = arith.negf %469 : vector<2x128xf32>
    %471 = math.exp %470 : vector<2x128xf32>
    %cst_82 = arith.constant 1.000000e+00 : f32
    %472 = vector.broadcast %cst_82 : f32 to vector<2x128xf32>
    %473 = arith.addf %472, %471 : vector<2x128xf32>
    %474 = arith.divf %472, %473 : vector<2x128xf32>
    %475 = vector.extract_strided_slice %457 {offsets = [0, 256], sizes = [2, 128], strides = [1, 1]} : vector<2x384xf32> to vector<2x128xf32>
    %476 = vector.extract_strided_slice %458 {offsets = [0, 256], sizes = [2, 128], strides = [1, 1]} : vector<2x384xf32> to vector<2x128xf32>
    %477 = arith.addf %476, %252 : vector<2x128xf32>
    %478 = arith.mulf %466, %477 : vector<2x128xf32>
    %479 = arith.addf %475, %478 : vector<2x128xf32>
    %480 = math.tanh %479 : vector<2x128xf32>
    %cst_83 = arith.constant 1.000000e+00 : f32
    %481 = vector.broadcast %cst_83 : f32 to vector<2x128xf32>
    %482 = arith.subf %481, %474 : vector<2x128xf32>
    %483 = arith.mulf %482, %480 : vector<2x128xf32>
    %484 = arith.mulf %474, %456 : vector<2x128xf32>
    %485 = arith.addf %483, %484 : vector<2x128xf32>
    %c0_84 = arith.constant 0 : index
    %c0_85 = arith.constant 0 : index
    %486 = vector.load %arg10[%c0_84, %c0_85] : memref<128x1024xf32, #tpu.memory_space<vmem>>, vector<128x1024xf32>
    %cst_86 = arith.constant dense<0.000000e+00> : vector<2x1024xf32>
    %487 = tpu.matmul %485, %486, %cst_86 {dimension_numbers = #tpu.dot_dimension_numbers<[1], [0], [0], [1], [0, 0, 1, 1], [], []>} : vector<2x128xf32>, vector<128x1024xf32>, vector<2x1024xf32> -> vector<2x1024xf32>
    %c0_87 = arith.constant 0 : index
    %c0_88 = arith.constant 0 : index
    %488 = vector.load %arg11[%c0_87, %c0_88] : memref<1x1024xf32, #tpu.memory_space<vmem>>, vector<1x1024xf32>
    %489 = vector.broadcast %488 : vector<1x1024xf32> to vector<2x1024xf32>
    %490 = arith.addf %487, %489 : vector<2x1024xf32>
    %cst_89 = arith.constant dense<0.000000e+00> : vector<1024xf32>
    %491 = vector.multi_reduction <add>, %490, %cst_89 [0] : vector<2x1024xf32> to vector<1024xf32>
    %492 = vector.shape_cast %491 : vector<1024xf32> to vector<1x1024xf32>
    %cst_90 = arith.constant 2.000000e+00 : f32
    %493 = vector.broadcast %cst_90 : f32 to vector<1x1024xf32>
    %494 = arith.divf %492, %493 : vector<1x1024xf32>
    %495 = vector.broadcast %494 : vector<1x1024xf32> to vector<2x1024xf32>
    %496 = arith.subf %490, %495 : vector<2x1024xf32>
    %497 = arith.mulf %496, %496 : vector<2x1024xf32>
    %cst_91 = arith.constant dense<0.000000e+00> : vector<1024xf32>
    %498 = vector.multi_reduction <add>, %497, %cst_91 [0] : vector<2x1024xf32> to vector<1024xf32>
    %499 = vector.shape_cast %498 : vector<1024xf32> to vector<1x1024xf32>
    %cst_92 = arith.constant 2.000000e+00 : f32
    %500 = vector.broadcast %cst_92 : f32 to vector<1x1024xf32>
    %501 = arith.divf %499, %500 : vector<1x1024xf32>
    %502 = vector.broadcast %494 : vector<1x1024xf32> to vector<2x1024xf32>
    %503 = arith.subf %490, %502 : vector<2x1024xf32>
    %cst_93 = arith.constant 9.99999974E-6 : f32
    %504 = vector.broadcast %cst_93 : f32 to vector<1x1024xf32>
    %505 = arith.addf %501, %504 : vector<1x1024xf32>
    %506 = math.rsqrt %505 : vector<1x1024xf32>
    %507 = vector.broadcast %506 : vector<1x1024xf32> to vector<2x1024xf32>
    %508 = arith.mulf %503, %507 : vector<2x1024xf32>
    %c0_94 = arith.constant 0 : index
    %c0_95 = arith.constant 0 : index
    %509 = vector.load %arg12[%c0_94, %c0_95] : memref<1x1024xf32, #tpu.memory_space<vmem>>, vector<1x1024xf32>
    %510 = vector.broadcast %509 : vector<1x1024xf32> to vector<2x1024xf32>
    %511 = arith.mulf %508, %510 : vector<2x1024xf32>
    %c0_96 = arith.constant 0 : index
    %c0_97 = arith.constant 0 : index
    %512 = vector.load %arg13[%c0_96, %c0_97] : memref<1x1024xf32, #tpu.memory_space<vmem>>, vector<1x1024xf32>
    %513 = vector.broadcast %512 : vector<1x1024xf32> to vector<2x1024xf32>
    %514 = arith.addf %511, %513 : vector<2x1024xf32>
    %cst_98 = arith.constant 0.000000e+00 : f32
    %515 = vector.broadcast %cst_98 : f32 to vector<2x1024xf32>
    %516 = arith.maximumf %514, %515 : vector<2x1024xf32>
    tpu.wait_dma2 semaphore(%arg18 : memref<!tpu.dma_semaphore, #tpu.memory_space<semaphore_mem>>) src(%arg15 : memref<1024x1024xbf16, #tpu.memory_space<any>>) dst(%arg17 : memref<1024x1024xbf16, #tpu.memory_space<vmem>>)
    %517 = arith.truncf %516 : vector<2x1024xf32> to vector<2x1024xbf16>
    %c0_99 = arith.constant 0 : index
    %c0_100 = arith.constant 0 : index
    %518 = vector.load %arg17[%c0_99, %c0_100] : memref<1024x1024xbf16, #tpu.memory_space<vmem>>, vector<1024x1024xbf16>
    %cst_101 = arith.constant dense<0.000000e+00> : vector<2x1024xf32>
    %519 = tpu.matmul %517, %518, %cst_101 {dimension_numbers = #tpu.dot_dimension_numbers<[1], [0], [0], [1], [0, 0, 1, 1], [], []>} : vector<2x1024xbf16>, vector<1024x1024xbf16>, vector<2x1024xf32> -> vector<2x1024xf32>
    %c0_102 = arith.constant 0 : index
    %c0_103 = arith.constant 0 : index
    %520 = vector.load %arg14[%c0_102, %c0_103] : memref<1x1024xf32, #tpu.memory_space<vmem>>, vector<1x1024xf32>
    %521 = vector.broadcast %520 : vector<1x1024xf32> to vector<2x1024xf32>
    %522 = arith.addf %519, %521 : vector<2x1024xf32>
    %c0_104 = arith.constant 0 : index
    %c0_105 = arith.constant 0 : index
    %523 = vector.load %arg16[%c0_104, %c0_105] : memref<2x1024xf32, #tpu.memory_space<vmem>>, vector<2x1024xf32>
    tpu.vector_store %arg16[%c0_104, %c0_105], %522 {strides = array<i32>} : memref<2x1024xf32, #tpu.memory_space<vmem>>, vector<2x1024xf32>,
    return
  }
  func.func @transform_0(%arg0: i32) -> (i32, i32) {
    %c0_i32 = arith.constant 0 : i32
    %c0_i32_0 = arith.constant 0 : i32
    %c0_i32_1 = arith.constant 0 : i32
    return %c0_i32, %c0_i32_0 : i32, i32
  }
  func.func @transform_1(%arg0: i32) -> (i32, i32) {
    %c0_i32 = arith.constant 0 : i32
    %c0_i32_0 = arith.constant 0 : i32
    %c0_i32_1 = arith.constant 0 : i32
    return %c0_i32, %c0_i32_0 : i32, i32
  }
  func.func @transform_2(%arg0: i32) -> (i32, i32) {
    %c0_i32 = arith.constant 0 : i32
    %c0_i32_0 = arith.constant 0 : i32
    %c0_i32_1 = arith.constant 0 : i32
    return %c0_i32, %c0_i32_0 : i32, i32
  }
  func.func @transform_3(%arg0: i32) -> (i32, i32) {
    %c0_i32 = arith.constant 0 : i32
    %c0_i32_0 = arith.constant 0 : i32
    %c0_i32_1 = arith.constant 0 : i32
    return %c0_i32, %c0_i32_0 : i32, i32
  }
  func.func @transform_4(%arg0: i32) -> (i32, i32) {
    %c0_i32 = arith.constant 0 : i32
    %c0_i32_0 = arith.constant 0 : i32
    %c0_i32_1 = arith.constant 0 : i32
    return %c0_i32, %c0_i32_0 : i32, i32
  }
  func.func @transform_5(%arg0: i32) -> (i32, i32) {
    %c0_i32 = arith.constant 0 : i32
    %c0_i32_0 = arith.constant 0 : i32
    %c0_i32_1 = arith.constant 0 : i32
    return %c0_i32, %c0_i32_0 : i32, i32
  }
  func.func @transform_6(%arg0: i32) -> (i32, i32) {
    %c0_i32 = arith.constant 0 : i32
    %c0_i32_0 = arith.constant 0 : i32
    %c0_i32_1 = arith.constant 0 : i32
    return %c0_i32, %c0_i32_0 : i32, i32
  }
  func.func @transform_7(%arg0: i32) -> (i32, i32) {
    %c0_i32 = arith.constant 0 : i32
    %c0_i32_0 = arith.constant 0 : i32
    %c0_i32_1 = arith.constant 0 : i32
    return %c0_i32, %c0_i32_0 : i32, i32
  }
  func.func @transform_8(%arg0: i32) -> (i32, i32) {
    %c0_i32 = arith.constant 0 : i32
    %c0_i32_0 = arith.constant 0 : i32
    %c0_i32_1 = arith.constant 0 : i32
    return %c0_i32, %c0_i32_0 : i32, i32
  }
  func.func @transform_9(%arg0: i32) -> (i32, i32) {
    %c0_i32 = arith.constant 0 : i32
    %c0_i32_0 = arith.constant 0 : i32
    %c0_i32_1 = arith.constant 0 : i32
    return %c0_i32, %c0_i32_0 : i32, i32
  }
  func.func @transform_10(%arg0: i32) -> (i32, i32) {
    %c0_i32 = arith.constant 0 : i32
    %c0_i32_0 = arith.constant 0 : i32
    %c0_i32_1 = arith.constant 0 : i32
    return %c0_i32, %c0_i32_0 : i32, i32
  }
  func.func @transform_11(%arg0: i32) -> (i32, i32) {
    %c0_i32 = arith.constant 0 : i32
    %c0_i32_0 = arith.constant 0 : i32
    %c0_i32_1 = arith.constant 0 : i32
    return %c0_i32, %c0_i32_0 : i32, i32
  }
  func.func @transform_12(%arg0: i32) -> (i32, i32) {
    %c0_i32 = arith.constant 0 : i32
    %c0_i32_0 = arith.constant 0 : i32
    %c0_i32_1 = arith.constant 0 : i32
    return %c0_i32, %c0_i32_0 : i32, i32
  }
  func.func @transform_13(%arg0: i32) -> (i32, i32) {
    %c0_i32 = arith.constant 0 : i32
    %c0_i32_0 = arith.constant 0 : i32
    %c0_i32_1 = arith.constant 0 : i32
    return %c0_i32, %c0_i32_0 : i32, i32
  }
  func.func @transform_15(%arg0: i32) -> (i32, i32) {
    %c0_i32 = arith.constant 0 : i32
    %c0_i32_0 = arith.constant 0 : i32
    %c0_i32_1 = arith.constant 0 : i32
    return %c0_i32, %c0_i32_0 : i32, i32
  }
}

</mosaic_0001>

<bundles_post_ra>
// kernel: rnn_predictor_forward.1
= control target key start
LH: loop header
LB: loop body
LE: loop exit
PB: predicated region body
PF: predicated region fallthrough
CT: control target
= control target key end

     0   :  { %20 = vsyncpa [#allocation5], 0  ;;  %s9633_s0 = inlined_call_operand.vmem [shape: f32[16,16], index: 0, kind: input, shape index: {}]   ;;  %s9634_s1 = inlined_call_operand.hbm [shape: f32[16,384], index: 1, kind: input, shape index: {}]   ;;  %s9635_s2 = inlined_call_operand.hbm [shape: f32[128,384], index: 2, kind: input, shape index: {}]   ;;  %s9636_s3 = inlined_call_operand.hbm [shape: f32[1,384], index: 3, kind: input, shape index: {}]   ;;  %s9637_s4 = inlined_call_operand.hbm [shape: f32[1,128], index: 4, kind: input, shape index: {}]   ;;  %s9638_s5 = inlined_call_operand.hbm [shape: f32[128,384], index: 5, kind: input, shape index: {}]   ;;  %s9639_s6 = inlined_call_operand.hbm [shape: f32[128,384], index: 6, kind: input, shape index: {}]   ;;  %s9640_s7 = inlined_call_operand.hbm [shape: f32[1,384], index: 7, kind: input, shape index: {}]   ;;  %s9641_s8 = inlined_call_operand.hbm [shape: f32[1,128], index: 8, kind: input, shape index: {}]   ;;  %s9642_s9 = inlined_call_operand.hbm [shape: f32[128,1024], index: 9, kind: input, shape index: {}]   ;;  %s9643_s10 = inlined_call_operand.hbm [shape: f32[1,1024], index: 10, kind: input, shape index: {}]   ;;  %s9644_s11 = inlined_call_operand.hbm [shape: f32[1,1024], index: 11, kind: input, shape index: {}]   ;;  %s9645_s12 = inlined_call_operand.hbm [shape: f32[1,1024], index: 12, kind: input, shape index: {}]   ;;  %s9646_s13 = inlined_call_operand.hbm [shape: f32[1,1024], index: 13, kind: input, shape index: {}]   ;;  %s9647_s14 = inlined_call_operand.hbm [shape: bf16[1024,1024], index: 14, kind: input, shape index: {}]   ;;  %s9648_s15 = inlined_call_operand.hbm [shape: f32[2,1024], index: 15, kind: output, shape index: {}]  }
   0x1   :  { %21 = vsyncpa [#allocation8], 0 }
   0x2   :  { %22 = vsyncpa [#allocation11], 0 }
   0x3   :  { %23 = vsyncpa [#allocation14], 0 }
   0x4   :  { %24 = vsyncpa [#allocation17], 0 }
   0x5   :  { %25 = vsyncpa [#allocation20], 0 }
   0x6   :  { %26 = vsyncpa [#allocation23], 0 }
   0x7   :  { %27 = vsyncpa [#allocation6], 0  ;;  %s8190_s18 = smov [#allocation7]   ;;  %s8191_s20 = smov [#allocation10]  }
   0x8   :  { %s47_s19 = sshll.u32 %s8190_s18, 4  ;;  %s70_s21 = sshll.u32 %s8191_s20, 4  ;;  %s48_s19 = int_to_ptr.vmem [resolvable:$true] %s47_s19  ;;  %s8300_s21 = int_to_ptr.vmem [resolvable:$true] %s70_s21 }
   0x9   :  { %s7864_s24 = scalar_lea.hbm %s9635_s2, 6144 }
   0xa   :  { %p7865_p0 = scmp.ne.s32.totalorder %s9635_s2, %s7864_s24  ;;  %p7868_p1 = scmp.lt.u32.totalorder %s7864_s24, %s9635_s2 }
   0xc   :  { %p7870_p2 = pnand %p7868_p1, %p7865_p0 }
   0xe   :  { %7873 = shalt.err (!%p7870_p2)
}
   0xf   :  { %s7874_s29 = scalar_lea.vmem %s48_s19, 6144  ;;  %p7879_p4 = scmp.lt.s32.totalorder %s48_s19, %s48_s19 }
  0x10   :  { %p7875_p3 = scmp.ne.s32.totalorder %s48_s19, %s7874_s29  ;;  %p7880_p5 = scmp.lt.s32.totalorder %s7874_s29, %s7874_s29 }
  0x12   :  { %p7881_p6 = por %p7880_p5, %p7879_p4 }
  0x14   :  { %p7882_p7 = pnand %p7881_p6, %p7875_p3 }
  0x16   :  { %7885 = shalt.err (!%p7882_p7)
}
  0x17   :  { %s8192_s30 = smov 384   ;;  %s8193_s16 = smov 24  }
  0x18   :  { %53 = dma.hbm_to_vmem [thread:$0]  %s9635_s2, 6144, %s48_s19, [#allocation8], %s8192_s30, %s8192_s30, %s8193_s16  }
  0x19   :  { %s7886_s23 = scalar_lea.hbm %s9637_s4, 16 }
  0x1a   :  { %p7887_p8 = scmp.ne.s32.totalorder %s9637_s4, %s7886_s23  ;;  %p7890_p9 = scmp.lt.u32.totalorder %s7886_s23, %s9637_s4 }
  0x1c   :  { %p7892_p10 = pnand %p7890_p9, %p7887_p8 }
  0x1e   :  { %7895 = shalt.err (!%p7892_p10)
}
  0x1f   :  { %s7896_s28 = scalar_lea.vmem %s8300_s21, 16  ;;  %s7900_s2 = scalar_lea.vmem %s8300_s21, 32 }
  0x20   :  { %p7897_p11 = scmp.ne.s32.totalorder %s8300_s21, %s7896_s28  ;;  %p7901_p12 = scmp.lt.s32.totalorder %s8300_s21, %s8300_s21 }
  0x21   :  { %p7902_p13 = scmp.lt.s32.totalorder %s7900_s2, %s7896_s28 }
  0x23   :  { %p7903_p0 = por %p7902_p13, %p7901_p12 }
  0x25   :  { %p7904_p1 = pnand %p7903_p0, %p7897_p11 }
  0x27   :  { %7907 = shalt.err (!%p7904_p1)
}
  0x28   :  { %73 = dma.hbm_to_vmem [thread:$0]  %s9637_s4, 16, %s8300_s21, [#allocation11]  }
  0x29   :  { %s8194_s17 = smov [#allocation13]   ;;  %s8195_s20 = smov [#allocation16]  }
  0x2a   :  { %s91_s18 = sshll.u32 %s8194_s17, 4  ;;  %s114_s22 = sshll.u32 %s8195_s20, 4  ;;  %s92_s18 = int_to_ptr.vmem [resolvable:$true] %s91_s18  ;;  %s115_s22 = int_to_ptr.vmem [resolvable:$true] %s114_s22 }
  0x2b   :  { %s7908_s25 = scalar_lea.hbm %s9639_s6, 6144 }
  0x2c   :  { %p7909_p2 = scmp.ne.s32.totalorder %s9639_s6, %s7908_s25  ;;  %p7912_p3 = scmp.lt.u32.totalorder %s7908_s25, %s9639_s6 }
  0x2e   :  { %p7914_p4 = pnand %p7912_p3, %p7909_p2 }
  0x30   :  { %7917 = shalt.err (!%p7914_p4)
}
  0x31   :  { %s7918_s4 = scalar_lea.vmem %s92_s18, 6144  ;;  %p7923_p6 = scmp.lt.s32.totalorder %s92_s18, %s92_s18 }
  0x32   :  { %p7919_p5 = scmp.ne.s32.totalorder %s92_s18, %s7918_s4  ;;  %p7924_p7 = scmp.lt.s32.totalorder %s7918_s4, %s7918_s4 }
  0x34   :  { %p7925_p8 = por %p7924_p7, %p7923_p6 }
  0x36   :  { %p7926_p9 = pnand %p7925_p8, %p7919_p5 }
  0x38   :  { %7929 = shalt.err (!%p7926_p9)
}
  0x39   :  { %97 = dma.hbm_to_vmem [thread:$0]  %s9639_s6, 6144, %s92_s18, [#allocation14], %s8192_s30, %s8192_s30, %s8193_s16  }
  0x3a   :  { %s7930_s20 = scalar_lea.hbm %s9641_s8, 16 }
  0x3b   :  { %p7931_p10 = scmp.ne.s32.totalorder %s9641_s8, %s7930_s20  ;;  %p7934_p11 = scmp.lt.u32.totalorder %s7930_s20, %s9641_s8 }
  0x3d   :  { %p7936_p12 = pnand %p7934_p11, %p7931_p10 }
  0x3f   :  { %7939 = shalt.err (!%p7936_p12)
}
  0x40   :  { %s7940_s27 = scalar_lea.vmem %s115_s22, 16  ;;  %s7944_s28 = scalar_lea.vmem %s115_s22, 32 }
  0x41   :  { %p7941_p13 = scmp.ne.s32.totalorder %s115_s22, %s7940_s27  ;;  %p7945_p0 = scmp.lt.s32.totalorder %s115_s22, %s115_s22 }
  0x42   :  { %p7946_p1 = scmp.lt.s32.totalorder %s7944_s28, %s7940_s27 }
  0x44   :  { %p7947_p2 = por %p7946_p1, %p7945_p0 }
  0x46   :  { %p7948_p3 = pnand %p7947_p2, %p7941_p13 }
  0x48   :  { %7951 = shalt.err (!%p7948_p3)
}
  0x49   :  { %117 = dma.hbm_to_vmem [thread:$0]  %s9641_s8, 16, %s115_s22, [#allocation17]  }
  0x4a   :  { %s8196_s2 = smov [#allocation19]   ;;  %s8197_s21 = smov [#allocation22]  }
  0x4b   :  { %s136_s4 = sshll.u32 %s8196_s2, 4  ;;  %s156_s19 = sshll.u32 %s8197_s21, 4  ;;  %s137_s4 = int_to_ptr.vmem [resolvable:$true] %s136_s4  ;;  %s157_s19 = int_to_ptr.vmem [resolvable:$true] %s156_s19 }
  0x4c   :  { %s7952_s20 = scalar_lea.hbm %s9643_s10, 128 }
  0x4d   :  { %p7953_p4 = scmp.ne.s32.totalorder %s9643_s10, %s7952_s20  ;;  %p7956_p5 = scmp.lt.u32.totalorder %s7952_s20, %s9643_s10 }
  0x4f   :  { %p7958_p6 = pnand %p7956_p5, %p7953_p4 }
  0x51   :  { %7961 = shalt.err (!%p7958_p6)
}
  0x52   :  { %s7962_s8 = scalar_lea.vmem %s137_s4, 128  ;;  %p7967_p8 = scmp.lt.s32.totalorder %s137_s4, %s137_s4 }
  0x53   :  { %p7963_p7 = scmp.ne.s32.totalorder %s137_s4, %s7962_s8  ;;  %p7968_p9 = scmp.lt.s32.totalorder %s7962_s8, %s7962_s8 }
  0x55   :  { %p7969_p10 = por %p7968_p9, %p7967_p8 }
  0x57   :  { %p7970_p11 = pnand %p7969_p10, %p7963_p7 }
  0x59   :  { %7973 = shalt.err (!%p7970_p11)
}
  0x5a   :  { %139 = dma.hbm_to_vmem [thread:$0]  %s9643_s10, 128, %s137_s4, [#allocation20]  }
  0x5b   :  { %s7974_s18 = scalar_lea.hbm %s9645_s12, 128 }
  0x5c   :  { %p7975_p12 = scmp.ne.s32.totalorder %s9645_s12, %s7974_s18  ;;  %p7978_p13 = scmp.lt.u32.totalorder %s7974_s18, %s9645_s12 }
  0x5e   :  { %p7980_p0 = pnand %p7978_p13, %p7975_p12 }
  0x60   :  { %7983 = shalt.err (!%p7980_p0)
}
  0x61   :  { %s7984_s20 = scalar_lea.vmem %s157_s19, 128  ;;  %p7989_p2 = scmp.lt.s32.totalorder %s157_s19, %s157_s19 }
  0x62   :  { %p7985_p1 = scmp.ne.s32.totalorder %s157_s19, %s7984_s20  ;;  %p7990_p3 = scmp.lt.s32.totalorder %s7984_s20, %s7984_s20 }
  0x64   :  { %p7991_p4 = por %p7990_p3, %p7989_p2 }
  0x66   :  { %p7992_p5 = pnand %p7991_p4, %p7985_p1 }
  0x68   :  { %7995 = shalt.err (!%p7992_p5)
}
  0x69   :  { %159 = dma.hbm_to_vmem [thread:$0]  %s9645_s12, 128, %s157_s19, [#allocation23]  }
  0x6a   :  { %s8198_s23 = smov [#allocation4]   ;;  %s8199_s25 = smov [#allocation9]  }
  0x6b   :  { %s35_s24 = sshll.u32 %s8198_s23, 4  ;;  %s60_s26 = sshll.u32 %s8199_s25, 4  ;;  %s36_s24 = int_to_ptr.vmem [resolvable:$true] %s35_s24  ;;  %s61_s26 = int_to_ptr.vmem [resolvable:$true] %s60_s26 }
  0x6c   :  { %s7996_s27 = scalar_lea.hbm %s9634_s1, 768 }
  0x6d   :  { %p7997_p6 = scmp.ne.s32.totalorder %s9634_s1, %s7996_s27  ;;  %p8000_p7 = scmp.lt.u32.totalorder %s7996_s27, %s9634_s1 }
  0x6f   :  { %p8002_p8 = pnand %p8000_p7, %p7997_p6 }
  0x71   :  { %8005 = shalt.err (!%p8002_p8)
}
  0x72   :  { %s8006_s12 = scalar_lea.vmem %s36_s24, 768  ;;  %p8011_p10 = scmp.lt.s32.totalorder %s36_s24, %s36_s24 }
  0x73   :  { %p8007_p9 = scmp.ne.s32.totalorder %s36_s24, %s8006_s12  ;;  %p8012_p11 = scmp.lt.s32.totalorder %s8006_s12, %s8006_s12 }
  0x75   :  { %p8013_p12 = por %p8012_p11, %p8011_p10 }
  0x77   :  { %p8014_p13 = pnand %p8013_p12, %p8007_p9 }
  0x79   :  { %8017 = shalt.err (!%p8014_p13)
}
  0x7a   :  { %41 = dma.hbm_to_vmem [thread:$0]  %s9634_s1, 768, %s36_s24, [#allocation5], %s8192_s30, %s8192_s30, %s8193_s16  }
  0x7b   :  { %s8018_s20 = scalar_lea.hbm %s9636_s3, 48 }
  0x7c   :  { %p8019_p0 = scmp.ne.s32.totalorder %s9636_s3, %s8018_s20  ;;  %p8022_p1 = scmp.lt.u32.totalorder %s8018_s20, %s9636_s3 }
  0x7e   :  { %p8024_p2 = pnand %p8022_p1, %p8019_p0 }
  0x80   :  { %8027 = shalt.err (!%p8024_p2)
}
  0x81   :  { %s8028_s8 = scalar_lea.vmem %s61_s26, 48  ;;  %s8032_s22 = scalar_lea.vmem %s61_s26, 64 }
  0x82   :  { %p8029_p3 = scmp.ne.s32.totalorder %s61_s26, %s8028_s8  ;;  %p8033_p4 = scmp.lt.s32.totalorder %s61_s26, %s61_s26 }
  0x83   :  { %p8034_p5 = scmp.lt.s32.totalorder %s8032_s22, %s8028_s8 }
  0x85   :  { %p8035_p6 = por %p8034_p5, %p8033_p4 }
  0x87   :  { %p8036_p7 = pnand %p8035_p6, %p8029_p3 }
  0x89   :  { %8039 = shalt.err (!%p8036_p7)
}
  0x8a   :  { %63 = dma.hbm_to_vmem [thread:$0]  %s9636_s3, 48, %s61_s26, [#allocation8]  }
  0x8b   :  { %s8200_s27 = smov [#allocation12]   ;;  %s8201_s6 = smov [#allocation15]  }
  0x8c   :  { %s79_s28 = sshll.u32 %s8200_s27, 4  ;;  %s104_s18 = sshll.u32 %s8201_s6, 4  ;;  %s80_s28 = int_to_ptr.vmem [resolvable:$true] %s79_s28  ;;  %s105_s18 = int_to_ptr.vmem [resolvable:$true] %s104_s18 }
  0x8d   :  { %s8040_s19 = scalar_lea.hbm %s9638_s5, 6144 }
  0x8e   :  { %p8041_p8 = scmp.ne.s32.totalorder %s9638_s5, %s8040_s19  ;;  %p8044_p9 = scmp.lt.u32.totalorder %s8040_s19, %s9638_s5 }
  0x90   :  { %p8046_p10 = pnand %p8044_p9, %p8041_p8 }
  0x92   :  { %8049 = shalt.err (!%p8046_p10)
}
  0x93   :  { %s8050_s3 = scalar_lea.vmem %s80_s28, 6144  ;;  %p8055_p12 = scmp.lt.s32.totalorder %s80_s28, %s80_s28 }
  0x94   :  { %p8051_p11 = scmp.ne.s32.totalorder %s80_s28, %s8050_s3  ;;  %p8056_p13 = scmp.lt.s32.totalorder %s8050_s3, %s8050_s3 }
  0x96   :  { %p8057_p0 = por %p8056_p13, %p8055_p12 }
  0x98   :  { %p8058_p1 = pnand %p8057_p0, %p8051_p11 }
  0x9a   :  { %8061 = shalt.err (!%p8058_p1)
}
  0x9b   :  { %85 = dma.hbm_to_vmem [thread:$0]  %s9638_s5, 6144, %s80_s28, [#allocation11], %s8192_s30, %s8192_s30, %s8193_s16  }
  0x9c   :  { %s8062_s25 = scalar_lea.hbm %s9640_s7, 48 }
  0x9d   :  { %p8063_p2 = scmp.ne.s32.totalorder %s9640_s7, %s8062_s25  ;;  %p8066_p3 = scmp.lt.u32.totalorder %s8062_s25, %s9640_s7 }
  0x9f   :  { %p8068_p4 = pnand %p8066_p3, %p8063_p2 }
  0xa1   :  { %8071 = shalt.err (!%p8068_p4)
}
  0xa2   :  { %s8072_s27 = scalar_lea.vmem %s105_s18, 48  ;;  %s8076_s6 = scalar_lea.vmem %s105_s18, 64 }
  0xa3   :  { %p8073_p5 = scmp.ne.s32.totalorder %s105_s18, %s8072_s27  ;;  %p8077_p6 = scmp.lt.s32.totalorder %s105_s18, %s105_s18 }
  0xa4   :  { %p8078_p7 = scmp.lt.s32.totalorder %s8076_s6, %s8072_s27 }
  0xa6   :  { %p8079_p8 = por %p8078_p7, %p8077_p6 }
  0xa8   :  { %p8080_p9 = pnand %p8079_p8, %p8073_p5 }
  0xaa   :  { %8083 = shalt.err (!%p8080_p9)
}
  0xab   :  { %107 = dma.hbm_to_vmem [thread:$0]  %s9640_s7, 48, %s105_s18, [#allocation14]  }
  0xac   :  { %s8202_s16 = smov [#allocation18]   ;;  %s8084_s19 = scalar_lea.hbm %s9642_s9, 16384 }
  0xad   :  { %s123_s28 = sshll.u32 %s8202_s16, 4  ;;  %p8085_p10 = scmp.ne.s32.totalorder %s9642_s9, %s8084_s19  ;;  %s124_s28 = int_to_ptr.vmem [resolvable:$true] %s123_s28 }
  0xae   :  { %p8088_p11 = scmp.lt.u32.totalorder %s8084_s19, %s9642_s9 }
  0xb0   :  { %p8090_p12 = pnand %p8088_p11, %p8085_p10 }
  0xb2   :  { %8093 = shalt.err (!%p8090_p12)
}
  0xb3   :  { %s8094_s3 = scalar_lea.vmem %s124_s28, 16384  ;;  %p8099_p0 = scmp.lt.s32.totalorder %s124_s28, %s124_s28 }
  0xb4   :  { %p8095_p13 = scmp.ne.s32.totalorder %s124_s28, %s8094_s3  ;;  %p8100_p1 = scmp.lt.s32.totalorder %s8094_s3, %s8094_s3 }
  0xb6   :  { %p8101_p2 = por %p8100_p1, %p8099_p0 }
  0xb8   :  { %p8102_p3 = pnand %p8101_p2, %p8095_p13 }
  0xba   :  { %8105 = shalt.err (!%p8102_p3)
}
  0xbb   :  { %s8203_s7 = smov 1024   ;;  %s8204_s18 = smov 64  }
  0xbc   :  { %129 = dma.hbm_to_vmem [thread:$0]  %s9642_s9, 16384, %s124_s28, [#allocation17], %s8203_s7, %s8203_s7, %s8204_s18  }
  0xbd   :  { %s8205_s4 = smov [#allocation21]   ;;  %s8206_s25 = smov [#allocation24]  }
  0xbe   :  { %s146_s23 = sshll.u32 %s8205_s4, 4  ;;  %s166_s8 = sshll.u32 %s8206_s25, 4  ;;  %s147_s23 = int_to_ptr.vmem [resolvable:$true] %s146_s23  ;;  %s167_s8 = int_to_ptr.vmem [resolvable:$true] %s166_s8 }
  0xbf   :  { %s8106_s24 = scalar_lea.hbm %s9644_s11, 128 }
  0xc0   :  { %p8107_p4 = scmp.ne.s32.totalorder %s9644_s11, %s8106_s24  ;;  %p8110_p5 = scmp.lt.u32.totalorder %s8106_s24, %s9644_s11 }
  0xc2   :  { %p8112_p6 = pnand %p8110_p5, %p8107_p4 }
  0xc4   :  { %8115 = shalt.err (!%p8112_p6)
}
  0xc5   :  { %s8116_s9 = scalar_lea.vmem %s147_s23, 128  ;;  %p8121_p8 = scmp.lt.s32.totalorder %s147_s23, %s147_s23 }
  0xc6   :  { %p8117_p7 = scmp.ne.s32.totalorder %s147_s23, %s8116_s9  ;;  %p8122_p9 = scmp.lt.s32.totalorder %s8116_s9, %s8116_s9 }
  0xc8   :  { %p8123_p10 = por %p8122_p9, %p8121_p8 }
  0xca   :  { %p8124_p11 = pnand %p8123_p10, %p8117_p7 }
  0xcc   :  { %8127 = shalt.err (!%p8124_p11)
}
  0xcd   :  { %149 = dma.hbm_to_vmem [thread:$0]  %s9644_s11, 128, %s147_s23, [#allocation20]  }
  0xce   :  { %s8128_s19 = scalar_lea.hbm %s9646_s13, 128 }
  0xcf   :  { %p8129_p12 = scmp.ne.s32.totalorder %s9646_s13, %s8128_s19  ;;  %p8132_p13 = scmp.lt.u32.totalorder %s8128_s19, %s9646_s13 }
  0xd1   :  { %p8134_p0 = pnand %p8132_p13, %p8129_p12 }
  0xd3   :  { %8137 = shalt.err (!%p8134_p0)
}
  0xd4   :  { %s8138_s3 = scalar_lea.vmem %s167_s8, 128  ;;  %p8143_p2 = scmp.lt.s32.totalorder %s167_s8, %s167_s8 }
  0xd5   :  { %p8139_p1 = scmp.ne.s32.totalorder %s167_s8, %s8138_s3  ;;  %p8144_p3 = scmp.lt.s32.totalorder %s8138_s3, %s8138_s3 }
  0xd7   :  { %p8145_p4 = por %p8144_p3, %p8143_p2 }
  0xd9   :  { %p8146_p5 = pnand %p8145_p4, %p8139_p1 }
  0xdb   :  { %8149 = shalt.err (!%p8146_p5)
}
  0xdc   :  { %169 = dma.hbm_to_vmem [thread:$0]  %s9646_s13, 128, %s167_s8, [#allocation23]  }
  0xdd   :  { %8172 = dma.done.wait [#allocation5], 768  }
  0xde   :  { %8173 = vsyncadd [#allocation5], 4294966528 }
  0xdf   :  { %8174 = dma.done.wait [#allocation8], 6192  }
  0xe0   :  { %8175 = vsyncadd [#allocation8], 4294961104 }
  0xe1   :  { %8176 = dma.done.wait [#allocation11], 6160  }
  0xe2   :  { %8177 = vsyncadd [#allocation11], 4294961136 }
  0xe3   :  { %8178 = dma.done.wait [#allocation14], 6192  }
  0xe4   :  { %8179 = vsyncadd [#allocation14], 4294961104 }
  0xe5   :  { %8180 = dma.done.wait [#allocation17], 16400  }
  0xe6   :  { %8181 = vsyncadd [#allocation17], 4294950896 }
  0xe7   :  { %8182 = dma.done.wait [#allocation20], 256  }
  0xe8   :  { %8183 = vsyncadd [#allocation20], 4294967040 }
  0xe9   :  { %8184 = dma.done.wait [#allocation23], 256  }
  0xea   :  { %8185 = vsyncadd [#allocation23], 4294967040  ;;  %s213_s10 = sld [smem:[#allocation0]]   ;;  %225 = sst [smem:[#allocation27]] %s8203_s7  ;;  %v8207_v0 = vmov 0.0   ;;  %vm318_vm0 = vcmask 130048  }
  0xeb   :  { %389 = vmatprep.mubr.f32.mxu0 %v8207_v0  ;;  %227 = sst [smem:[#allocation27 + $0x1]] %s8203_s7  ;;  %s8208_s13 = smov 8   ;;  %v8216_v40 = vmov 0.0|0.0   ;;  %vm8217_vm1 = vmmov 0   ;;  %vm1870_vm2 = vcmask 1041408   ;;  %vm1872_vm3 = vcmask 1043456  }
  0xec   :  { %229 = sst [smem:[#allocation27 + $0x2]] %s8208_s13  ;;  %s8209_s4 = smov 128   ;;  %vm1874_vm4 = vcmask 1045504  }
  0xed   :  { %231 = sst [smem:[#allocation27 + $0x3]] %s8204_s18  ;;  %s8210_s23 = smov 2  }
  0xee   :  { %233 = sst [smem:[#allocation27 + $0x4]] %s8209_s4  ;;  %s8211_s25 = smov [#allocation2]  }
  0xef   :  { %235 = sst [smem:[#allocation27 + $0x5]] %s8210_s23  ;;  %s221_s8 = sshll.u32 %s8211_s25, 4  ;;  %s222_s8 = int_to_ptr.vmem [resolvable:$true] %s221_s8 }
  0xf0   :  { %s5567_s22 = sshll.u32 %s213_s10, 26  ;;  %s8212_s1 = smov 512  }
  0xf1   :  { %237 = sst [smem:[#allocation27 + $0x6]] %s8212_s1  ;;  %s5568_s24 = sadd.s32 134217728, %s5567_s22 }
  0xf2   :  { %239 = sst [smem:[#allocation27 + $0x7]] %s8204_s18  ;;  %s8213_s27 = smov 4  }
  0xf3   :  { %241 = sst [smem:[#allocation27 + $0x8]] %s8213_s27  ;;  %s8214_s7 = smov [#allocation3]  }
  0xf4   :  { %s8215_s6 = smov [#allocation26]  }
  0xf5   :  { %243 = dma.general %s9647_s14, 65536, %s222_s8, %s8214_s7, %s8215_s6, [#allocation27], %s5568_s24, 0  }
  0xf6   :  { %v247_v1 = vld [vmem:[#allocation4 + $0x8] sm:$0xff]  ;;  %v250_v2 = vld [vmem:[#allocation4 + $0x20] sm:$0xff]  ;;  %v249_v5 = vld [vmem:[#allocation4 + $0x18] sm:$0xff] }
  0xf7   :  { %v246_v3 = vld [vmem:[#allocation4] sm:$0xff]  ;;  %v6504_v4 = vpack.c.bf16 %v250_v2, %v247_v1  ;;  %v253_v7 = vld [vmem:[#allocation7 + $0x8] sm:$0xff]  ;;  %v256_v9 = vld [vmem:[#allocation7 + $0x20] sm:$0xff] }
  0xf8   :  { %v244_v6 = vld [vmem:[%s9633_s0] sm:$0xff]  ;;  %v6506_v8 = vpack.c.bf16 %v249_v5, %v246_v3  ;;  %v252_v10 = vld [vmem:[#allocation7] sm:$0xff]  ;;  %v255_v11 = vld [vmem:[#allocation7 + $0x18] sm:$0xff]  ;;  %v8491_v12 = vpack.c.bf16 %v256_v9, %v253_v7 }
  0xf9   :  { %5906 = vmatprep.mubr.msk.f32.mxu1 %vm318_vm0, %v244_v6  ;;  %6505 = vmatprep.subr.bf16.mxu0 %v6504_v4  ;;  %v259_v13 = vld [vmem:[#allocation7 + $0x38] sm:$0xff]  ;;  %v262_v14 = vld [vmem:[#allocation7 + $0x50] sm:$0xff]  ;;  %v8493_v15 = vpack.c.bf16 %v255_v11, %v252_v10  ;;  %v261_v18 = vld [vmem:[#allocation7 + $0x48] sm:$0xff] }
  0xfa   :  { %6507 = vmatpush1.bf16.msra.mxu0 %v6506_v8  ;;  %v8496_v16 = vpack.c.bf16 %v262_v14, %v259_v13  ;;  %v258_v17 = vld [vmem:[#allocation7 + $0x30] sm:$0xff]  ;;  %v265_v19 = vld [vmem:[#allocation7 + $0x68] sm:$0xff]  ;;  %v268_v20 = vld [vmem:[#allocation7 + $0x80] sm:$0xff] }
  0xfb   :  { %6513 = vmatprep.subr.bf16.mxu0 %v8491_v12  ;;  %v8500_v21 = vpack.c.bf16 %v261_v18, %v258_v17  ;;  %v264_v22 = vld [vmem:[#allocation7 + $0x60] sm:$0xff]  ;;  %v8504_v23 = vpack.c.bf16 %v268_v20, %v265_v19  ;;  %v267_v24 = vld [vmem:[#allocation7 + $0x78] sm:$0xff]  ;;  %v274_v28 = vld [vmem:[#allocation7 + $0xb0] sm:$0xff] }
  0xfc   :  { %v248_v25 = vld [vmem:[#allocation4 + $0x10] sm:$0xff]  ;;  %v251_v26 = vld [vmem:[#allocation4 + $0x28] sm:$0xff]  ;;  %v8510_v31 = vpack.c.bf16 %v267_v24, %v264_v22  ;;  %v254_v32 = vld [vmem:[#allocation7 + $0x10] sm:$0xff] }
  0xfd   :  { %5569 = vmatmul.mubr.msk.f32.vlgmr.msra.gmra.mrb[0].mxu0 %vm318_vm0, %v244_v6  ;;  %v271_v27 = vld [vmem:[#allocation7 + $0x98] sm:$0xff]  ;;  %v6508_v29 = vpack.c.bf16 %v251_v26, %v248_v25  ;;  %v257_v33 = vld [vmem:[#allocation7 + $0x28] sm:$0xff]  ;;  %v270_v35 = vld [vmem:[#allocation7 + $0x90] sm:$0xff] }
  0xfe   :  { %6515 = vmatpush1.bf16.msra.mxu0 %v8493_v15  ;;  %395 = vmatprep.mubr.f32.mxu0 %v8207_v0  ;;  %v245_v30 = vld [vmem:[%s9633_s0 + $0x8] sm:$0xff]  ;;  %v8513_v34 = vpack.c.bf16 %v274_v28, %v271_v27  ;;  %v273_v36 = vld [vmem:[#allocation7 + $0xa8] sm:$0xff]  ;;  %v8515_v38 = vpack.c.bf16 %v257_v33, %v254_v32  ;;  %v280_v39 = vld [vmem:[#allocation7 + $0xe0] sm:$0xff]  ;;  %v303_v27 = vlaneseq }
  0xff   :  { %6517 = vmatprep.subr.bf16.mxu0 %v8496_v16  ;;  %6509 = vmatprep.subr.bf16.mxu1 %v6508_v29  ;;  %v277_v37 = vld [vmem:[#allocation7 + $0xc8] sm:$0xff]  ;;  %v260_v41 = vld [vmem:[#allocation7 + $0x40] sm:$0xff]  ;;  %v263_v42 = vld [vmem:[#allocation7 + $0x58] sm:$0xff]  ;;  %v8521_v43 = vpack.c.bf16 %v273_v36, %v270_v35 }
 0x100   :  { %6511 = vmatpush3.bf16.msra.mxu1 %v6508_v29  ;;  %v8525_v44 = vpack.c.bf16 %v280_v39, %v277_v37  ;;  %v276_v45 = vld [vmem:[#allocation7 + $0xc0] sm:$0xff]  ;;  %v279_v46 = vld [vmem:[#allocation7 + $0xd8] sm:$0xff]  ;;  %v8528_v48 = vpack.c.bf16 %v263_v42, %v260_v41  ;;  %v286_v49 = vld [vmem:[#allocation7 + $0x110] sm:$0xff]  ;;  %v8620_v28 = vshrl.u32 %v303_v27, 7 }
 0x101   :  { %6544 = vmatprep.subr.bf16.mxu1 %v8216_v40  ;;  %5570 = vmatmul.mubr.msk.f32.gmra.mrb[2].mxu0 %vm318_vm0, %v245_v30  ;;  %v283_v47 = vld [vmem:[#allocation7 + $0xf8] sm:$0xff]  ;;  %v266_v50 = vld [vmem:[#allocation7 + $0x70] sm:$0xff]  ;;  %v269_v51 = vld [vmem:[#allocation7 + $0x88] sm:$0xff]  ;;  %v8534_v52 = vpack.c.bf16 %v279_v46, %v276_v45 }
 0x102   :  { %6519 = vmatpush1.bf16.msra.mxu0 %v8500_v21  ;;  %547 = vmatprep.mubr.f32.mxu0 %v8207_v0  ;;  %v8537_v53 = vpack.c.bf16 %v286_v49, %v283_v47  ;;  %v282_v54 = vld [vmem:[#allocation7 + $0xf0] sm:$0xff]  ;;  %v285_v55 = vld [vmem:[#allocation7 + $0x108] sm:$0xff]  ;;  %v8540_v57 = vpack.c.bf16 %v269_v51, %v266_v50  ;;  %v292_v58 = vld [vmem:[#allocation7 + $0x140] sm:$0xff]  ;;  %v8623_v32 = vsub.s32 0, %v8620_v28  ;;  %v8626_v33 = vsub.s32 2, %v8620_v28 }
 0x103   :  { %6521 = vmatprep.subr.bf16.mxu0 %v8504_v23  ;;  %5907 = vmatmul.mubr.msk.f32.vlgmr.msra.gmra.mrb[0].mxu1 %vm318_vm0, %v245_v30  ;;  %v289_v56 = vld [vmem:[#allocation7 + $0x128] sm:$0xff]  ;;  %v272_v59 = vld [vmem:[#allocation7 + $0xa0] sm:$0xff]  ;;  %v275_v60 = vld [vmem:[#allocation7 + $0xb8] sm:$0xff]  ;;  %v8544_v61 = vpack.c.bf16 %v285_v55, %v282_v54  ;;  %v8629_v36 = vsub.s32 1, %v8620_v28 }
 0x104   :  { %6546 = vmatpush3.bf16.msra.mxu1 %v8515_v38  ;;  %5941 = vmatprep.mubr.msk.f32.mxu1 %vm8217_vm1, %v8207_v0  ;;  %v8547_v62 = vpack.c.bf16 %v292_v58, %v289_v56  ;;  %v288_v63 = vld [vmem:[#allocation7 + $0x120] sm:$0xff]  ;;  %v291_v1 = vld [vmem:[#allocation7 + $0x138] sm:$0xff]  ;;  %v8550_v3 = vpack.c.bf16 %v275_v60, %v272_v59  ;;  %v298_v4 = vld [vmem:[#allocation7 + $0x170] sm:$0xff] }
 0x105   :  { %6547 = vmatprep.subr.bf16.mxu1 %v8216_v40  ;;  %v295_v2 = vld [vmem:[#allocation7 + $0x158] sm:$0xff]  ;;  %v278_v5 = vld [vmem:[#allocation7 + $0xd0] sm:$0xff]  ;;  %v281_v6 = vld [vmem:[#allocation7 + $0xe8] sm:$0xff]  ;;  %v8554_v7 = vpack.c.bf16 %v291_v1, %v288_v63 }
 0x106   :  { %6523 = vmatpush1.bf16.msra.mxu0 %v8510_v31  ;;  %v8557_v8 = vpack.c.bf16 %v298_v4, %v295_v2  ;;  %v294_v9 = vld [vmem:[#allocation7 + $0x150] sm:$0xff]  ;;  %v297_v10 = vld [vmem:[#allocation7 + $0x168] sm:$0xff]  ;;  %v8560_v11 = vpack.c.bf16 %v281_v6, %v278_v5  ;;  %v284_v13 = vld [vmem:[#allocation7 + $0x100] sm:$0xff] }
 0x107   :  { %6525 = vmatprep.subr.bf16.mxu0 %v8513_v34  ;;  %v287_v14 = vld [vmem:[#allocation7 + $0x118] sm:$0xff]  ;;  %v8564_v17 = vpack.c.bf16 %v297_v10, %v294_v9  ;;  %v290_v19 = vld [vmem:[#allocation7 + $0x130] sm:$0xff]  ;;  %v293_v20 = vld [vmem:[#allocation7 + $0x148] sm:$0xff] }
 0x108   :  { %6549 = vmatpush3.bf16.msra.mxu1 %v8528_v48  ;;  %v8568_v18 = vpack.c.bf16 %v287_v14, %v284_v13  ;;  %v8573_v22 = vpack.c.bf16 %v293_v20, %v290_v19  ;;  %v296_v24 = vld [vmem:[#allocation7 + $0x160] sm:$0xff]  ;;  %v299_v25 = vld [vmem:[#allocation7 + $0x178] sm:$0xff] }
 0x109   :  { %6550 = vmatprep.subr.bf16.mxu1 %v8216_v40  ;;  %v8581_v26 = vpack.c.bf16 %v299_v25, %v296_v24  ;;  %v300_v35 = vld [vmem:[#allocation9] sm:$0x7]  ;;  %v8646_v10 = vld [vmem:[#allocation10] ss:$0 sm:$0xff] }
 0x10a   :  { %6527 = vmatpush1.bf16.msra.mxu0 %v8521_v43  ;;  %v306_v37 = vrot.slane %v300_v35, %v8623_v32  ;;  %v314_v39 = vrot.slane %v300_v35, %v8626_v33  ;;  %v310_v41 = vrot.slane %v300_v35, %v8629_v36 }
 0x10b   :  { %6529 = vmatprep.subr.bf16.mxu0 %v8525_v44 }
 0x10c   :  { %6552 = vmatpush3.bf16.msra.mxu1 %v8540_v57 }
 0x10d   :  { %6553 = vmatprep.subr.bf16.mxu1 %v8216_v40 }
 0x10e   :  { %6531 = vmatpush1.bf16.msra.mxu0 %v8534_v52 }
 0x10f   :  { %6533 = vmatprep.subr.bf16.mxu0 %v8537_v53 }
 0x110   :  { %6555 = vmatpush3.bf16.msra.mxu1 %v8550_v3 }
 0x111   :  { %6556 = vmatprep.subr.bf16.mxu1 %v8216_v40 }
 0x112   :  { %6535 = vmatpush1.bf16.msra.mxu0 %v8544_v61 }
 0x113   :  { %6537 = vmatprep.subr.bf16.mxu0 %v8547_v62 }
 0x114   :  { %6558 = vmatpush3.bf16.msra.mxu1 %v8560_v11 }
 0x115   :  { %6559 = vmatprep.subr.bf16.mxu1 %v8216_v40 }
 0x116   :  { %6539 = vmatpush1.bf16.msra.mxu0 %v8554_v7 }
 0x117   :  { %6541 = vmatprep.subr.bf16.mxu0 %v8557_v8 }
 0x118   :  { %6561 = vmatpush3.bf16.msra.mxu1 %v8568_v18 }
 0x119   :  { %6562 = vmatprep.subr.bf16.mxu1 %v8216_v40 }
 0x11a   :  { %6543 = vmatpush1.bf16.msra.mxu0 %v8564_v17 }
 0x11b   :  { %6569 = vmatprep.subr.bf16.mxu0 %v8491_v12 }
 0x11c   :  { %6564 = vmatpush3.bf16.msra.mxu1 %v8573_v22 }
 0x11d   :  { %548 = vmatmul.mubr.f32.vlgmr.msra.gmra.mrb[4].mxu0 %v8207_v0  ;;  %6565 = vmatprep.subr.bf16.mxu1 %v8216_v40 }
 0x11e   :  { %6571 = vmatpush1.bf16.msra.mxu0 %v8493_v15  ;;  %710 = vmatprep.mubr.f32.mxu0 %v8207_v0 }
 0x11f   :  { %6573 = vmatprep.subr.bf16.mxu0 %v8496_v16 }
 0x120   :  { %6567 = vmatpush3.bf16.msra.mxu1 %v8581_v26 }
 0x121   :  { %6600 = vmatprep.subr.bf16.mxu1 %v8216_v40 }
 0x122   :  { %6575 = vmatpush1.bf16.msra.mxu0 %v8500_v21 }
 0x123   :  { %6577 = vmatprep.subr.bf16.mxu0 %v8504_v23  ;;  %5942 = vmatmul.mubr.f32.vlgmr.msra.gmra.mrb[2].mxu1 %v8207_v0 }
 0x124   :  { %6602 = vmatpush3.bf16.msra.mxu1 %v8515_v38  ;;  %5976 = vmatprep.mubr.msk.f32.mxu1 %vm8217_vm1, %v8207_v0 }
 0x125   :  { %6603 = vmatprep.subr.bf16.mxu1 %v8216_v40 }
 0x126   :  { %6579 = vmatpush1.bf16.msra.mxu0 %v8510_v31 }
 0x127   :  { %6581 = vmatprep.subr.bf16.mxu0 %v8513_v34 }
 0x128   :  { %6605 = vmatpush3.bf16.msra.mxu1 %v8528_v48 }
 0x129   :  { %6606 = vmatprep.subr.bf16.mxu1 %v8216_v40 }
 0x12a   :  { %6583 = vmatpush1.bf16.msra.mxu0 %v8521_v43 }
 0x12b   :  { %6585 = vmatprep.subr.bf16.mxu0 %v8525_v44 }
 0x12c   :  { %6608 = vmatpush3.bf16.msra.mxu1 %v8540_v57 }
 0x12d   :  { %6609 = vmatprep.subr.bf16.mxu1 %v8216_v40 }
 0x12e   :  { %6587 = vmatpush1.bf16.msra.mxu0 %v8534_v52 }
 0x12f   :  { %6589 = vmatprep.subr.bf16.mxu0 %v8537_v53 }
 0x130   :  { %6611 = vmatpush3.bf16.msra.mxu1 %v8550_v3 }
 0x131   :  { %6612 = vmatprep.subr.bf16.mxu1 %v8216_v40 }
 0x132   :  { %6591 = vmatpush1.bf16.msra.mxu0 %v8544_v61 }
 0x133   :  { %6593 = vmatprep.subr.bf16.mxu0 %v8547_v62 }
 0x134   :  { %6614 = vmatpush3.bf16.msra.mxu1 %v8560_v11 }
 0x135   :  { %6615 = vmatprep.subr.bf16.mxu1 %v8216_v40 }
 0x136   :  { %6595 = vmatpush1.bf16.msra.mxu0 %v8554_v7 }
 0x137   :  { %6597 = vmatprep.subr.bf16.mxu0 %v8557_v8 }
 0x138   :  { %6617 = vmatpush3.bf16.msra.mxu1 %v8568_v18 }
 0x139   :  { %6618 = vmatprep.subr.bf16.mxu1 %v8216_v40 }
 0x13a   :  { %6599 = vmatpush1.bf16.msra.mxu0 %v8564_v17 }
 0x13b   :  { %6625 = vmatprep.subr.bf16.mxu0 %v8491_v12 }
 0x13c   :  { %6620 = vmatpush3.bf16.msra.mxu1 %v8573_v22 }
 0x13d   :  { %6621 = vmatprep.subr.bf16.mxu1 %v8216_v40 }
 0x140   :  { %6623 = vmatpush3.bf16.msra.mxu1 %v8581_v26 }
 0x141   :  { %6656 = vmatprep.subr.bf16.mxu1 %v8216_v40 }
 0x1d0   :  { %v391_v29 = vpop.f32.mrb[0].mxu0 }
 0x1d1   :  { %v393_v30 = vpop.f32.mrb[1].mxu0  ;;  %v8640_v54 = vadd.f32 %v391_v29, %v306_v37 }
 0x1d2   :  { %v8643_v59 = vadd.f32 %v393_v30, %v310_v41 }
 0x1d4   :  { %v397_v42 = vpop.f32.mrb[2].mxu0 }
 0x1d5   :  { %v8634_v45 = vadd.f32 %v397_v42, %v306_v37  ;;  %v399_v46 = vpop.f32.mrb[3].mxu0 }
 0x1d6   :  { %v5908_v47 = vpop.f32.mrb[0].mxu1  ;;  %v8636_v49 = vadd.f32 %v399_v46, %v310_v41 }
 0x1d7   :  { %v8638_v50 = vadd.f32 %v5908_v47, %v314_v39  ;;  %v468_v51 = vpop.f32.mrb[1].mxu1 }
 0x1d8   :  { %v8649_v20 = vadd.f32 %v468_v51, %v314_v39 }
 0x1f0   :  { %v549_v55 = vpop.f32.mrb[4].mxu0 }
 0x1f1   :  { %v624_v56 = vadd.f32 %v549_v55, %v8640_v54  ;;  %v551_v58 = vpop.f32.mrb[5].mxu0 }
 0x1f2   :  { %v631_v63 = vadd.f32 %v551_v58, %v8643_v59 }
 0x1f3   :  { %v5574_v60 = vmul.f32 -1.442695, %v624_v56 }
 0x1f4   :  { %v5575_v1 = vmul.f32 -1.442695, %v631_v63 }
 0x1f5   :  { %7686 = vpow2.f32 %v5574_v60 }
 0x1f6   :  { %v620_v2 = vpop.f32.mrb[2].mxu1  ;;  %7688 = vpow2.f32 %v5575_v1 }
 0x1f7   :  { %v5943_v4 = vpop.f32.mrb[3].mxu1  ;;  %v638_v14 = vadd.f32 %v8646_v10, %v620_v2 }
 0x1ff   :  { %v7687_v5 = vpop.eup %7686 }
 0x200   :  { %v628_v6 = vadd.f32 1.0, %v7687_v5  ;;  %v7689_v9 = vpop.eup %7688 }
 0x201   :  { %v635_v13 = vadd.f32 1.0, %v7689_v9 }
 0x202   :  { %7690 = vrcp.f32 %v628_v6 }
 0x203   :  { %7692 = vrcp.f32 %v635_v13 }
 0x20c   :  { %v7691_v19 = vpop.eup %7690 }
 0x20d   :  { %v639_v24 = vmul.f32 %v7691_v19, %v638_v14  ;;  %v7693_v27 = vpop.eup %7692 }
 0x20e   :  { %v642_v29 = vsub.f32 1.0, %v7693_v27  ;;  %v644_v37 = vmul.f32 0.0, %v7693_v27 }
 0x20f   :  { %v640_v25 = vadd.f32 %v639_v24, %v8649_v20 }
 0x211   :  { %7694 = vtanh.f32 %v640_v25 }
 0x21b   :  { %v7695_v30 = vpop.eup %7694 }
 0x21c   :  { %v643_v35 = vmul.f32 %v7695_v30, %v642_v29 }
 0x21e   :  { %v8652_v41 = vadd.f32 %v644_v37, %v643_v35 }
 0x220   :  { %711 = vmatmul.mubr.f32.vlgmr.msra.gmra.mrb[6].mxu0 %v8652_v41  ;;  %5977 = vmatmul.mubr.f32.vlgmr.msra.gmra.mrb[4].mxu1 %v8652_v41  ;;  %v817_v25 = vrot.slane %v8652_v41, 6 }
 0x221   :  { %6627 = vmatpush1.bf16.msra.mxu0 %v8493_v15  ;;  %6658 = vmatpush3.bf16.msra.mxu1 %v8515_v38 }
 0x222   :  { %6629 = vmatprep.subr.bf16.mxu0 %v8496_v16  ;;  %6659 = vmatprep.subr.bf16.mxu1 %v8216_v40 }
 0x223   :  { %888 = vmatprep.mubr.f32.mxu0 %v8207_v0  ;;  %6011 = vmatprep.mubr.msk.f32.mxu1 %vm8217_vm1, %v8207_v0 }
 0x225   :  { %6631 = vmatpush1.bf16.msra.mxu0 %v8500_v21  ;;  %6661 = vmatpush3.bf16.msra.mxu1 %v8528_v48 }
 0x226   :  { %6633 = vmatprep.subr.bf16.mxu0 %v8504_v23  ;;  %6662 = vmatprep.subr.bf16.mxu1 %v8216_v40 }
 0x229   :  { %6635 = vmatpush1.bf16.msra.mxu0 %v8510_v31  ;;  %6664 = vmatpush3.bf16.msra.mxu1 %v8540_v57 }
 0x22a   :  { %6637 = vmatprep.subr.bf16.mxu0 %v8513_v34  ;;  %6665 = vmatprep.subr.bf16.mxu1 %v8216_v40 }
 0x22d   :  { %6639 = vmatpush1.bf16.msra.mxu0 %v8521_v43  ;;  %6667 = vmatpush3.bf16.msra.mxu1 %v8550_v3 }
 0x22e   :  { %6641 = vmatprep.subr.bf16.mxu0 %v8525_v44  ;;  %6668 = vmatprep.subr.bf16.mxu1 %v8216_v40 }
 0x231   :  { %6643 = vmatpush1.bf16.msra.mxu0 %v8534_v52  ;;  %6670 = vmatpush3.bf16.msra.mxu1 %v8560_v11 }
 0x232   :  { %6645 = vmatprep.subr.bf16.mxu0 %v8537_v53  ;;  %6671 = vmatprep.subr.bf16.mxu1 %v8216_v40 }
 0x235   :  { %6647 = vmatpush1.bf16.msra.mxu0 %v8544_v61  ;;  %6673 = vmatpush3.bf16.msra.mxu1 %v8568_v18 }
 0x236   :  { %6649 = vmatprep.subr.bf16.mxu0 %v8547_v62  ;;  %6674 = vmatprep.subr.bf16.mxu1 %v8216_v40 }
 0x239   :  { %6651 = vmatpush1.bf16.msra.mxu0 %v8554_v7  ;;  %6676 = vmatpush3.bf16.msra.mxu1 %v8573_v22 }
 0x23a   :  { %6653 = vmatprep.subr.bf16.mxu0 %v8557_v8  ;;  %6677 = vmatprep.subr.bf16.mxu1 %v8216_v40 }
 0x23d   :  { %6655 = vmatpush1.bf16.msra.mxu0 %v8564_v17  ;;  %6679 = vmatpush3.bf16.msra.mxu1 %v8581_v26 }
 0x23e   :  { %6681 = vmatprep.subr.bf16.mxu0 %v8491_v12  ;;  %6712 = vmatprep.subr.bf16.mxu1 %v8216_v40 }
 0x2f3   :  { %v712_v39 = vpop.f32.mrb[6].mxu0  ;;  %v783_v42 = vpop.f32.mrb[4].mxu1 }
 0x2f4   :  { %v788_v46 = vrot.slane %v712_v39, 6  ;;  %v714_v47 = vpop.f32.mrb[7].mxu0  ;;  %v5978_v51 = vpop.f32.mrb[5].mxu1  ;;  %v807_v5 = vadd.f32 %v8646_v10, %v783_v42 }
 0x2f5   :  { %v798_v55 = vrot.slane %v714_v47, 6 }
 0x2f6   :  { %v790_v56 = vadd.f32 %v788_v46, %v8640_v54  ;;  %v809_v9 = vrot.slane %v807_v5, 6 }
 0x2f7   :  { %v800_v60 = vadd.f32 %v798_v55, %v8643_v59 }
 0x2f8   :  { %v5576_v58 = vmul.f32 -1.442695, %v790_v56 }
 0x2f9   :  { %v5577_v63 = vmul.f32 -1.442695, %v800_v60 }
 0x2fa   :  { %7696 = vpow2.f32 %v5576_v58 }
 0x2fb   :  { %7698 = vpow2.f32 %v5577_v63 }
 0x304   :  { %v7697_v1 = vpop.eup %7696 }
 0x305   :  { %v794_v2 = vadd.f32 1.0, %v7697_v1  ;;  %v7699_v4 = vpop.eup %7698 }
 0x306   :  { %v804_v6 = vadd.f32 1.0, %v7699_v4 }
 0x307   :  { %7700 = vrcp.f32 %v794_v2 }
 0x308   :  { %7702 = vrcp.f32 %v804_v6 }
 0x311   :  { %v7701_v13 = vpop.eup %7700 }
 0x312   :  { %v811_v14 = vmul.f32 %v7701_v13, %v809_v9  ;;  %v7703_v24 = vpop.eup %7702 }
 0x313   :  { %v814_v27 = vsub.f32 1.0, %v7703_v24  ;;  %v819_v35 = vmul.f32 %v7703_v24, %v817_v25 }
 0x314   :  { %v812_v19 = vadd.f32 %v811_v14, %v8649_v20 }
 0x316   :  { %7704 = vtanh.f32 %v812_v19 }
 0x320   :  { %v7705_v29 = vpop.eup %7704 }
 0x321   :  { %v815_v30 = vmul.f32 %v7705_v29, %v814_v27 }
 0x323   :  { %v8696_v37 = vadd.f32 %v819_v35, %v815_v30 }
 0x325   :  { %v822_v39 = vrot.slane %v8696_v37, 2  ;;  %v994_v19 = vrot.slane %v8696_v37, 6 }
 0x327   :  { %889 = vmatmul.mubr.f32.vlgmr.msra.gmra.mrb[8].mxu0 %v822_v39  ;;  %6012 = vmatmul.mubr.f32.vlgmr.msra.gmra.mrb[6].mxu1 %v822_v39 }
 0x328   :  { %6683 = vmatpush1.bf16.msra.mxu0 %v8493_v15  ;;  %6714 = vmatpush3.bf16.msra.mxu1 %v8515_v38 }
 0x329   :  { %6685 = vmatprep.subr.bf16.mxu0 %v8496_v16  ;;  %6715 = vmatprep.subr.bf16.mxu1 %v8216_v40 }
 0x32a   :  { %1065 = vmatprep.mubr.f32.mxu0 %v8207_v0  ;;  %6046 = vmatprep.mubr.msk.f32.mxu1 %vm8217_vm1, %v8207_v0 }
 0x32c   :  { %6687 = vmatpush1.bf16.msra.mxu0 %v8500_v21  ;;  %6717 = vmatpush3.bf16.msra.mxu1 %v8528_v48 }
 0x32d   :  { %6689 = vmatprep.subr.bf16.mxu0 %v8504_v23  ;;  %6718 = vmatprep.subr.bf16.mxu1 %v8216_v40 }
 0x330   :  { %6691 = vmatpush1.bf16.msra.mxu0 %v8510_v31  ;;  %6720 = vmatpush3.bf16.msra.mxu1 %v8540_v57 }
 0x331   :  { %6693 = vmatprep.subr.bf16.mxu0 %v8513_v34  ;;  %6721 = vmatprep.subr.bf16.mxu1 %v8216_v40 }
 0x334   :  { %6695 = vmatpush1.bf16.msra.mxu0 %v8521_v43  ;;  %6723 = vmatpush3.bf16.msra.mxu1 %v8550_v3 }
 0x335   :  { %6697 = vmatprep.subr.bf16.mxu0 %v8525_v44  ;;  %6724 = vmatprep.subr.bf16.mxu1 %v8216_v40 }
 0x338   :  { %6699 = vmatpush1.bf16.msra.mxu0 %v8534_v52  ;;  %6726 = vmatpush3.bf16.msra.mxu1 %v8560_v11 }
 0x339   :  { %6701 = vmatprep.subr.bf16.mxu0 %v8537_v53  ;;  %6727 = vmatprep.subr.bf16.mxu1 %v8216_v40 }
 0x33c   :  { %6703 = vmatpush1.bf16.msra.mxu0 %v8544_v61  ;;  %6729 = vmatpush3.bf16.msra.mxu1 %v8568_v18 }
 0x33d   :  { %6705 = vmatprep.subr.bf16.mxu0 %v8547_v62  ;;  %6730 = vmatprep.subr.bf16.mxu1 %v8216_v40 }
 0x340   :  { %6707 = vmatpush1.bf16.msra.mxu0 %v8554_v7  ;;  %6732 = vmatpush3.bf16.msra.mxu1 %v8573_v22 }
 0x341   :  { %6709 = vmatprep.subr.bf16.mxu0 %v8557_v8  ;;  %6733 = vmatprep.subr.bf16.mxu1 %v8216_v40 }
 0x344   :  { %6711 = vmatpush1.bf16.msra.mxu0 %v8564_v17  ;;  %6735 = vmatpush3.bf16.msra.mxu1 %v8581_v26 }
 0x345   :  { %6737 = vmatprep.subr.bf16.mxu0 %v8491_v12  ;;  %6768 = vmatprep.subr.bf16.mxu1 %v8216_v40 }
 0x3fa   :  { %v890_v42 = vpop.f32.mrb[8].mxu0  ;;  %v961_v46 = vpop.f32.mrb[6].mxu1 }
 0x3fb   :  { %v966_v47 = vrot.slane %v890_v42, 4  ;;  %v892_v51 = vpop.f32.mrb[9].mxu0  ;;  %v6013_v55 = vpop.f32.mrb[7].mxu1  ;;  %v985_v9 = vadd.f32 %v8646_v10, %v961_v46  ;;  %v1871_v46 = vsel %vm1870_vm2, %v8652_v41, %v8696_v37 }
 0x3fc   :  { %v976_v56 = vrot.slane %v892_v51, 4 }
 0x3fd   :  { %v968_v58 = vadd.f32 %v966_v47, %v8640_v54  ;;  %v987_v13 = vrot.slane %v985_v9, 4 }
 0x3fe   :  { %v978_v60 = vadd.f32 %v976_v56, %v8643_v59 }
 0x3ff   :  { %v5578_v63 = vmul.f32 -1.442695, %v968_v58 }
 0x400   :  { %v5579_v1 = vmul.f32 -1.442695, %v978_v60 }
 0x401   :  { %7706 = vpow2.f32 %v5578_v63 }
 0x402   :  { %7708 = vpow2.f32 %v5579_v1 }
 0x40b   :  { %v7707_v2 = vpop.eup %7706 }
 0x40c   :  { %v7709_v4 = vpop.eup %7708  ;;  %v972_v5 = vadd.f32 1.0, %v7707_v2 }
 0x40d   :  { %v982_v6 = vadd.f32 1.0, %v7709_v4 }
 0x40e   :  { %7710 = vrcp.f32 %v972_v5 }
 0x40f   :  { %7712 = vrcp.f32 %v982_v6 }
 0x418   :  { %v7711_v14 = vpop.eup %7710 }
 0x419   :  { %v7713_v24 = vpop.eup %7712  ;;  %v989_v25 = vmul.f32 %v7711_v14, %v987_v13 }
 0x41a   :  { %v996_v27 = vmul.f32 %v7713_v24, %v994_v19  ;;  %v992_v30 = vsub.f32 1.0, %v7713_v24 }
 0x41b   :  { %v990_v29 = vadd.f32 %v989_v25, %v8649_v20 }
 0x41d   :  { %7714 = vtanh.f32 %v990_v29 }
 0x427   :  { %v7715_v35 = vpop.eup %7714 }
 0x428   :  { %v993_v39 = vmul.f32 %v7715_v35, %v992_v30 }
 0x42a   :  { %v8739_v42 = vadd.f32 %v996_v27, %v993_v39 }
 0x42c   :  { %v999_v47 = vrot.slane %v8739_v42, 4  ;;  %v8747_v51 = vsel %vm1872_vm3, %v1871_v46, %v8739_v42  ;;  %v1171_v25 = vrot.slane %v8739_v42, 6 }
 0x42e   :  { %1066 = vmatmul.mubr.f32.vlgmr.msra.gmra.mrb[10].mxu0 %v999_v47  ;;  %6047 = vmatmul.mubr.f32.vlgmr.msra.gmra.mrb[8].mxu1 %v999_v47 }
 0x42f   :  { %6739 = vmatpush1.bf16.msra.mxu0 %v8493_v15  ;;  %6770 = vmatpush3.bf16.msra.mxu1 %v8515_v38 }
 0x430   :  { %6741 = vmatprep.subr.bf16.mxu0 %v8496_v16  ;;  %6771 = vmatprep.subr.bf16.mxu1 %v8216_v40 }
 0x431   :  { %1242 = vmatprep.mubr.f32.mxu0 %v8207_v0  ;;  %6081 = vmatprep.mubr.msk.f32.mxu1 %vm8217_vm1, %v8207_v0 }
 0x433   :  { %6743 = vmatpush1.bf16.msra.mxu0 %v8500_v21  ;;  %6773 = vmatpush3.bf16.msra.mxu1 %v8528_v48 }
 0x434   :  { %6745 = vmatprep.subr.bf16.mxu0 %v8504_v23  ;;  %6774 = vmatprep.subr.bf16.mxu1 %v8216_v40 }
 0x437   :  { %6747 = vmatpush1.bf16.msra.mxu0 %v8510_v31  ;;  %6776 = vmatpush3.bf16.msra.mxu1 %v8540_v57 }
 0x438   :  { %6749 = vmatprep.subr.bf16.mxu0 %v8513_v34  ;;  %6777 = vmatprep.subr.bf16.mxu1 %v8216_v40 }
 0x43b   :  { %6751 = vmatpush1.bf16.msra.mxu0 %v8521_v43  ;;  %6779 = vmatpush3.bf16.msra.mxu1 %v8550_v3 }
 0x43c   :  { %6753 = vmatprep.subr.bf16.mxu0 %v8525_v44  ;;  %6780 = vmatprep.subr.bf16.mxu1 %v8216_v40 }
 0x43f   :  { %6755 = vmatpush1.bf16.msra.mxu0 %v8534_v52  ;;  %6782 = vmatpush3.bf16.msra.mxu1 %v8560_v11 }
 0x440   :  { %6757 = vmatprep.subr.bf16.mxu0 %v8537_v53  ;;  %6783 = vmatprep.subr.bf16.mxu1 %v8216_v40 }
 0x443   :  { %6759 = vmatpush1.bf16.msra.mxu0 %v8544_v61  ;;  %6785 = vmatpush3.bf16.msra.mxu1 %v8568_v18 }
 0x444   :  { %6761 = vmatprep.subr.bf16.mxu0 %v8547_v62  ;;  %6786 = vmatprep.subr.bf16.mxu1 %v8216_v40 }
 0x447   :  { %6763 = vmatpush1.bf16.msra.mxu0 %v8554_v7  ;;  %6788 = vmatpush3.bf16.msra.mxu1 %v8573_v22 }
 0x448   :  { %6765 = vmatprep.subr.bf16.mxu0 %v8557_v8  ;;  %6789 = vmatprep.subr.bf16.mxu1 %v8216_v40 }
 0x44b   :  { %6767 = vmatpush1.bf16.msra.mxu0 %v8564_v17  ;;  %6791 = vmatpush3.bf16.msra.mxu1 %v8581_v26 }
 0x44c   :  { %6793 = vmatprep.subr.bf16.mxu0 %v8491_v12  ;;  %6824 = vmatprep.subr.bf16.mxu1 %v8216_v40 }
 0x501   :  { %v1067_v41 = vpop.f32.mrb[10].mxu0  ;;  %v1138_v37 = vpop.f32.mrb[8].mxu1 }
 0x502   :  { %v1143_v55 = vrot.slane %v1067_v41, 2  ;;  %v1069_v56 = vpop.f32.mrb[11].mxu0  ;;  %v6048_v58 = vpop.f32.mrb[9].mxu1  ;;  %v1162_v14 = vadd.f32 %v8646_v10, %v1138_v37 }
 0x503   :  { %v1153_v60 = vrot.slane %v1069_v56, 2 }
 0x504   :  { %v1145_v63 = vadd.f32 %v1143_v55, %v8640_v54  ;;  %v1164_v19 = vrot.slane %v1162_v14, 2 }
 0x505   :  { %v1155_v1 = vadd.f32 %v1153_v60, %v8643_v59 }
 0x506   :  { %v5580_v2 = vmul.f32 -1.442695, %v1145_v63 }
 0x507   :  { %v5581_v4 = vmul.f32 -1.442695, %v1155_v1 }
 0x508   :  { %7716 = vpow2.f32 %v5580_v2 }
 0x509   :  { %7718 = vpow2.f32 %v5581_v4 }
 0x512   :  { %v7717_v5 = vpop.eup %7716 }
 0x513   :  { %v7719_v6 = vpop.eup %7718  ;;  %v1149_v9 = vadd.f32 1.0, %v7717_v5 }
 0x514   :  { %v1159_v13 = vadd.f32 1.0, %v7719_v6 }
 0x515   :  { %7720 = vrcp.f32 %v1149_v9 }
 0x516   :  { %7722 = vrcp.f32 %v1159_v13 }
 0x51f   :  { %v7721_v24 = vpop.eup %7720 }
 0x520   :  { %v7723_v27 = vpop.eup %7722  ;;  %v1166_v54 = vmul.f32 %v7721_v24, %v1164_v19 }
 0x521   :  { %v1173_v29 = vmul.f32 %v7723_v27, %v1171_v25  ;;  %v1169_v30 = vsub.f32 1.0, %v7723_v27 }
 0x522   :  { %v1167_v59 = vadd.f32 %v1166_v54, %v8649_v20 }
 0x524   :  { %7724 = vtanh.f32 %v1167_v59 }
 0x52e   :  { %v7725_v35 = vpop.eup %7724 }
 0x52f   :  { %v1170_v39 = vmul.f32 %v7725_v35, %v1169_v30 }
 0x531   :  { %v1174_v46 = vadd.f32 %v1173_v29, %v1170_v39 }
 0x533   :  { %v8789_v47 = vrot.slane %v1174_v46, 6  ;;  %v8793_v41 = vsel %vm1874_vm4, %v8747_v51, %v1174_v46 }
 0x535   :  { %1243 = vmatmul.mubr.f32.vlgmr.msra.gmra.mrb[12].mxu0 %v8789_v47  ;;  %6082 = vmatmul.mubr.f32.vlgmr.msra.gmra.mrb[10].mxu1 %v8789_v47 }
 0x536   :  { %6795 = vmatpush1.bf16.msra.mxu0 %v8493_v15  ;;  %6826 = vmatpush3.bf16.msra.mxu1 %v8515_v38 }
 0x537   :  { %6797 = vmatprep.subr.bf16.mxu0 %v8496_v16  ;;  %6827 = vmatprep.subr.bf16.mxu1 %v8216_v40 }
 0x538   :  { %1405 = vmatprep.mubr.f32.mxu0 %v8207_v0  ;;  %6116 = vmatprep.mubr.msk.f32.mxu1 %vm8217_vm1, %v8207_v0 }
 0x53a   :  { %6799 = vmatpush1.bf16.msra.mxu0 %v8500_v21  ;;  %6829 = vmatpush3.bf16.msra.mxu1 %v8528_v48 }
 0x53b   :  { %6801 = vmatprep.subr.bf16.mxu0 %v8504_v23  ;;  %6830 = vmatprep.subr.bf16.mxu1 %v8216_v40 }
 0x53e   :  { %6803 = vmatpush1.bf16.msra.mxu0 %v8510_v31  ;;  %6832 = vmatpush3.bf16.msra.mxu1 %v8540_v57 }
 0x53f   :  { %6805 = vmatprep.subr.bf16.mxu0 %v8513_v34  ;;  %6833 = vmatprep.subr.bf16.mxu1 %v8216_v40 }
 0x542   :  { %6807 = vmatpush1.bf16.msra.mxu0 %v8521_v43  ;;  %6835 = vmatpush3.bf16.msra.mxu1 %v8550_v3 }
 0x543   :  { %6809 = vmatprep.subr.bf16.mxu0 %v8525_v44  ;;  %6836 = vmatprep.subr.bf16.mxu1 %v8216_v40 }
 0x546   :  { %6811 = vmatpush1.bf16.msra.mxu0 %v8534_v52  ;;  %6838 = vmatpush3.bf16.msra.mxu1 %v8560_v11 }
 0x547   :  { %6813 = vmatprep.subr.bf16.mxu0 %v8537_v53  ;;  %6839 = vmatprep.subr.bf16.mxu1 %v8216_v40 }
 0x54a   :  { %6815 = vmatpush1.bf16.msra.mxu0 %v8544_v61  ;;  %6841 = vmatpush3.bf16.msra.mxu1 %v8568_v18 }
 0x54b   :  { %6817 = vmatprep.subr.bf16.mxu0 %v8547_v62  ;;  %6842 = vmatprep.subr.bf16.mxu1 %v8216_v40 }
 0x54e   :  { %6819 = vmatpush1.bf16.msra.mxu0 %v8554_v7  ;;  %6844 = vmatpush3.bf16.msra.mxu1 %v8573_v22 }
 0x54f   :  { %6821 = vmatprep.subr.bf16.mxu0 %v8557_v8  ;;  %6845 = vmatprep.subr.bf16.mxu1 %v8216_v40 }
 0x552   :  { %6823 = vmatpush1.bf16.msra.mxu0 %v8564_v17  ;;  %6847 = vmatpush3.bf16.msra.mxu1 %v8581_v26 }
 0x553   :  { %6849 = vmatprep.subr.bf16.mxu0 %v8491_v12  ;;  %6880 = vmatprep.subr.bf16.mxu1 %v8216_v40 }
 0x608   :  { %v1244_v20 = vpop.f32.mrb[12].mxu0  ;;  %v1315_v42 = vpop.f32.mrb[10].mxu1 }
 0x609   :  { %v1319_v51 = vadd.f32 %v1244_v20, %v8634_v45  ;;  %v1246_v37 = vpop.f32.mrb[13].mxu0  ;;  %v6083_v55 = vpop.f32.mrb[11].mxu1  ;;  %v1333_v5 = vadd.f32 %v8646_v10, %v1315_v42 }
 0x60a   :  { %v1326_v58 = vadd.f32 %v1246_v37, %v8636_v49 }
 0x60b   :  { %v5582_v56 = vmul.f32 -1.442695, %v1319_v51 }
 0x60c   :  { %v5583_v60 = vmul.f32 -1.442695, %v1326_v58 }
 0x60d   :  { %7726 = vpow2.f32 %v5582_v56 }
 0x60e   :  { %7728 = vpow2.f32 %v5583_v60 }
 0x617   :  { %v7727_v63 = vpop.eup %7726 }
 0x618   :  { %v1323_v1 = vadd.f32 1.0, %v7727_v63  ;;  %v7729_v2 = vpop.eup %7728 }
 0x619   :  { %v1330_v4 = vadd.f32 1.0, %v7729_v2 }
 0x61a   :  { %7730 = vrcp.f32 %v1323_v1 }
 0x61b   :  { %7732 = vrcp.f32 %v1330_v4 }
 0x624   :  { %v7731_v6 = vpop.eup %7730 }
 0x625   :  { %v1334_v9 = vmul.f32 %v7731_v6, %v1333_v5  ;;  %v7733_v14 = vpop.eup %7732 }
 0x626   :  { %v1337_v19 = vsub.f32 1.0, %v7733_v14  ;;  %v1339_v27 = vmul.f32 %v7733_v14, %v8789_v47 }
 0x627   :  { %v1335_v13 = vadd.f32 %v1334_v9, %v8638_v50 }
 0x629   :  { %7734 = vtanh.f32 %v1335_v13 }
 0x633   :  { %v7735_v24 = vpop.eup %7734 }
 0x634   :  { %v1338_v25 = vmul.f32 %v7735_v24, %v1337_v19 }
 0x636   :  { %v8837_v54 = vadd.f32 %v1339_v27, %v1338_v25 }
 0x638   :  { %1406 = vmatmul.mubr.f32.vlgmr.msra.gmra.mrb[14].mxu0 %v8837_v54  ;;  %6117 = vmatmul.mubr.f32.vlgmr.msra.gmra.mrb[12].mxu1 %v8837_v54  ;;  %v1512_v5 = vrot.slane %v8837_v54, 6 }
 0x639   :  { %6851 = vmatpush1.bf16.msra.mxu0 %v8493_v15  ;;  %6882 = vmatpush3.bf16.msra.mxu1 %v8515_v38 }
 0x63a   :  { %6853 = vmatprep.subr.bf16.mxu0 %v8496_v16  ;;  %6883 = vmatprep.subr.bf16.mxu1 %v8216_v40 }
 0x63b   :  { %1583 = vmatprep.mubr.f32.mxu0 %v8207_v0  ;;  %6151 = vmatprep.mubr.msk.f32.mxu1 %vm8217_vm1, %v8207_v0 }
 0x63d   :  { %6855 = vmatpush1.bf16.msra.mxu0 %v8500_v21  ;;  %6885 = vmatpush3.bf16.msra.mxu1 %v8528_v48 }
 0x63e   :  { %6857 = vmatprep.subr.bf16.mxu0 %v8504_v23  ;;  %6886 = vmatprep.subr.bf16.mxu1 %v8216_v40 }
 0x641   :  { %6859 = vmatpush1.bf16.msra.mxu0 %v8510_v31  ;;  %6888 = vmatpush3.bf16.msra.mxu1 %v8540_v57 }
 0x642   :  { %6861 = vmatprep.subr.bf16.mxu0 %v8513_v34  ;;  %6889 = vmatprep.subr.bf16.mxu1 %v8216_v40 }
 0x645   :  { %6863 = vmatpush1.bf16.msra.mxu0 %v8521_v43  ;;  %6891 = vmatpush3.bf16.msra.mxu1 %v8550_v3 }
 0x646   :  { %6865 = vmatprep.subr.bf16.mxu0 %v8525_v44  ;;  %6892 = vmatprep.subr.bf16.mxu1 %v8216_v40 }
 0x649   :  { %6867 = vmatpush1.bf16.msra.mxu0 %v8534_v52  ;;  %6894 = vmatpush3.bf16.msra.mxu1 %v8560_v11 }
 0x64a   :  { %6869 = vmatprep.subr.bf16.mxu0 %v8537_v53  ;;  %6895 = vmatprep.subr.bf16.mxu1 %v8216_v40 }
 0x64d   :  { %6871 = vmatpush1.bf16.msra.mxu0 %v8544_v61  ;;  %6897 = vmatpush3.bf16.msra.mxu1 %v8568_v18 }
 0x64e   :  { %6873 = vmatprep.subr.bf16.mxu0 %v8547_v62  ;;  %6898 = vmatprep.subr.bf16.mxu1 %v8216_v40 }
 0x651   :  { %6875 = vmatpush1.bf16.msra.mxu0 %v8554_v7  ;;  %6900 = vmatpush3.bf16.msra.mxu1 %v8573_v22 }
 0x652   :  { %6877 = vmatprep.subr.bf16.mxu0 %v8557_v8  ;;  %6901 = vmatprep.subr.bf16.mxu1 %v8216_v40 }
 0x655   :  { %6879 = vmatpush1.bf16.msra.mxu0 %v8564_v17  ;;  %6903 = vmatpush3.bf16.msra.mxu1 %v8581_v26 }
 0x656   :  { %6905 = vmatprep.subr.bf16.mxu0 %v8491_v12  ;;  %6936 = vmatprep.subr.bf16.mxu1 %v8216_v40 }
 0x70b   :  { %v1407_v29 = vpop.f32.mrb[14].mxu0  ;;  %v1478_v59 = vpop.f32.mrb[12].mxu1 }
 0x70c   :  { %v1483_v30 = vrot.slane %v1407_v29, 6  ;;  %v1409_v35 = vpop.f32.mrb[15].mxu0  ;;  %v6118_v39 = vpop.f32.mrb[13].mxu1  ;;  %v1502_v56 = vadd.f32 %v8646_v10, %v1478_v59 }
 0x70d   :  { %v1493_v46 = vrot.slane %v1409_v35, 6  ;;  %v1879_v35 = vld [vmem:[#allocation12] sm:$0xff]  ;;  %v1882_v39 = vld [vmem:[#allocation12 + $0x18] sm:$0xff] }
 0x70e   :  { %v1485_v47 = vadd.f32 %v1483_v30, %v8634_v45  ;;  %v1504_v60 = vrot.slane %v1502_v56, 6 }
 0x70f   :  { %v1495_v42 = vadd.f32 %v1493_v46, %v8636_v49  ;;  %v1886_v46 = vld [vmem:[#allocation12 + $0x38] sm:$0xff] }
 0x710   :  { %v5584_v20 = vmul.f32 -1.442695, %v1485_v47  ;;  %v1889_v47 = vld [vmem:[#allocation12 + $0x50] sm:$0xff] }
 0x711   :  { %v5585_v51 = vmul.f32 -1.442695, %v1495_v42 }
 0x712   :  { %7736 = vpow2.f32 %v5584_v20 }
 0x713   :  { %7738 = vpow2.f32 %v5585_v51 }
 0x71c   :  { %v7737_v37 = vpop.eup %7736 }
 0x71d   :  { %v1489_v55 = vadd.f32 1.0, %v7737_v37  ;;  %v7739_v12 = vpop.eup %7738  ;;  %v6964_v37 = vpack.c.bf16 %v1889_v47, %v1886_v46  ;;  %v1931_v46 = vld [vmem:[#allocation13 + $0x20] sm:$0xff] }
 0x71e   :  { %v1499_v58 = vadd.f32 1.0, %v7739_v12  ;;  %v1888_v12 = vld [vmem:[#allocation12 + $0x48] sm:$0xff] }
 0x71f   :  { %7740 = vrcp.f32 %v1489_v55  ;;  %v1885_v55 = vld [vmem:[#allocation12 + $0x30] sm:$0xff] }
 0x720   :  { %7742 = vrcp.f32 %v1499_v58  ;;  %v1892_v58 = vld [vmem:[#allocation12 + $0x68] sm:$0xff] }
 0x729   :  { %v7741_v63 = vpop.eup %7740 }
 0x72a   :  { %v1506_v1 = vmul.f32 %v7741_v63, %v1504_v60  ;;  %v7743_v4 = vpop.eup %7742  ;;  %v1895_v60 = vld [vmem:[#allocation12 + $0x80] sm:$0xff]  ;;  %v6966_v63 = vpack.c.bf16 %v1888_v12, %v1885_v55  ;;  %v1934_v12 = vld [vmem:[#allocation13 + $0x38] sm:$0xff] }
 0x72b   :  { %v1509_v6 = vsub.f32 1.0, %v7743_v4  ;;  %v1514_v14 = vmul.f32 %v7743_v4, %v1512_v5  ;;  %v1898_v4 = vld [vmem:[#allocation12 + $0x98] sm:$0xff]  ;;  %v1901_v5 = vld [vmem:[#allocation12 + $0xb0] sm:$0xff] }
 0x72c   :  { %v1507_v2 = vadd.f32 %v1506_v1, %v8638_v50  ;;  %v6968_v1 = vpack.c.bf16 %v1895_v60, %v1892_v58  ;;  %v1937_v58 = vld [vmem:[#allocation13 + $0x50] sm:$0xff] }
 0x72d   :  { %v8942_v60 = vpack.c.bf16 %v1937_v58, %v1934_v12  ;;  %v1970_v12 = vld [vmem:[#allocation13 + $0x158] sm:$0xff]  ;;  %v1973_v58 = vld [vmem:[#allocation13 + $0x170] sm:$0xff] }
 0x72e   :  { %7744 = vtanh.f32 %v1507_v2  ;;  %v1894_v2 = vld [vmem:[#allocation12 + $0x78] sm:$0xff] }
 0x738   :  { %v7745_v9 = vpop.eup %7744 }
 0x739   :  { %v1510_v13 = vmul.f32 %v7745_v9, %v1509_v6  ;;  %v6972_v9 = vpack.c.bf16 %v1901_v5, %v1898_v4  ;;  %v1902_v4 = vld [vmem:[#allocation12 + $0xb8] sm:$0xff] }
 0x73b   :  { %v8881_v19 = vadd.f32 %v1514_v14, %v1510_v13  ;;  %v1897_v13 = vld [vmem:[#allocation12 + $0x90] sm:$0xff]  ;;  %v1900_v14 = vld [vmem:[#allocation12 + $0xa8] sm:$0xff] }
 0x73d   :  { %v1517_v24 = vrot.slane %v8881_v19, 2  ;;  %v1876_v42 = vsel %vm1870_vm2, %v8837_v54, %v8881_v19  ;;  %v1891_v54 = vld [vmem:[#allocation12 + $0x60] sm:$0xff] }
 0x73e   :  { %v6970_v6 = vpack.c.bf16 %v1894_v2, %v1891_v54  ;;  %v1899_v2 = vld [vmem:[#allocation12 + $0xa0] sm:$0xff] }
 0x73f   :  { %1584 = vmatmul.mubr.f32.vlgmr.msra.gmra.mrb[16].mxu0 %v1517_v24  ;;  %6152 = vmatmul.mubr.f32.vlgmr.msra.gmra.mrb[14].mxu1 %v1517_v24  ;;  %v1907_v24 = vld [vmem:[#allocation12 + $0xe0] sm:$0xff]  ;;  %v7004_v5 = vpack.c.bf16 %v1902_v4, %v1899_v2  ;;  %v1972_v2 = vld [vmem:[#allocation13 + $0x168] sm:$0xff] }
 0x740   :  { %6907 = vmatpush1.bf16.msra.mxu0 %v8493_v15  ;;  %6938 = vmatpush3.bf16.msra.mxu1 %v8515_v38  ;;  %v1880_v15 = vld [vmem:[#allocation12 + $0x8] sm:$0xff] }
 0x741   :  { %6909 = vmatprep.subr.bf16.mxu0 %v8496_v16  ;;  %6939 = vmatprep.subr.bf16.mxu1 %v8216_v40  ;;  %v1883_v16 = vld [vmem:[#allocation12 + $0x20] sm:$0xff] }
 0x742   :  { %1760 = vmatprep.mubr.f32.mxu0 %v8207_v0  ;;  %6186 = vmatprep.mubr.msk.f32.mxu1 %vm8217_vm1, %v8207_v0 }
 0x744   :  { %6911 = vmatpush1.bf16.msra.mxu0 %v8500_v21  ;;  %6941 = vmatpush3.bf16.msra.mxu1 %v8528_v48  ;;  %v6960_v21 = vpack.c.bf16 %v1883_v16, %v1880_v15  ;;  %v6974_v15 = vpack.c.bf16 %v1900_v14, %v1897_v13  ;;  %v1939_v14 = vld [vmem:[#allocation13 + $0x60] sm:$0xff] }
 0x745   :  { %6913 = vmatprep.subr.bf16.mxu0 %v8504_v23  ;;  %6942 = vmatprep.subr.bf16.mxu1 %v8216_v40 }
 0x748   :  { %6915 = vmatpush1.bf16.msra.mxu0 %v8510_v31  ;;  %6944 = vmatpush3.bf16.msra.mxu1 %v8540_v57 }
 0x749   :  { %6917 = vmatprep.subr.bf16.mxu0 %v8513_v34  ;;  %6945 = vmatprep.subr.bf16.mxu1 %v8216_v40 }
 0x74c   :  { %6919 = vmatpush1.bf16.msra.mxu0 %v8521_v43  ;;  %6947 = vmatpush3.bf16.msra.mxu1 %v8550_v3 }
 0x74d   :  { %6921 = vmatprep.subr.bf16.mxu0 %v8525_v44  ;;  %6948 = vmatprep.subr.bf16.mxu1 %v8216_v40 }
 0x750   :  { %6923 = vmatpush1.bf16.msra.mxu0 %v8534_v52  ;;  %6950 = vmatpush3.bf16.msra.mxu1 %v8560_v11 }
 0x751   :  { %6925 = vmatprep.subr.bf16.mxu0 %v8537_v53  ;;  %6951 = vmatprep.subr.bf16.mxu1 %v8216_v40 }
 0x754   :  { %6927 = vmatpush1.bf16.msra.mxu0 %v8544_v61  ;;  %6953 = vmatpush3.bf16.msra.mxu1 %v8568_v18  ;;  %v1689_v18 = vrot.slane %v8881_v19, 6  ;;  %v1904_v19 = vld [vmem:[#allocation12 + $0xc8] sm:$0xff] }
 0x755   :  { %6929 = vmatprep.subr.bf16.mxu0 %v8547_v62  ;;  %6954 = vmatprep.subr.bf16.mxu1 %v8216_v40  ;;  %v6976_v16 = vpack.c.bf16 %v1907_v24, %v1904_v19  ;;  %v1942_v19 = vld [vmem:[#allocation13 + $0x78] sm:$0xff] }
 0x756   :  { %v8950_v24 = vpack.c.bf16 %v1942_v19, %v1939_v14 }
 0x758   :  { %6931 = vmatpush1.bf16.msra.mxu0 %v8554_v7  ;;  %6956 = vmatpush3.bf16.msra.mxu1 %v8573_v22 }
 0x759   :  { %6933 = vmatprep.subr.bf16.mxu0 %v8557_v8  ;;  %6957 = vmatprep.subr.bf16.mxu1 %v8216_v40 }
 0x75c   :  { %6935 = vmatpush1.bf16.msra.mxu0 %v8564_v17  ;;  %6959 = vmatpush3.bf16.msra.mxu1 %v8581_v26 }
 0x75d   :  { %6961 = vmatprep.subr.bf16.mxu0 %v6960_v21  ;;  %v1903_v21 = vld [vmem:[#allocation12 + $0xc0] sm:$0xff] }
 0x812   :  { %v1585_v23 = vpop.f32.mrb[16].mxu0  ;;  %v1656_v31 = vpop.f32.mrb[14].mxu1 }
 0x813   :  { %v1661_v34 = vrot.slane %v1585_v23, 4  ;;  %v1587_v38 = vpop.f32.mrb[17].mxu0  ;;  %v6153_v43 = vpop.f32.mrb[15].mxu1  ;;  %v1680_v8 = vadd.f32 %v8646_v10, %v1656_v31  ;;  %v6962_v10 = vpack.c.bf16 %v1882_v39, %v1879_v35  ;;  %v1906_v23 = vld [vmem:[#allocation12 + $0xd8] sm:$0xff]  ;;  %v1928_v39 = vld [vmem:[#allocation13 + $0x8] sm:$0xff] }
 0x814   :  { %v1671_v44 = vrot.slane %v1587_v38, 4  ;;  %v1910_v31 = vld [vmem:[#allocation12 + $0xf8] sm:$0xff]  ;;  %v6978_v38 = vpack.c.bf16 %v1906_v23, %v1903_v21  ;;  %v8936_v47 = vpack.c.bf16 %v1931_v46, %v1928_v39  ;;  %v1967_v39 = vld [vmem:[#allocation13 + $0x140] sm:$0xff] }
 0x815   :  { %v1663_v48 = vadd.f32 %v1661_v34, %v8634_v45  ;;  %v1682_v11 = vrot.slane %v1680_v8, 4  ;;  %v1913_v34 = vld [vmem:[#allocation12 + $0x110] sm:$0xff]  ;;  %v1946_v23 = vld [vmem:[#allocation13 + $0x98] sm:$0xff] }
 0x816   :  { %v1673_v52 = vadd.f32 %v1671_v44, %v8636_v49  ;;  %v6980_v43 = vpack.c.bf16 %v1913_v34, %v1910_v31  ;;  %v1909_v44 = vld [vmem:[#allocation12 + $0xf0] sm:$0xff] }
 0x817   :  { %v5586_v53 = vmul.f32 -1.442695, %v1663_v48  ;;  %v1912_v48 = vld [vmem:[#allocation12 + $0x108] sm:$0xff]  ;;  %v1925_v8 = vld [vmem:[#allocation12 + $0x170] sm:$0xff] }
 0x818   :  { %v5587_v57 = vmul.f32 -1.442695, %v1673_v52  ;;  %v1916_v52 = vld [vmem:[#allocation12 + $0x128] sm:$0xff]  ;;  %v1949_v31 = vld [vmem:[#allocation13 + $0xb0] sm:$0xff] }
 0x819   :  { %7746 = vpow2.f32 %v5586_v53  ;;  %v1919_v53 = vld [vmem:[#allocation12 + $0x140] sm:$0xff]  ;;  %v8954_v34 = vpack.c.bf16 %v1949_v31, %v1946_v23 }
 0x81a   :  { %7748 = vpow2.f32 %v5587_v57  ;;  %v6982_v57 = vpack.c.bf16 %v1912_v48, %v1909_v44  ;;  %v1911_v48 = vld [vmem:[#allocation12 + $0x100] sm:$0xff] }
 0x823   :  { %v7747_v61 = vpop.eup %7746 }
 0x824   :  { %v7749_v62 = vpop.eup %7748  ;;  %v1667_v3 = vadd.f32 1.0, %v7747_v61  ;;  %v6984_v61 = vpack.c.bf16 %v1919_v53, %v1916_v52  ;;  %v1914_v52 = vld [vmem:[#allocation12 + $0x118] sm:$0xff]  ;;  %v1952_v53 = vld [vmem:[#allocation13 + $0xc8] sm:$0xff] }
 0x825   :  { %v1677_v7 = vadd.f32 1.0, %v7749_v62  ;;  %v1915_v62 = vld [vmem:[#allocation12 + $0x120] sm:$0xff] }
 0x826   :  { %7750 = vrcp.f32 %v1667_v3  ;;  %v1918_v3 = vld [vmem:[#allocation12 + $0x138] sm:$0xff] }
 0x827   :  { %7752 = vrcp.f32 %v1677_v7  ;;  %v1922_v7 = vld [vmem:[#allocation12 + $0x158] sm:$0xff] }
 0x830   :  { %v7751_v17 = vpop.eup %7750 }
 0x831   :  { %v7753_v22 = vpop.eup %7752  ;;  %v1684_v26 = vmul.f32 %v7751_v17, %v1682_v11  ;;  %v6986_v11 = vpack.c.bf16 %v1918_v3, %v1915_v62  ;;  %v6988_v17 = vpack.c.bf16 %v1925_v8, %v1922_v7  ;;  %v1951_v62 = vld [vmem:[#allocation13 + $0xc0] sm:$0xff]  ;;  %v1954_v3 = vld [vmem:[#allocation13 + $0xd8] sm:$0xff] }
 0x832   :  { %v1691_v25 = vmul.f32 %v7753_v22, %v1689_v18  ;;  %v1687_v29 = vsub.f32 1.0, %v7753_v22  ;;  %v1921_v18 = vld [vmem:[#allocation12 + $0x150] sm:$0xff]  ;;  %v1924_v22 = vld [vmem:[#allocation12 + $0x168] sm:$0xff]  ;;  %v8962_v8 = vpack.c.bf16 %v1954_v3, %v1951_v62 }
 0x833   :  { %v1685_v27 = vadd.f32 %v1684_v26, %v8638_v50  ;;  %v6990_v26 = vpack.c.bf16 %v1924_v22, %v1921_v18  ;;  %v1958_v18 = vld [vmem:[#allocation13 + $0xf8] sm:$0xff] }
 0x835   :  { %7754 = vtanh.f32 %v1685_v27  ;;  %v1884_v27 = vld [vmem:[#allocation12 + $0x28] sm:$0xff] }
 0x83f   :  { %v7755_v59 = vpop.eup %7754 }
 0x840   :  { %v1688_v30 = vmul.f32 %v7755_v59, %v1687_v29  ;;  %v1887_v59 = vld [vmem:[#allocation12 + $0x40] sm:$0xff] }
 0x842   :  { %v8922_v20 = vadd.f32 %v1691_v25, %v1688_v30  ;;  %v1881_v25 = vld [vmem:[#allocation12 + $0x10] sm:$0xff]  ;;  %v1890_v30 = vld [vmem:[#allocation12 + $0x58] sm:$0xff] }
 0x843   :  { %v6992_v29 = vpack.c.bf16 %v1884_v27, %v1881_v25  ;;  %v6996_v35 = vpack.c.bf16 %v1890_v30, %v1887_v59  ;;  %v1957_v25 = vld [vmem:[#allocation13 + $0xf0] sm:$0xff]  ;;  %v1960_v27 = vld [vmem:[#allocation13 + $0x108] sm:$0xff]  ;;  %v1923_v59 = vld [vmem:[#allocation12 + $0x160] sm:$0xff] }
 0x844   :  { %v1694_v51 = vrot.slane %v8922_v20, 4  ;;  %v8930_v56 = vsel %vm1872_vm3, %v1876_v42, %v8922_v20  ;;  %v1930_v42 = vld [vmem:[#allocation13 + $0x18] sm:$0xff]  ;;  %v8968_v46 = vpack.c.bf16 %v1960_v27, %v1957_v25  ;;  %v1866_v3 = vrot.slane %v8922_v20, 6  ;;  %v1929_v27 = vld [vmem:[#allocation13 + $0x10] sm:$0xff] }
 0x845   :  { %6993 = vmatprep.subr.bf16.mxu1 %v6992_v29  ;;  %v1926_v30 = vld [vmem:[#allocation12 + $0x178] sm:$0xff] }
 0x846   :  { %1761 = vmatmul.mubr.f32.vlgmr.msra.gmra.mrb[18].mxu0 %v1694_v51  ;;  %6187 = vmatmul.mubr.f32.vlgmr.msra.gmra.mrb[16].mxu1 %v1694_v51  ;;  %v1938_v20 = vld [vmem:[#allocation13 + $0x58] sm:$0xff] }
 0x847   :  { %6963 = vmatpush1.bf16.msra.mxu0 %v6962_v10  ;;  %6221 = vmatprep.mubr.f32.mxu1 %v8793_v41  ;;  %v1927_v10 = vld [vmem:[#allocation13] sm:$0xff] }
 0x848   :  { %6965 = vmatprep.subr.bf16.mxu0 %v6964_v37  ;;  %2057 = vmatprep.mubr.f32.mxu0 %v8207_v0  ;;  %v8938_v51 = vpack.c.bf16 %v1930_v42, %v1927_v10  ;;  %v1896_v37 = vld [vmem:[#allocation12 + $0x88] sm:$0xff]  ;;  %v7020_v10 = vpack.c.bf16 %v1926_v30, %v1923_v59 }
 0x849   :  { %6995 = vmatpush3.bf16.msra.mxu1 %v6992_v29  ;;  %v1932_v59 = vld [vmem:[#allocation13 + $0x28] sm:$0xff] }
 0x84a   :  { %6997 = vmatprep.subr.bf16.mxu1 %v6996_v35 }
 0x84b   :  { %6967 = vmatpush1.bf16.msra.mxu0 %v6966_v63  ;;  %v1933_v63 = vld [vmem:[#allocation13 + $0x30] sm:$0xff] }
 0x84c   :  { %6969 = vmatprep.subr.bf16.mxu0 %v6968_v1  ;;  %v1936_v1 = vld [vmem:[#allocation13 + $0x48] sm:$0xff] }
 0x84d   :  { %6999 = vmatpush3.bf16.msra.mxu1 %v6996_v35  ;;  %v8944_v54 = vpack.c.bf16 %v1936_v1, %v1933_v63  ;;  %v1964_v35 = vld [vmem:[#allocation13 + $0x128] sm:$0xff]  ;;  %v8979_v63 = vpack.c.bf16 %v1973_v58, %v1970_v12  ;;  %v1969_v1 = vld [vmem:[#allocation13 + $0x150] sm:$0xff]  ;;  %v1947_v58 = vld [vmem:[#allocation13 + $0xa0] sm:$0xff] }
 0x84e   :  { %v8971_v42 = vpack.c.bf16 %v1967_v39, %v1964_v35  ;;  %v8981_v4 = vpack.c.bf16 %v1972_v2, %v1969_v1  ;;  %v8994_v39 = vpack.c.bf16 %v1932_v59, %v1929_v27  ;;  %v1944_v12 = vld [vmem:[#allocation13 + $0x88] sm:$0xff]  ;;  %v1950_v1 = vld [vmem:[#allocation13 + $0xb8] sm:$0xff] }
 0x84f   :  { %6971 = vmatpush1.bf16.msra.mxu0 %v6970_v6  ;;  %v1940_v6 = vld [vmem:[#allocation13 + $0x68] sm:$0xff]  ;;  %v9014_v2 = vpack.c.bf16 %v1950_v1, %v1947_v58 }
 0x850   :  { %6973 = vmatprep.subr.bf16.mxu0 %v6972_v9  ;;  %v1943_v9 = vld [vmem:[#allocation13 + $0x80] sm:$0xff] }
 0x851   :  { %v8948_v13 = vpack.c.bf16 %v1943_v9, %v1940_v6 }
 0x853   :  { %6975 = vmatpush1.bf16.msra.mxu0 %v6974_v15  ;;  %v1905_v15 = vld [vmem:[#allocation12 + $0xd0] sm:$0xff] }
 0x854   :  { %6977 = vmatprep.subr.bf16.mxu0 %v6976_v16  ;;  %v1908_v16 = vld [vmem:[#allocation12 + $0xe8] sm:$0xff] }
 0x855   :  { %v7008_v21 = vpack.c.bf16 %v1908_v16, %v1905_v15 }
 0x857   :  { %6979 = vmatpush1.bf16.msra.mxu0 %v6978_v38  ;;  %v1945_v38 = vld [vmem:[#allocation13 + $0x90] sm:$0xff] }
 0x858   :  { %6981 = vmatprep.subr.bf16.mxu0 %v6980_v43  ;;  %v1948_v43 = vld [vmem:[#allocation13 + $0xa8] sm:$0xff] }
 0x859   :  { %v8956_v44 = vpack.c.bf16 %v1948_v43, %v1945_v38 }
 0x85b   :  { %6983 = vmatpush1.bf16.msra.mxu0 %v6982_v57  ;;  %v7012_v57 = vpack.c.bf16 %v1914_v52, %v1911_v48 }
 0x85c   :  { %6985 = vmatprep.subr.bf16.mxu0 %v6984_v61  ;;  %v1955_v61 = vld [vmem:[#allocation13 + $0xe0] sm:$0xff] }
 0x85d   :  { %v8960_v7 = vpack.c.bf16 %v1955_v61, %v1952_v53  ;;  %v7862_v53 = vld [vmem:[#allocation10] ss:$0 sm:$0xff] }
 0x85f   :  { %6987 = vmatpush1.bf16.msra.mxu0 %v6986_v11  ;;  %v1917_v11 = vld [vmem:[#allocation12 + $0x130] sm:$0xff] }
 0x860   :  { %6989 = vmatprep.subr.bf16.mxu0 %v6988_v17  ;;  %v1920_v17 = vld [vmem:[#allocation12 + $0x148] sm:$0xff] }
 0x861   :  { %v7016_v22 = vpack.c.bf16 %v1920_v17, %v1917_v11 }
 0x863   :  { %6991 = vmatpush1.bf16.msra.mxu0 %v6990_v26  ;;  %v1961_v26 = vld [vmem:[#allocation13 + $0x110] sm:$0xff] }
 0x864   :  { %7025 = vmatprep.subr.bf16.mxu0 %v8936_v47  ;;  %v8965_v29 = vpack.c.bf16 %v1961_v26, %v1958_v18 }
 0x866   :  { %2058 = vmatmul.mubr.f32.vlgmr.msra.gmra.mrb[20].mxu0 %v8793_v41  ;;  %v1893_v41 = vld [vmem:[#allocation12 + $0x70] sm:$0xff] }
 0x867   :  { %2063 = vmatprep.mubr.f32.mxu0 %v8207_v0  ;;  %7027 = vmatpush1.bf16.msra.mxu0 %v8938_v51  ;;  %v7000_v55 = vpack.c.bf16 %v1896_v37, %v1893_v41  ;;  %v1963_v41 = vld [vmem:[#allocation13 + $0x120] sm:$0xff]  ;;  %v1966_v37 = vld [vmem:[#allocation13 + $0x138] sm:$0xff] }
 0x868   :  { %7029 = vmatprep.subr.bf16.mxu0 %v8942_v60 }
 0x869   :  { %7001 = vmatprep.subr.bf16.mxu1 %v7000_v55 }
 0x86a   :  { %7003 = vmatpush3.bf16.msra.mxu1 %v7000_v55  ;;  %v8974_v55 = vpack.c.bf16 %v1966_v37, %v1963_v41  ;;  %v1941_v37 = vld [vmem:[#allocation13 + $0x70] sm:$0xff] }
 0x86b   :  { %7031 = vmatpush1.bf16.msra.mxu0 %v8944_v54  ;;  %7005 = vmatprep.subr.bf16.mxu1 %v7004_v5 }
 0x86c   :  { %7033 = vmatprep.subr.bf16.mxu0 %v8948_v13 }
 0x86e   :  { %7007 = vmatpush3.bf16.msra.mxu1 %v7004_v5 }
 0x86f   :  { %7035 = vmatpush1.bf16.msra.mxu0 %v8950_v24  ;;  %7009 = vmatprep.subr.bf16.mxu1 %v7008_v21 }
 0x870   :  { %7037 = vmatprep.subr.bf16.mxu0 %v8954_v34 }
 0x872   :  { %7011 = vmatpush3.bf16.msra.mxu1 %v7008_v21 }
 0x873   :  { %7039 = vmatpush1.bf16.msra.mxu0 %v8956_v44  ;;  %7013 = vmatprep.subr.bf16.mxu1 %v7012_v57 }
 0x874   :  { %7041 = vmatprep.subr.bf16.mxu0 %v8960_v7 }
 0x876   :  { %7015 = vmatpush3.bf16.msra.mxu1 %v7012_v57 }
 0x877   :  { %7043 = vmatpush1.bf16.msra.mxu0 %v8962_v8  ;;  %7017 = vmatprep.subr.bf16.mxu1 %v7016_v22 }
 0x878   :  { %7045 = vmatprep.subr.bf16.mxu0 %v8965_v29 }
 0x87a   :  { %7019 = vmatpush3.bf16.msra.mxu1 %v7016_v22 }
 0x87b   :  { %7047 = vmatpush1.bf16.msra.mxu0 %v8968_v46  ;;  %7021 = vmatprep.subr.bf16.mxu1 %v7020_v10 }
 0x87c   :  { %7049 = vmatprep.subr.bf16.mxu0 %v8971_v42 }
 0x87e   :  { %7023 = vmatpush3.bf16.msra.mxu1 %v7020_v10  ;;  %v1935_v10 = vld [vmem:[#allocation13 + $0x40] sm:$0xff] }
 0x87f   :  { %7051 = vmatpush1.bf16.msra.mxu0 %v8974_v55  ;;  %7056 = vmatprep.subr.bf16.mxu1 %v8216_v40 }
 0x880   :  { %7053 = vmatprep.subr.bf16.mxu0 %v8979_v63 }
 0x883   :  { %7055 = vmatpush1.bf16.msra.mxu0 %v8981_v4 }
 0x884   :  { %7081 = vmatprep.subr.bf16.mxu0 %v8936_v47 }
 0x919   :  { %v1762_v5 = vpop.f32.mrb[18].mxu0  ;;  %v1833_v6 = vpop.f32.mrb[16].mxu1 }
 0x91a   :  { %v1838_v9 = vrot.slane %v1762_v5, 2  ;;  %v1764_v14 = vpop.f32.mrb[19].mxu0  ;;  %v6188_v19 = vpop.f32.mrb[17].mxu1  ;;  %v1857_v57 = vadd.f32 %v7862_v53, %v1833_v6  ;;  %v1953_v5 = vld [vmem:[#allocation13 + $0xd0] sm:$0xff]  ;;  %v1956_v6 = vld [vmem:[#allocation13 + $0xe8] sm:$0xff] }
 0x91b   :  { %v1848_v15 = vrot.slane %v1764_v14, 2  ;;  %v1959_v14 = vld [vmem:[#allocation13 + $0x100] sm:$0xff]  ;;  %v1962_v19 = vld [vmem:[#allocation13 + $0x118] sm:$0xff] }
 0x91c   :  { %v1840_v16 = vadd.f32 %v1838_v9, %v8634_v45  ;;  %v1859_v61 = vrot.slane %v1857_v57, 2  ;;  %v9020_v9 = vpack.c.bf16 %v1956_v6, %v1953_v5 }
 0x91d   :  { %v1850_v21 = vadd.f32 %v1848_v15, %v8636_v49  ;;  %v9026_v15 = vpack.c.bf16 %v1962_v19, %v1959_v14 }
 0x91e   :  { %v5588_v23 = vmul.f32 -1.442695, %v1840_v16  ;;  %v1965_v16 = vld [vmem:[#allocation13 + $0x130] sm:$0xff] }
 0x91f   :  { %v5589_v31 = vmul.f32 -1.442695, %v1850_v21  ;;  %v1968_v21 = vld [vmem:[#allocation13 + $0x148] sm:$0xff] }
 0x920   :  { %7756 = vpow2.f32 %v5588_v23  ;;  %v9032_v23 = vpack.c.bf16 %v1968_v21, %v1965_v16 }
 0x921   :  { %7758 = vpow2.f32 %v5589_v31  ;;  %v1971_v31 = vld [vmem:[#allocation13 + $0x160] sm:$0xff] }
 0x92a   :  { %v7757_v38 = vpop.eup %7756 }
 0x92b   :  { %v7759_v43 = vpop.eup %7758  ;;  %v1844_v48 = vadd.f32 1.0, %v7757_v38  ;;  %v1974_v38 = vld [vmem:[#allocation13 + $0x178] sm:$0xff] }
 0x92c   :  { %v1854_v52 = vadd.f32 1.0, %v7759_v43  ;;  %v9038_v43 = vpack.c.bf16 %v1974_v38, %v1971_v31 }
 0x92d   :  { %7760 = vrcp.f32 %v1844_v48  ;;  %v1975_v48 = vld [vmem:[#allocation15] sm:$0x7] }
 0x92e   :  { %7762 = vrcp.f32 %v1854_v52  ;;  %v1989_v52 = vrot.slane %v1975_v48, %v8626_v33  ;;  %v9070_v53 = vrot.slane %v1975_v48, %v8623_v32 }
 0x937   :  { %v7761_v62 = vpop.eup %7760 }
 0x938   :  { %v7763_v11 = vpop.eup %7762  ;;  %v1861_v45 = vmul.f32 %v7761_v62, %v1859_v61 }
 0x939   :  { %v8989_v17 = vpop.f32.mrb[20].mxu0  ;;  %v1868_v49 = vmul.f32 %v7763_v11, %v1866_v3  ;;  %v1864_v26 = vsub.f32 1.0, %v7763_v11 }
 0x93a   :  { %v1862_v18 = vadd.f32 %v1861_v45, %v8638_v50  ;;  %v8992_v22 = vpop.f32.mrb[21].mxu0  ;;  %v9000_v50 = vpack.c.bf16 %v1938_v20, %v1935_v10  ;;  %v9080_v45 = vadd.f32 %v8989_v17, %v9070_v53 }
 0x93c   :  { %7764 = vtanh.f32 %v1862_v18 }
 0x946   :  { %v7765_v25 = vpop.eup %7764 }
 0x947   :  { %v1865_v30 = vmul.f32 %v7765_v25, %v1864_v26 }
 0x949   :  { %v1869_v35 = vadd.f32 %v1868_v49, %v1865_v30  ;;  %v9083_v49 = vrot.slane %v1975_v48, %v8629_v36 }
 0x94b   :  { %v1878_v41 = vsel %vm1874_vm4, %v8930_v56, %v1869_v35  ;;  %v9007_v56 = vpack.c.bf16 %v1944_v12, %v1941_v37  ;;  %v9088_v59 = vadd.f32 %v8992_v22, %v9083_v49 }
 0x94c   :  { %2064 = vmatmul.mubr.f32.gmra.mrb[22].mxu0 %v1878_v41  ;;  %6222 = vmatmul.mubr.f32.vlgmr.msra.gmra.mrb[18].mxu1 %v1878_v41  ;;  %v9091_v41 = vld [vmem:[#allocation16] ss:$0 sm:$0xff] }
 0x94d   :  { %7058 = vmatpush3.bf16.msra.mxu1 %v8994_v39  ;;  %2215 = vmatprep.mubr.f32.mxu0 %v8207_v0 }
 0x94e   :  { %7059 = vmatprep.subr.bf16.mxu1 %v8216_v40  ;;  %6256 = vmatprep.mubr.msk.f32.mxu1 %vm8217_vm1, %v8207_v0 }
 0x950   :  { %2216 = vmatmul.mubr.f32.vlgmr.msra.gmra.mrb[24].mxu0 %v8207_v0 }
 0x951   :  { %7061 = vmatpush3.bf16.msra.mxu1 %v9000_v50  ;;  %7083 = vmatpush1.bf16.msra.mxu0 %v8938_v51 }
 0x952   :  { %7062 = vmatprep.subr.bf16.mxu1 %v8216_v40  ;;  %7085 = vmatprep.subr.bf16.mxu0 %v8942_v60 }
 0x953   :  { %2378 = vmatprep.mubr.f32.mxu0 %v8207_v0 }
 0x955   :  { %7064 = vmatpush3.bf16.msra.mxu1 %v9007_v56  ;;  %7087 = vmatpush1.bf16.msra.mxu0 %v8944_v54 }
 0x956   :  { %7065 = vmatprep.subr.bf16.mxu1 %v8216_v40  ;;  %7089 = vmatprep.subr.bf16.mxu0 %v8948_v13 }
 0x959   :  { %7067 = vmatpush3.bf16.msra.mxu1 %v9014_v2  ;;  %7091 = vmatpush1.bf16.msra.mxu0 %v8950_v24 }
 0x95a   :  { %7068 = vmatprep.subr.bf16.mxu1 %v8216_v40  ;;  %7093 = vmatprep.subr.bf16.mxu0 %v8954_v34 }
 0x95d   :  { %7070 = vmatpush3.bf16.msra.mxu1 %v9020_v9  ;;  %7095 = vmatpush1.bf16.msra.mxu0 %v8956_v44 }
 0x95e   :  { %7071 = vmatprep.subr.bf16.mxu1 %v8216_v40  ;;  %7097 = vmatprep.subr.bf16.mxu0 %v8960_v7 }
 0x961   :  { %7073 = vmatpush3.bf16.msra.mxu1 %v9026_v15  ;;  %7099 = vmatpush1.bf16.msra.mxu0 %v8962_v8 }
 0x962   :  { %7074 = vmatprep.subr.bf16.mxu1 %v8216_v40  ;;  %7101 = vmatprep.subr.bf16.mxu0 %v8965_v29 }
 0x965   :  { %7076 = vmatpush3.bf16.msra.mxu1 %v9032_v23  ;;  %7103 = vmatpush1.bf16.msra.mxu0 %v8968_v46 }
 0x966   :  { %7077 = vmatprep.subr.bf16.mxu1 %v8216_v40  ;;  %7105 = vmatprep.subr.bf16.mxu0 %v8971_v42 }
 0x969   :  { %7079 = vmatpush3.bf16.msra.mxu1 %v9038_v43  ;;  %7107 = vmatpush1.bf16.msra.mxu0 %v8974_v55 }
 0x96a   :  { %7112 = vmatprep.subr.bf16.mxu1 %v8216_v40  ;;  %7109 = vmatprep.subr.bf16.mxu0 %v8979_v63 }
 0x96c   :  { %6257 = vmatmul.mubr.f32.vlgmr.msra.gmra.mrb[20].mxu1 %v8207_v0 }
 0x96d   :  { %7114 = vmatpush3.bf16.msra.mxu1 %v8994_v39  ;;  %7111 = vmatpush1.bf16.msra.mxu0 %v8981_v4 }
 0x96e   :  { %7115 = vmatprep.subr.bf16.mxu1 %v8216_v40  ;;  %6291 = vmatprep.mubr.msk.f32.mxu1 %vm8217_vm1, %v8207_v0 }
 0x96f   :  { %7137 = vmatprep.subr.bf16.mxu0 %v8936_v47 }
 0x971   :  { %7117 = vmatpush3.bf16.msra.mxu1 %v9000_v50 }
 0x972   :  { %7118 = vmatprep.subr.bf16.mxu1 %v8216_v40 }
 0x975   :  { %7120 = vmatpush3.bf16.msra.mxu1 %v9007_v56 }
 0x976   :  { %7121 = vmatprep.subr.bf16.mxu1 %v8216_v40 }
 0x979   :  { %7123 = vmatpush3.bf16.msra.mxu1 %v9014_v2 }
 0x97a   :  { %7124 = vmatprep.subr.bf16.mxu1 %v8216_v40 }
 0x97d   :  { %7126 = vmatpush3.bf16.msra.mxu1 %v9020_v9 }
 0x97e   :  { %7127 = vmatprep.subr.bf16.mxu1 %v8216_v40 }
 0x981   :  { %7129 = vmatpush3.bf16.msra.mxu1 %v9026_v15 }
 0x982   :  { %7130 = vmatprep.subr.bf16.mxu1 %v8216_v40 }
 0x985   :  { %7132 = vmatpush3.bf16.msra.mxu1 %v9032_v23 }
 0x986   :  { %7133 = vmatprep.subr.bf16.mxu1 %v8216_v40 }
 0x989   :  { %7135 = vmatpush3.bf16.msra.mxu1 %v9038_v43 }
 0x98a   :  { %7168 = vmatprep.subr.bf16.mxu1 %v8216_v40 }
 0xa1f   :  { %v9072_v57 = vpop.f32.mrb[22].mxu0  ;;  %v6223_v61 = vpop.f32.mrb[18].mxu1 }
 0xa20   :  { %v9074_v62 = vadd.f32 %v6223_v61, %v1989_v52  ;;  %v9076_v3 = vpop.f32.mrb[23].mxu0  ;;  %v2136_v11 = vpop.f32.mrb[19].mxu1 }
 0xa21   :  { %v9094_v6 = vadd.f32 %v2136_v11, %v1989_v52 }
 0xa23   :  { %v2217_v18 = vpop.f32.mrb[24].mxu0 }
 0xa24   :  { %v2292_v26 = vadd.f32 %v2217_v18, %v9080_v45  ;;  %v2219_v25 = vpop.f32.mrb[25].mxu0 }
 0xa25   :  { %v2299_v30 = vadd.f32 %v2219_v25, %v9088_v59 }
 0xa26   :  { %v5591_v27 = vmul.f32 -1.442695, %v2292_v26 }
 0xa27   :  { %v5592_v35 = vmul.f32 -1.442695, %v2299_v30 }
 0xa28   :  { %7766 = vpow2.f32 %v5591_v27 }
 0xa29   :  { %7768 = vpow2.f32 %v5592_v35 }
 0xa32   :  { %v7767_v10 = vpop.eup %7766 }
 0xa33   :  { %v2296_v17 = vadd.f32 1.0, %v7767_v10  ;;  %v7769_v20 = vpop.eup %7768 }
 0xa34   :  { %v2303_v37 = vadd.f32 1.0, %v7769_v20 }
 0xa35   :  { %7770 = vrcp.f32 %v2296_v17 }
 0xa36   :  { %7772 = vrcp.f32 %v2303_v37 }
 0xa3f   :  { %v7771_v12 = vpop.eup %7770  ;;  %v2288_v58 = vpop.f32.mrb[20].mxu1 }
 0xa40   :  { %v2306_v1 = vadd.f32 %v9091_v41, %v2288_v58  ;;  %v6258_v5 = vpop.f32.mrb[21].mxu1  ;;  %v7773_v19 = vpop.eup %7772 }
 0xa41   :  { %v2310_v16 = vsub.f32 1.0, %v7773_v19  ;;  %v2312_v38 = vmul.f32 0.0, %v7773_v19 }
 0xa42   :  { %v2307_v22 = vmul.f32 %v7771_v12, %v2306_v1 }
 0xa44   :  { %v2308_v14 = vadd.f32 %v2307_v22, %v9094_v6 }
 0xa46   :  { %7774 = vtanh.f32 %v2308_v14 }
 0xa50   :  { %v7775_v21 = vpop.eup %7774 }
 0xa51   :  { %v2311_v31 = vmul.f32 %v7775_v21, %v2310_v16 }
 0xa53   :  { %v2313_v48 = vadd.f32 %v2312_v38, %v2311_v31 }
 0xa55   :  { %2379 = vmatmul.mubr.f32.vlgmr.msra.gmra.mrb[26].mxu0 %v2313_v48  ;;  %6292 = vmatmul.mubr.f32.vlgmr.msra.gmra.mrb[22].mxu1 %v2313_v48  ;;  %v2485_v22 = vrot.slane %v2313_v48, 6 }
 0xa56   :  { %7139 = vmatpush1.bf16.msra.mxu0 %v8938_v51  ;;  %7170 = vmatpush3.bf16.msra.mxu1 %v8994_v39 }
 0xa57   :  { %7141 = vmatprep.subr.bf16.mxu0 %v8942_v60  ;;  %7171 = vmatprep.subr.bf16.mxu1 %v8216_v40 }
 0xa58   :  { %2556 = vmatprep.mubr.f32.mxu0 %v8207_v0  ;;  %6326 = vmatprep.mubr.msk.f32.mxu1 %vm8217_vm1, %v8207_v0 }
 0xa5a   :  { %7143 = vmatpush1.bf16.msra.mxu0 %v8944_v54  ;;  %7173 = vmatpush3.bf16.msra.mxu1 %v9000_v50 }
 0xa5b   :  { %7145 = vmatprep.subr.bf16.mxu0 %v8948_v13  ;;  %7174 = vmatprep.subr.bf16.mxu1 %v8216_v40 }
 0xa5e   :  { %7147 = vmatpush1.bf16.msra.mxu0 %v8950_v24  ;;  %7176 = vmatpush3.bf16.msra.mxu1 %v9007_v56 }
 0xa5f   :  { %7149 = vmatprep.subr.bf16.mxu0 %v8954_v34  ;;  %7177 = vmatprep.subr.bf16.mxu1 %v8216_v40 }
 0xa62   :  { %7151 = vmatpush1.bf16.msra.mxu0 %v8956_v44  ;;  %7179 = vmatpush3.bf16.msra.mxu1 %v9014_v2 }
 0xa63   :  { %7153 = vmatprep.subr.bf16.mxu0 %v8960_v7  ;;  %7180 = vmatprep.subr.bf16.mxu1 %v8216_v40 }
 0xa66   :  { %7155 = vmatpush1.bf16.msra.mxu0 %v8962_v8  ;;  %7182 = vmatpush3.bf16.msra.mxu1 %v9020_v9 }
 0xa67   :  { %7157 = vmatprep.subr.bf16.mxu0 %v8965_v29  ;;  %7183 = vmatprep.subr.bf16.mxu1 %v8216_v40 }
 0xa6a   :  { %7159 = vmatpush1.bf16.msra.mxu0 %v8968_v46  ;;  %7185 = vmatpush3.bf16.msra.mxu1 %v9026_v15 }
 0xa6b   :  { %7161 = vmatprep.subr.bf16.mxu0 %v8971_v42  ;;  %7186 = vmatprep.subr.bf16.mxu1 %v8216_v40 }
 0xa6e   :  { %7163 = vmatpush1.bf16.msra.mxu0 %v8974_v55  ;;  %7188 = vmatpush3.bf16.msra.mxu1 %v9032_v23 }
 0xa6f   :  { %7165 = vmatprep.subr.bf16.mxu0 %v8979_v63  ;;  %7189 = vmatprep.subr.bf16.mxu1 %v8216_v40 }
 0xa72   :  { %7167 = vmatpush1.bf16.msra.mxu0 %v8981_v4  ;;  %7191 = vmatpush3.bf16.msra.mxu1 %v9038_v43 }
 0xa73   :  { %7193 = vmatprep.subr.bf16.mxu0 %v8936_v47  ;;  %7224 = vmatprep.subr.bf16.mxu1 %v8216_v40 }
 0xb28   :  { %v2380_v52 = vpop.f32.mrb[26].mxu0  ;;  %v2451_v61 = vpop.f32.mrb[22].mxu1 }
 0xb29   :  { %v2456_v11 = vrot.slane %v2380_v52, 6  ;;  %v2382_v18 = vpop.f32.mrb[27].mxu0  ;;  %v6293_v26 = vpop.f32.mrb[23].mxu1  ;;  %v2475_v58 = vadd.f32 %v9091_v41, %v2451_v61 }
 0xb2a   :  { %v2466_v25 = vrot.slane %v2382_v18, 6 }
 0xb2b   :  { %v2458_v27 = vadd.f32 %v2456_v11, %v9080_v45  ;;  %v2477_v1 = vrot.slane %v2475_v58, 6 }
 0xb2c   :  { %v2468_v30 = vadd.f32 %v2466_v25, %v9088_v59 }
 0xb2d   :  { %v5593_v35 = vmul.f32 -1.442695, %v2458_v27 }
 0xb2e   :  { %v5594_v10 = vmul.f32 -1.442695, %v2468_v30 }
 0xb2f   :  { %7776 = vpow2.f32 %v5593_v35 }
 0xb30   :  { %7778 = vpow2.f32 %v5594_v10 }
 0xb39   :  { %v7777_v17 = vpop.eup %7776 }
 0xb3a   :  { %v7779_v20 = vpop.eup %7778  ;;  %v2462_v37 = vadd.f32 1.0, %v7777_v17 }
 0xb3b   :  { %v2472_v12 = vadd.f32 1.0, %v7779_v20 }
 0xb3c   :  { %7780 = vrcp.f32 %v2462_v37 }
 0xb3d   :  { %7782 = vrcp.f32 %v2472_v12 }
 0xb46   :  { %v7781_v5 = vpop.eup %7780 }
 0xb47   :  { %v7783_v14 = vpop.eup %7782  ;;  %v2479_v19 = vmul.f32 %v7781_v5, %v2477_v1 }
 0xb48   :  { %v2487_v16 = vmul.f32 %v7783_v14, %v2485_v22  ;;  %v2482_v31 = vsub.f32 1.0, %v7783_v14 }
 0xb49   :  { %v2480_v21 = vadd.f32 %v2479_v19, %v9094_v6 }
 0xb4b   :  { %7784 = vtanh.f32 %v2480_v21 }
 0xb55   :  { %v7785_v38 = vpop.eup %7784 }
 0xb56   :  { %v2483_v52 = vmul.f32 %v7785_v38, %v2482_v31 }
 0xb58   :  { %v9136_v11 = vadd.f32 %v2487_v16, %v2483_v52 }
 0xb5a   :  { %v2490_v18 = vrot.slane %v9136_v11, 2  ;;  %v2662_v19 = vrot.slane %v9136_v11, 6 }
 0xb5c   :  { %2557 = vmatmul.mubr.f32.vlgmr.msra.gmra.mrb[28].mxu0 %v2490_v18  ;;  %6327 = vmatmul.mubr.f32.vlgmr.msra.gmra.mrb[24].mxu1 %v2490_v18 }
 0xb5d   :  { %7195 = vmatpush1.bf16.msra.mxu0 %v8938_v51  ;;  %7226 = vmatpush3.bf16.msra.mxu1 %v8994_v39 }
 0xb5e   :  { %7197 = vmatprep.subr.bf16.mxu0 %v8942_v60  ;;  %7227 = vmatprep.subr.bf16.mxu1 %v8216_v40 }
 0xb5f   :  { %2733 = vmatprep.mubr.f32.mxu0 %v8207_v0  ;;  %6361 = vmatprep.mubr.msk.f32.mxu1 %vm8217_vm1, %v8207_v0 }
 0xb61   :  { %7199 = vmatpush1.bf16.msra.mxu0 %v8944_v54  ;;  %7229 = vmatpush3.bf16.msra.mxu1 %v9000_v50 }
 0xb62   :  { %7201 = vmatprep.subr.bf16.mxu0 %v8948_v13  ;;  %7230 = vmatprep.subr.bf16.mxu1 %v8216_v40 }
 0xb65   :  { %7203 = vmatpush1.bf16.msra.mxu0 %v8950_v24  ;;  %7232 = vmatpush3.bf16.msra.mxu1 %v9007_v56 }
 0xb66   :  { %7205 = vmatprep.subr.bf16.mxu0 %v8954_v34  ;;  %7233 = vmatprep.subr.bf16.mxu1 %v8216_v40 }
 0xb69   :  { %7207 = vmatpush1.bf16.msra.mxu0 %v8956_v44  ;;  %7235 = vmatpush3.bf16.msra.mxu1 %v9014_v2 }
 0xb6a   :  { %7209 = vmatprep.subr.bf16.mxu0 %v8960_v7  ;;  %7236 = vmatprep.subr.bf16.mxu1 %v8216_v40 }
 0xb6d   :  { %7211 = vmatpush1.bf16.msra.mxu0 %v8962_v8  ;;  %7238 = vmatpush3.bf16.msra.mxu1 %v9020_v9 }
 0xb6e   :  { %7213 = vmatprep.subr.bf16.mxu0 %v8965_v29  ;;  %7239 = vmatprep.subr.bf16.mxu1 %v8216_v40 }
 0xb71   :  { %7215 = vmatpush1.bf16.msra.mxu0 %v8968_v46  ;;  %7241 = vmatpush3.bf16.msra.mxu1 %v9026_v15 }
 0xb72   :  { %7217 = vmatprep.subr.bf16.mxu0 %v8971_v42  ;;  %7242 = vmatprep.subr.bf16.mxu1 %v8216_v40 }
 0xb75   :  { %7219 = vmatpush1.bf16.msra.mxu0 %v8974_v55  ;;  %7244 = vmatpush3.bf16.msra.mxu1 %v9032_v23 }
 0xb76   :  { %7221 = vmatprep.subr.bf16.mxu0 %v8979_v63  ;;  %7245 = vmatprep.subr.bf16.mxu1 %v8216_v40 }
 0xb79   :  { %7223 = vmatpush1.bf16.msra.mxu0 %v8981_v4  ;;  %7247 = vmatpush3.bf16.msra.mxu1 %v9038_v43 }
 0xb7a   :  { %7249 = vmatprep.subr.bf16.mxu0 %v8936_v47  ;;  %7280 = vmatprep.subr.bf16.mxu1 %v8216_v40 }
 0xc2f   :  { %v2558_v48 = vpop.f32.mrb[28].mxu0  ;;  %v2629_v61 = vpop.f32.mrb[24].mxu1 }
 0xc30   :  { %v2634_v26 = vrot.slane %v2558_v48, 4  ;;  %v2560_v25 = vpop.f32.mrb[29].mxu0  ;;  %v6328_v27 = vpop.f32.mrb[25].mxu1  ;;  %v2653_v5 = vadd.f32 %v9091_v41, %v2629_v61 }
 0xc31   :  { %v2644_v30 = vrot.slane %v2560_v25, 4 }
 0xc32   :  { %v2636_v35 = vadd.f32 %v2634_v26, %v9080_v45  ;;  %v2655_v22 = vrot.slane %v2653_v5, 4 }
 0xc33   :  { %v2646_v10 = vadd.f32 %v2644_v30, %v9088_v59 }
 0xc34   :  { %v5595_v17 = vmul.f32 -1.442695, %v2636_v35 }
 0xc35   :  { %v5596_v20 = vmul.f32 -1.442695, %v2646_v10 }
 0xc36   :  { %7786 = vpow2.f32 %v5595_v17 }
 0xc37   :  { %7788 = vpow2.f32 %v5596_v20 }
 0xc40   :  { %v7787_v37 = vpop.eup %7786 }
 0xc41   :  { %v7789_v12 = vpop.eup %7788  ;;  %v2640_v58 = vadd.f32 1.0, %v7787_v37 }
 0xc42   :  { %v2650_v1 = vadd.f32 1.0, %v7789_v12 }
 0xc43   :  { %7790 = vrcp.f32 %v2640_v58 }
 0xc44   :  { %7792 = vrcp.f32 %v2650_v1 }
 0xc4d   :  { %v7791_v14 = vpop.eup %7790 }
 0xc4e   :  { %v7793_v16 = vpop.eup %7792  ;;  %v2657_v21 = vmul.f32 %v7791_v14, %v2655_v22 }
 0xc4f   :  { %v2664_v31 = vmul.f32 %v7793_v16, %v2662_v19  ;;  %v2660_v52 = vsub.f32 1.0, %v7793_v16 }
 0xc50   :  { %v2658_v38 = vadd.f32 %v2657_v21, %v9094_v6 }
 0xc52   :  { %7794 = vtanh.f32 %v2658_v38 }
 0xc5c   :  { %v7795_v18 = vpop.eup %7794 }
 0xc5d   :  { %v2661_v48 = vmul.f32 %v7795_v18, %v2660_v52 }
 0xc5f   :  { %v9179_v26 = vadd.f32 %v2664_v31, %v2661_v48 }
 0xc61   :  { %v2667_v25 = vrot.slane %v9179_v26, 4  ;;  %v2839_v21 = vrot.slane %v9179_v26, 6 }
 0xc63   :  { %2734 = vmatmul.mubr.f32.vlgmr.msra.gmra.mrb[30].mxu0 %v2667_v25  ;;  %6362 = vmatmul.mubr.f32.vlgmr.msra.gmra.mrb[26].mxu1 %v2667_v25 }
 0xc64   :  { %7251 = vmatpush1.bf16.msra.mxu0 %v8938_v51  ;;  %7282 = vmatpush3.bf16.msra.mxu1 %v8994_v39 }
 0xc65   :  { %7253 = vmatprep.subr.bf16.mxu0 %v8942_v60  ;;  %7283 = vmatprep.subr.bf16.mxu1 %v8216_v40 }
 0xc66   :  { %2910 = vmatprep.mubr.f32.mxu0 %v8207_v0  ;;  %6396 = vmatprep.mubr.msk.f32.mxu1 %vm8217_vm1, %v8207_v0 }
 0xc68   :  { %7255 = vmatpush1.bf16.msra.mxu0 %v8944_v54  ;;  %7285 = vmatpush3.bf16.msra.mxu1 %v9000_v50 }
 0xc69   :  { %7257 = vmatprep.subr.bf16.mxu0 %v8948_v13  ;;  %7286 = vmatprep.subr.bf16.mxu1 %v8216_v40 }
 0xc6c   :  { %7259 = vmatpush1.bf16.msra.mxu0 %v8950_v24  ;;  %7288 = vmatpush3.bf16.msra.mxu1 %v9007_v56 }
 0xc6d   :  { %7261 = vmatprep.subr.bf16.mxu0 %v8954_v34  ;;  %7289 = vmatprep.subr.bf16.mxu1 %v8216_v40 }
 0xc70   :  { %7263 = vmatpush1.bf16.msra.mxu0 %v8956_v44  ;;  %7291 = vmatpush3.bf16.msra.mxu1 %v9014_v2 }
 0xc71   :  { %7265 = vmatprep.subr.bf16.mxu0 %v8960_v7  ;;  %7292 = vmatprep.subr.bf16.mxu1 %v8216_v40 }
 0xc74   :  { %7267 = vmatpush1.bf16.msra.mxu0 %v8962_v8  ;;  %7294 = vmatpush3.bf16.msra.mxu1 %v9020_v9 }
 0xc75   :  { %7269 = vmatprep.subr.bf16.mxu0 %v8965_v29  ;;  %7295 = vmatprep.subr.bf16.mxu1 %v8216_v40 }
 0xc78   :  { %7271 = vmatpush1.bf16.msra.mxu0 %v8968_v46  ;;  %7297 = vmatpush3.bf16.msra.mxu1 %v9026_v15 }
 0xc79   :  { %7273 = vmatprep.subr.bf16.mxu0 %v8971_v42  ;;  %7298 = vmatprep.subr.bf16.mxu1 %v8216_v40 }
 0xc7c   :  { %7275 = vmatpush1.bf16.msra.mxu0 %v8974_v55  ;;  %7300 = vmatpush3.bf16.msra.mxu1 %v9032_v23 }
 0xc7d   :  { %7277 = vmatprep.subr.bf16.mxu0 %v8979_v63  ;;  %7301 = vmatprep.subr.bf16.mxu1 %v8216_v40 }
 0xc80   :  { %7279 = vmatpush1.bf16.msra.mxu0 %v8981_v4  ;;  %7303 = vmatpush3.bf16.msra.mxu1 %v9038_v43 }
 0xc81   :  { %7305 = vmatprep.subr.bf16.mxu0 %v8936_v47  ;;  %7336 = vmatprep.subr.bf16.mxu1 %v8216_v40 }
 0xd36   :  { %v2735_v11 = vpop.f32.mrb[30].mxu0  ;;  %v2806_v61 = vpop.f32.mrb[26].mxu1 }
 0xd37   :  { %v2811_v27 = vrot.slane %v2735_v11, 2  ;;  %v2737_v30 = vpop.f32.mrb[31].mxu0  ;;  %v6363_v35 = vpop.f32.mrb[27].mxu1  ;;  %v2830_v14 = vadd.f32 %v9091_v41, %v2806_v61 }
 0xd38   :  { %v2821_v10 = vrot.slane %v2737_v30, 2 }
 0xd39   :  { %v2813_v17 = vadd.f32 %v2811_v27, %v9080_v45  ;;  %v2832_v19 = vrot.slane %v2830_v14, 2 }
 0xd3a   :  { %v2823_v20 = vadd.f32 %v2821_v10, %v9088_v59  ;;  %v9268_v10 = vadd.f32 %v9076_v3, %v9083_v49 }
 0xd3b   :  { %v5597_v37 = vmul.f32 -1.442695, %v2813_v17 }
 0xd3c   :  { %v5598_v12 = vmul.f32 -1.442695, %v2823_v20 }
 0xd3d   :  { %7796 = vpow2.f32 %v5597_v37 }
 0xd3e   :  { %7798 = vpow2.f32 %v5598_v12 }
 0xd47   :  { %v7797_v58 = vpop.eup %7796 }
 0xd48   :  { %v7799_v1 = vpop.eup %7798  ;;  %v2817_v5 = vadd.f32 1.0, %v7797_v58 }
 0xd49   :  { %v2827_v22 = vadd.f32 1.0, %v7799_v1 }
 0xd4a   :  { %7800 = vrcp.f32 %v2817_v5 }
 0xd4b   :  { %7802 = vrcp.f32 %v2827_v22 }
 0xd54   :  { %v7801_v16 = vpop.eup %7800 }
 0xd55   :  { %v7803_v31 = vpop.eup %7802  ;;  %v2834_v45 = vmul.f32 %v7801_v16, %v2832_v19 }
 0xd56   :  { %v2841_v38 = vmul.f32 %v7803_v31, %v2839_v21  ;;  %v2837_v52 = vsub.f32 1.0, %v7803_v31 }
 0xd57   :  { %v2835_v59 = vadd.f32 %v2834_v45, %v9094_v6  ;;  %v9263_v6 = vadd.f32 %v9072_v57, %v9070_v53 }
 0xd59   :  { %7804 = vtanh.f32 %v2835_v59 }
 0xd63   :  { %v7805_v18 = vpop.eup %7804 }
 0xd64   :  { %v2838_v48 = vmul.f32 %v7805_v18, %v2837_v52 }
 0xd66   :  { %v2842_v25 = vadd.f32 %v2841_v38, %v2838_v48 }
 0xd68   :  { %v9222_v11 = vrot.slane %v2842_v25, 6 }
 0xd6a   :  { %2911 = vmatmul.mubr.f32.vlgmr.msra.gmra.mrb[32].mxu0 %v9222_v11  ;;  %6397 = vmatmul.mubr.f32.vlgmr.msra.gmra.mrb[28].mxu1 %v9222_v11 }
 0xd6b   :  { %7307 = vmatpush1.bf16.msra.mxu0 %v8938_v51  ;;  %7338 = vmatpush3.bf16.msra.mxu1 %v8994_v39 }
 0xd6c   :  { %7309 = vmatprep.subr.bf16.mxu0 %v8942_v60  ;;  %7339 = vmatprep.subr.bf16.mxu1 %v8216_v40 }
 0xd6d   :  { %3073 = vmatprep.mubr.f32.mxu0 %v8207_v0  ;;  %6431 = vmatprep.mubr.msk.f32.mxu1 %vm8217_vm1, %v8207_v0 }
 0xd6f   :  { %7311 = vmatpush1.bf16.msra.mxu0 %v8944_v54  ;;  %7341 = vmatpush3.bf16.msra.mxu1 %v9000_v50 }
 0xd70   :  { %7313 = vmatprep.subr.bf16.mxu0 %v8948_v13  ;;  %7342 = vmatprep.subr.bf16.mxu1 %v8216_v40 }
 0xd73   :  { %7315 = vmatpush1.bf16.msra.mxu0 %v8950_v24  ;;  %7344 = vmatpush3.bf16.msra.mxu1 %v9007_v56 }
 0xd74   :  { %7317 = vmatprep.subr.bf16.mxu0 %v8954_v34  ;;  %7345 = vmatprep.subr.bf16.mxu1 %v8216_v40 }
 0xd77   :  { %7319 = vmatpush1.bf16.msra.mxu0 %v8956_v44  ;;  %7347 = vmatpush3.bf16.msra.mxu1 %v9014_v2 }
 0xd78   :  { %7321 = vmatprep.subr.bf16.mxu0 %v8960_v7  ;;  %7348 = vmatprep.subr.bf16.mxu1 %v8216_v40 }
 0xd7b   :  { %7323 = vmatpush1.bf16.msra.mxu0 %v8962_v8  ;;  %7350 = vmatpush3.bf16.msra.mxu1 %v9020_v9 }
 0xd7c   :  { %7325 = vmatprep.subr.bf16.mxu0 %v8965_v29  ;;  %7351 = vmatprep.subr.bf16.mxu1 %v8216_v40 }
 0xd7f   :  { %7327 = vmatpush1.bf16.msra.mxu0 %v8968_v46  ;;  %7353 = vmatpush3.bf16.msra.mxu1 %v9026_v15 }
 0xd80   :  { %7329 = vmatprep.subr.bf16.mxu0 %v8971_v42  ;;  %7354 = vmatprep.subr.bf16.mxu1 %v8216_v40 }
 0xd83   :  { %7331 = vmatpush1.bf16.msra.mxu0 %v8974_v55  ;;  %7356 = vmatpush3.bf16.msra.mxu1 %v9032_v23 }
 0xd84   :  { %7333 = vmatprep.subr.bf16.mxu0 %v8979_v63  ;;  %7357 = vmatprep.subr.bf16.mxu1 %v8216_v40 }
 0xd87   :  { %7335 = vmatpush1.bf16.msra.mxu0 %v8981_v4  ;;  %7359 = vmatpush3.bf16.msra.mxu1 %v9038_v43 }
 0xd88   :  { %7361 = vmatprep.subr.bf16.mxu0 %v8936_v47  ;;  %7392 = vmatprep.subr.bf16.mxu1 %v8216_v40 }
 0xe3d   :  { %v2912_v26 = vpop.f32.mrb[32].mxu0  ;;  %v2983_v61 = vpop.f32.mrb[28].mxu1 }
 0xe3e   :  { %v2987_v27 = vadd.f32 %v2912_v26, %v9263_v6  ;;  %v2914_v30 = vpop.f32.mrb[33].mxu0  ;;  %v6398_v35 = vpop.f32.mrb[29].mxu1  ;;  %v3001_v1 = vadd.f32 %v9091_v41, %v2983_v61 }
 0xe3f   :  { %v2994_v20 = vadd.f32 %v2914_v30, %v9268_v10 }
 0xe40   :  { %v5599_v17 = vmul.f32 -1.442695, %v2987_v27 }
 0xe41   :  { %v5600_v37 = vmul.f32 -1.442695, %v2994_v20 }
 0xe42   :  { %7806 = vpow2.f32 %v5599_v17 }
 0xe43   :  { %7808 = vpow2.f32 %v5600_v37 }
 0xe4c   :  { %v7807_v12 = vpop.eup %7806 }
 0xe4d   :  { %v2991_v58 = vadd.f32 1.0, %v7807_v12  ;;  %v7809_v53 = vpop.eup %7808 }
 0xe4e   :  { %v2998_v57 = vadd.f32 1.0, %v7809_v53 }
 0xe4f   :  { %7810 = vrcp.f32 %v2991_v58 }
 0xe50   :  { %7812 = vrcp.f32 %v2998_v57 }
 0xe59   :  { %v7811_v5 = vpop.eup %7810 }
 0xe5a   :  { %v3002_v22 = vmul.f32 %v7811_v5, %v3001_v1  ;;  %v7813_v3 = vpop.eup %7812 }
 0xe5b   :  { %v3005_v49 = vsub.f32 1.0, %v7813_v3  ;;  %v3007_v21 = vmul.f32 %v7813_v3, %v9222_v11 }
 0xe5c   :  { %v3003_v14 = vadd.f32 %v3002_v22, %v9074_v62 }
 0xe5e   :  { %7814 = vtanh.f32 %v3003_v14 }
 0xe68   :  { %v7815_v19 = vpop.eup %7814 }
 0xe69   :  { %v3006_v16 = vmul.f32 %v7815_v19, %v3005_v49 }
 0xe6b   :  { %v3008_v31 = vadd.f32 %v3007_v21, %v3006_v16 }
 0xe6d   :  { %3074 = vmatmul.mubr.f32.vlgmr.msra.gmra.mrb[34].mxu0 %v3008_v31  ;;  %6432 = vmatmul.mubr.f32.vlgmr.msra.gmra.mrb[30].mxu1 %v3008_v31  ;;  %v3180_v12 = vrot.slane %v3008_v31, 6  ;;  %v3547_v31 = vld [vmem:[#allocation18 + $0x48] sm:$0xff] }
 0xe6e   :  { %7363 = vmatpush1.bf16.msra.mxu0 %v8938_v51  ;;  %7394 = vmatpush3.bf16.msra.mxu1 %v8994_v39 }
 0xe6f   :  { %7365 = vmatprep.subr.bf16.mxu0 %v8942_v60  ;;  %7395 = vmatprep.subr.bf16.mxu1 %v8216_v40 }
 0xe70   :  { %3251 = vmatprep.mubr.f32.mxu0 %v8207_v0  ;;  %6466 = vmatprep.mubr.msk.f32.mxu1 %vm8217_vm1, %v8207_v0 }
 0xe72   :  { %7367 = vmatpush1.bf16.msra.mxu0 %v8944_v54  ;;  %7397 = vmatpush3.bf16.msra.mxu1 %v9000_v50 }
 0xe73   :  { %7369 = vmatprep.subr.bf16.mxu0 %v8948_v13  ;;  %7398 = vmatprep.subr.bf16.mxu1 %v8216_v40 }
 0xe76   :  { %7371 = vmatpush1.bf16.msra.mxu0 %v8950_v24  ;;  %7400 = vmatpush3.bf16.msra.mxu1 %v9007_v56 }
 0xe77   :  { %7373 = vmatprep.subr.bf16.mxu0 %v8954_v34  ;;  %7401 = vmatprep.subr.bf16.mxu1 %v8216_v40 }
 0xe7a   :  { %7375 = vmatpush1.bf16.msra.mxu0 %v8956_v44  ;;  %7403 = vmatpush3.bf16.msra.mxu1 %v9014_v2 }
 0xe7b   :  { %7377 = vmatprep.subr.bf16.mxu0 %v8960_v7  ;;  %7404 = vmatprep.subr.bf16.mxu1 %v8216_v40 }
 0xe7e   :  { %7379 = vmatpush1.bf16.msra.mxu0 %v8962_v8  ;;  %7406 = vmatpush3.bf16.msra.mxu1 %v9020_v9 }
 0xe7f   :  { %7381 = vmatprep.subr.bf16.mxu0 %v8965_v29  ;;  %7407 = vmatprep.subr.bf16.mxu1 %v8216_v40 }
 0xe82   :  { %7383 = vmatpush1.bf16.msra.mxu0 %v8968_v46  ;;  %7409 = vmatpush3.bf16.msra.mxu1 %v9026_v15 }
 0xe83   :  { %7385 = vmatprep.subr.bf16.mxu0 %v8971_v42  ;;  %7410 = vmatprep.subr.bf16.mxu1 %v8216_v40 }
 0xe86   :  { %7387 = vmatpush1.bf16.msra.mxu0 %v8974_v55  ;;  %7412 = vmatpush3.bf16.msra.mxu1 %v9032_v23 }
 0xe87   :  { %7389 = vmatprep.subr.bf16.mxu0 %v8979_v63  ;;  %7413 = vmatprep.subr.bf16.mxu1 %v8216_v40 }
 0xe8a   :  { %7391 = vmatpush1.bf16.msra.mxu0 %v8981_v4  ;;  %7415 = vmatpush3.bf16.msra.mxu1 %v9038_v43 }
 0xe8b   :  { %7417 = vmatprep.subr.bf16.mxu0 %v8936_v47  ;;  %7448 = vmatprep.subr.bf16.mxu1 %v8216_v40 }
 0xf40   :  { %v3075_v45 = vpop.f32.mrb[34].mxu0  ;;  %v3146_v38 = vpop.f32.mrb[30].mxu1 }
 0xf41   :  { %v3151_v59 = vrot.slane %v3075_v45, 6  ;;  %v3077_v52 = vpop.f32.mrb[35].mxu0  ;;  %v6433_v18 = vpop.f32.mrb[31].mxu1  ;;  %v3170_v17 = vadd.f32 %v9091_v41, %v3146_v38  ;;  %v3541_v45 = vld [vmem:[#allocation18 + $0x18] sm:$0xff] }
 0xf42   :  { %v3161_v48 = vrot.slane %v3077_v52, 6  ;;  %v3538_v52 = vld [vmem:[#allocation18] sm:$0xff] }
 0xf43   :  { %v3153_v25 = vadd.f32 %v3151_v59, %v9263_v6  ;;  %v3172_v20 = vrot.slane %v3170_v17, 6  ;;  %v3549_v59 = vld [vmem:[#allocation18 + $0x58] sm:$0xff]  ;;  %v3546_v18 = vld [vmem:[#allocation18 + $0x40] sm:$0xff] }
 0xf44   :  { %v3163_v11 = vadd.f32 %v3161_v48, %v9268_v10  ;;  %v7504_v48 = vpack.c.bf16 %v3549_v59, %v3541_v45  ;;  %v3565_v17 = vld [vmem:[#allocation18 + $0xd8] sm:$0xff]  ;;  %v3604_v45 = vld [vmem:[#allocation18 + $0x210] sm:$0xff] }
 0xf45   :  { %v5601_v26 = vmul.f32 -1.442695, %v3153_v25  ;;  %v7474_v25 = vpack.c.bf16 %v3546_v18, %v3538_v52  ;;  %v3619_v52 = vld [vmem:[#allocation18 + $0x288] sm:$0xff] }
 0xf46   :  { %v5602_v61 = vmul.f32 -1.442695, %v3163_v11  ;;  %v3540_v11 = vld [vmem:[#allocation18 + $0x10] sm:$0xff]  ;;  %v3627_v18 = vld [vmem:[#allocation18 + $0x2c8] sm:$0xff] }
 0xf47   :  { %7816 = vpow2.f32 %v5601_v26  ;;  %v3548_v26 = vld [vmem:[#allocation18 + $0x50] sm:$0xff] }
 0xf48   :  { %7818 = vpow2.f32 %v5602_v61  ;;  %v7506_v61 = vpack.c.bf16 %v3548_v26, %v3540_v11  ;;  %v3629_v11 = vld [vmem:[#allocation18 + $0x2d8] sm:$0xff]  ;;  %v3618_v26 = vld [vmem:[#allocation18 + $0x280] sm:$0xff] }
 0xf51   :  { %v7817_v27 = vpop.eup %7816 }
 0xf52   :  { %v7819_v30 = vpop.eup %7818  ;;  %v3157_v35 = vadd.f32 1.0, %v7817_v27  ;;  %v3555_v27 = vld [vmem:[#allocation18 + $0x88] sm:$0xff] }
 0xf53   :  { %v3167_v47 = vadd.f32 1.0, %v7819_v30  ;;  %v3563_v30 = vld [vmem:[#allocation18 + $0xc8] sm:$0xff] }
 0xf54   :  { %7820 = vrcp.f32 %v3157_v35  ;;  %v3557_v35 = vld [vmem:[#allocation18 + $0x98] sm:$0xff] }
 0xf55   :  { %7822 = vrcp.f32 %v3167_v47  ;;  %v7476_v47 = vpack.c.bf16 %v3563_v30, %v3555_v27 }
 0xf5e   :  { %v7821_v37 = vpop.eup %7820 }
 0xf5f   :  { %v7823_v58 = vpop.eup %7822  ;;  %v3174_v53 = vmul.f32 %v7821_v37, %v3172_v20  ;;  %v3554_v20 = vld [vmem:[#allocation18 + $0x80] sm:$0xff] }
 0xf60   :  { %v3182_v57 = vmul.f32 %v7823_v58, %v3180_v12  ;;  %v3177_v5 = vsub.f32 1.0, %v7823_v58  ;;  %v3562_v37 = vld [vmem:[#allocation18 + $0xc0] sm:$0xff]  ;;  %v7508_v12 = vpack.c.bf16 %v3565_v17, %v3557_v35  ;;  %v3620_v35 = vld [vmem:[#allocation18 + $0x290] sm:$0xff]  ;;  %v3635_v17 = vld [vmem:[#allocation18 + $0x308] sm:$0xff] }
 0xf61   :  { %v3175_v1 = vadd.f32 %v3174_v53, %v9074_v62  ;;  %v7478_v58 = vpack.c.bf16 %v3562_v37, %v3554_v20  ;;  %v3556_v53 = vld [vmem:[#allocation18 + $0x90] sm:$0xff]  ;;  %v3643_v37 = vld [vmem:[#allocation18 + $0x348] sm:$0xff] }
 0xf63   :  { %7824 = vtanh.f32 %v3175_v1 }
 0xf6d   :  { %v7825_v22 = vpop.eup %7824 }
 0xf6e   :  { %v3178_v14 = vmul.f32 %v7825_v22, %v3177_v5  ;;  %v3571_v5 = vld [vmem:[#allocation18 + $0x108] sm:$0xff] }
 0xf6f   :  { %v3579_v22 = vld [vmem:[#allocation18 + $0x148] sm:$0xff] }
 0xf70   :  { %v3183_v3 = vadd.f32 %v3182_v57, %v3178_v14  ;;  %v3564_v57 = vld [vmem:[#allocation18 + $0xd0] sm:$0xff]  ;;  %v3573_v14 = vld [vmem:[#allocation18 + $0x118] sm:$0xff] }
 0xf71   :  { %v7510_v1 = vpack.c.bf16 %v3564_v57, %v3556_v53  ;;  %v7496_v53 = vpack.c.bf16 %v3643_v37, %v3635_v17  ;;  %v3550_v17 = vld [vmem:[#allocation18 + $0x60] sm:$0xff]  ;;  %v3544_v37 = vld [vmem:[#allocation18 + $0x30] sm:$0xff] }
 0xf72   :  { %v3185_v49 = vrot.slane %v3183_v3, 2 }
 0xf74   :  { %3252 = vmatmul.mubr.f32.vlgmr.msra.gmra.mrb[36].mxu0 %v3185_v49  ;;  %6467 = vmatmul.mubr.f32.vlgmr.msra.gmra.mrb[32].mxu1 %v3185_v49  ;;  %v3581_v49 = vld [vmem:[#allocation18 + $0x158] sm:$0xff] }
 0xf75   :  { %7419 = vmatpush1.bf16.msra.mxu0 %v8938_v51  ;;  %7450 = vmatpush3.bf16.msra.mxu1 %v8994_v39 }
 0xf76   :  { %7421 = vmatprep.subr.bf16.mxu0 %v8942_v60  ;;  %7451 = vmatprep.subr.bf16.mxu1 %v8216_v40 }
 0xf77   :  { %3428 = vmatprep.mubr.f32.mxu0 %v8207_v0  ;;  %6501 = vmatprep.mubr.msk.f32.mxu1 %vm8217_vm1, %v8207_v0 }
 0xf79   :  { %7423 = vmatpush1.bf16.msra.mxu0 %v8944_v54  ;;  %7453 = vmatpush3.bf16.msra.mxu1 %v9000_v50  ;;  %v3357_v50 = vrot.slane %v3183_v3, 6  ;;  %v7480_v3 = vpack.c.bf16 %v3579_v22, %v3571_v5  ;;  %v3642_v5 = vld [vmem:[#allocation18 + $0x340] sm:$0xff]  ;;  %v3636_v22 = vld [vmem:[#allocation18 + $0x310] sm:$0xff] }
 0xf7a   :  { %7425 = vmatprep.subr.bf16.mxu0 %v8948_v13  ;;  %7454 = vmatprep.subr.bf16.mxu1 %v8216_v40 }
 0xf7d   :  { %7427 = vmatpush1.bf16.msra.mxu0 %v8950_v24  ;;  %7456 = vmatpush3.bf16.msra.mxu1 %v9007_v56 }
 0xf7e   :  { %7429 = vmatprep.subr.bf16.mxu0 %v8954_v34  ;;  %7457 = vmatprep.subr.bf16.mxu1 %v8216_v40 }
 0xf81   :  { %7431 = vmatpush1.bf16.msra.mxu0 %v8956_v44  ;;  %7459 = vmatpush3.bf16.msra.mxu1 %v9014_v2 }
 0xf82   :  { %7433 = vmatprep.subr.bf16.mxu0 %v8960_v7  ;;  %7460 = vmatprep.subr.bf16.mxu1 %v8216_v40 }
 0xf85   :  { %7435 = vmatpush1.bf16.msra.mxu0 %v8962_v8  ;;  %7462 = vmatpush3.bf16.msra.mxu1 %v9020_v9 }
 0xf86   :  { %7437 = vmatprep.subr.bf16.mxu0 %v8965_v29  ;;  %7463 = vmatprep.subr.bf16.mxu1 %v8216_v40 }
 0xf89   :  { %7439 = vmatpush1.bf16.msra.mxu0 %v8968_v46  ;;  %7465 = vmatpush3.bf16.msra.mxu1 %v9026_v15 }
 0xf8a   :  { %7441 = vmatprep.subr.bf16.mxu0 %v8971_v42  ;;  %7466 = vmatprep.subr.bf16.mxu1 %v8216_v40 }
 0xf8d   :  { %7443 = vmatpush1.bf16.msra.mxu0 %v8974_v55  ;;  %7468 = vmatpush3.bf16.msra.mxu1 %v9032_v23 }
 0xf8e   :  { %7445 = vmatprep.subr.bf16.mxu0 %v8979_v63  ;;  %7469 = vmatprep.subr.bf16.mxu1 %v8216_v40 }
 0xf91   :  { %7447 = vmatpush1.bf16.msra.mxu0 %v8981_v4  ;;  %7471 = vmatpush3.bf16.msra.mxu1 %v9038_v43 }
 0xf92   :  { %7505 = vmatprep.subr.bf16.mxu1 %v7504_v48  ;;  %v3621_v48 = vld [vmem:[#allocation18 + $0x298] sm:$0xff] }
 0xf93   :  { %v7524_v27 = vpack.c.bf16 %v3629_v11, %v3621_v48 }
0x1047   :  { %v3253_v51 = vpop.f32.mrb[36].mxu0  ;;  %v3324_v60 = vpop.f32.mrb[32].mxu1 }
0x1048   :  { %v3329_v54 = vrot.slane %v3253_v51, 4  ;;  %v3255_v13 = vpop.f32.mrb[37].mxu0  ;;  %v6468_v24 = vpop.f32.mrb[33].mxu1  ;;  %v3348_v63 = vadd.f32 %v9091_v41, %v3324_v60  ;;  %v3539_v41 = vld [vmem:[#allocation18 + $0x8] sm:$0xff]  ;;  %v3570_v51 = vld [vmem:[#allocation18 + $0x100] sm:$0xff] }
0x1049   :  { %v3339_v34 = vrot.slane %v3255_v13, 4  ;;  %v7472_v38 = vpack.c.bf16 %v3547_v31, %v3539_v41  ;;  %v3578_v60 = vld [vmem:[#allocation18 + $0x140] sm:$0xff]  ;;  %v3572_v24 = vld [vmem:[#allocation18 + $0x110] sm:$0xff] }
0x104a   :  { %v3331_v44 = vadd.f32 %v3329_v54, %v9263_v6  ;;  %v3350_v4 = vrot.slane %v3348_v63, 4  ;;  %v7512_v54 = vpack.c.bf16 %v3581_v49, %v3573_v14  ;;  %v7482_v13 = vpack.c.bf16 %v3578_v60, %v3570_v51  ;;  %v3651_v49 = vld [vmem:[#allocation18 + $0x388] sm:$0xff] }
0x104b   :  { %v3341_v7 = vadd.f32 %v3339_v34, %v9268_v10  ;;  %7473 = vmatprep.subr.bf16.mxu0 %v7472_v38  ;;  %v3580_v34 = vld [vmem:[#allocation18 + $0x150] sm:$0xff]  ;;  %v3659_v51 = vld [vmem:[#allocation18 + $0x3c8] sm:$0xff] }
0x104c   :  { %v5603_v8 = vmul.f32 -1.442695, %v3331_v44  ;;  %v7514_v44 = vpack.c.bf16 %v3580_v34, %v3572_v24  ;;  %v3612_v38 = vld [vmem:[#allocation18 + $0x250] sm:$0xff]  ;;  %v3661_v24 = vld [vmem:[#allocation18 + $0x3d8] sm:$0xff]  ;;  %v3650_v34 = vld [vmem:[#allocation18 + $0x380] sm:$0xff] }
0x104d   :  { %v5604_v29 = vmul.f32 -1.442695, %v3341_v7  ;;  %v3587_v7 = vld [vmem:[#allocation18 + $0x188] sm:$0xff]  ;;  %v7522_v59 = vpack.c.bf16 %v3612_v38, %v3604_v45 }
0x104e   :  { %7826 = vpow2.f32 %v5603_v8  ;;  %v3595_v8 = vld [vmem:[#allocation18 + $0x1c8] sm:$0xff] }
0x104f   :  { %7828 = vpow2.f32 %v5604_v29  ;;  %v3589_v29 = vld [vmem:[#allocation18 + $0x198] sm:$0xff] }
0x1058   :  { %v7827_v46 = vpop.eup %7826 }
0x1059   :  { %v7829_v40 = vpop.eup %7828  ;;  %v3335_v42 = vadd.f32 1.0, %v7827_v46  ;;  %v7484_v46 = vpack.c.bf16 %v3595_v8, %v3587_v7  ;;  %v3658_v7 = vld [vmem:[#allocation18 + $0x3c0] sm:$0xff]  ;;  %v3652_v8 = vld [vmem:[#allocation18 + $0x390] sm:$0xff] }
0x105a   :  { %v3345_v55 = vadd.f32 1.0, %v7829_v40  ;;  %v3597_v40 = vld [vmem:[#allocation18 + $0x1d8] sm:$0xff] }
0x105b   :  { %7830 = vrcp.f32 %v3335_v42  ;;  %v3586_v42 = vld [vmem:[#allocation18 + $0x180] sm:$0xff]  ;;  %v7516_v63 = vpack.c.bf16 %v3597_v40, %v3589_v29  ;;  %v3660_v29 = vld [vmem:[#allocation18 + $0x3d0] sm:$0xff]  ;;  %v3551_v40 = vld [vmem:[#allocation18 + $0x68] sm:$0xff] }
0x105c   :  { %7832 = vrcp.f32 %v3345_v55  ;;  %v3594_v55 = vld [vmem:[#allocation18 + $0x1c0] sm:$0xff] }
0x1065   :  { %v7831_v39 = vpop.eup %7830 }
0x1066   :  { %v7833_v56 = vpop.eup %7832  ;;  %v3352_v2 = vmul.f32 %v7831_v39, %v3350_v4  ;;  %v7486_v4 = vpack.c.bf16 %v3594_v55, %v3586_v42  ;;  %v3588_v39 = vld [vmem:[#allocation18 + $0x190] sm:$0xff]  ;;  %v3545_v42 = vld [vmem:[#allocation18 + $0x38] sm:$0xff]  ;;  %v7502_v55 = vpack.c.bf16 %v3658_v7, %v3650_v34 }
0x1067   :  { %v3359_v9 = vmul.f32 %v7833_v56, %v3357_v50  ;;  %v3355_v23 = vsub.f32 1.0, %v7833_v56  ;;  %v3596_v50 = vld [vmem:[#allocation18 + $0x1d0] sm:$0xff]  ;;  %v3577_v34 = vld [vmem:[#allocation18 + $0x138] sm:$0xff] }
0x1068   :  { %v3353_v15 = vadd.f32 %v3352_v2, %v9074_v62  ;;  %v7518_v56 = vpack.c.bf16 %v3596_v50, %v3588_v39  ;;  %v3603_v2 = vld [vmem:[#allocation18 + $0x208] sm:$0xff] }
0x106a   :  { %7834 = vtanh.f32 %v3353_v15  ;;  %v3605_v15 = vld [vmem:[#allocation18 + $0x218] sm:$0xff] }
0x1074   :  { %v7835_v43 = vpop.eup %7834 }
0x1075   :  { %v3356_v19 = vmul.f32 %v7835_v43, %v3355_v23  ;;  %v3613_v43 = vld [vmem:[#allocation18 + $0x258] sm:$0xff] }
0x1076   :  { %v7520_v41 = vpack.c.bf16 %v3613_v43, %v3605_v15 }
0x1077   :  { %v9350_v16 = vadd.f32 %v3359_v9, %v3356_v19  ;;  %v3611_v9 = vld [vmem:[#allocation18 + $0x248] sm:$0xff]  ;;  %v3602_v19 = vld [vmem:[#allocation18 + $0x200] sm:$0xff] }
0x1078   :  { %v7488_v23 = vpack.c.bf16 %v3611_v9, %v3603_v2 }
0x1079   :  { %v3362_v21 = vrot.slane %v9350_v16, 4 }
0x107b   :  { %3429 = vmatmul.mubr.f32.vlgmr.msra.gmra.mrb[38].mxu0 %v3362_v21  ;;  %6502 = vmatmul.mubr.f32.vlgmr.msra.gmra.mrb[34].mxu1 %v3362_v21  ;;  %v3610_v21 = vld [vmem:[#allocation18 + $0x240] sm:$0xff] }
0x107c   :  { %3775 = vmatprep.mubr.f32.mxu0 %v8207_v0  ;;  %3846 = vmatprep.mubr.f32.mxu1 %v8207_v0  ;;  %v7490_v31 = vpack.c.bf16 %v3610_v21, %v3602_v19 }
0x107d   :  { %7475 = vmatpush1.bf16.msra.mxu0 %v7474_v25  ;;  %7507 = vmatpush1.bf16.msra.mxu1 %v7506_v61  ;;  %v7492_v25 = vpack.c.bf16 %v3627_v18, %v3619_v52  ;;  %v3626_v61 = vld [vmem:[#allocation18 + $0x2c0] sm:$0xff]  ;;  %v7863_v18 = vld [vmem:[#allocation16] ss:$0 sm:$0xff] }
0x107e   :  { %7477 = vmatprep.subr.bf16.mxu0 %v7476_v47  ;;  %7509 = vmatprep.subr.bf16.mxu1 %v7508_v12  ;;  %v7494_v30 = vpack.c.bf16 %v3626_v61, %v3618_v26  ;;  %v3628_v47 = vld [vmem:[#allocation18 + $0x2d0] sm:$0xff]  ;;  %v3637_v12 = vld [vmem:[#allocation18 + $0x318] sm:$0xff]  ;;  %v3534_v26 = vrot.slane %v9350_v16, 6 }
0x107f   :  { %v7526_v20 = vpack.c.bf16 %v3628_v47, %v3620_v35  ;;  %v3542_v47 = vld [vmem:[#allocation18 + $0x20] sm:$0xff] }
0x1081   :  { %7479 = vmatpush1.bf16.msra.mxu0 %v7478_v58  ;;  %7511 = vmatpush1.bf16.msra.mxu1 %v7510_v1  ;;  %v3645_v58 = vld [vmem:[#allocation18 + $0x358] sm:$0xff]  ;;  %v3634_v1 = vld [vmem:[#allocation18 + $0x300] sm:$0xff] }
0x1082   :  { %7481 = vmatprep.subr.bf16.mxu0 %v7480_v3  ;;  %7513 = vmatprep.subr.bf16.mxu1 %v7512_v54  ;;  %v7528_v57 = vpack.c.bf16 %v3645_v58, %v3637_v12  ;;  %v7498_v14 = vpack.c.bf16 %v3642_v5, %v3634_v1  ;;  %v3644_v3 = vld [vmem:[#allocation18 + $0x350] sm:$0xff]  ;;  %v7500_v54 = vpack.c.bf16 %v3659_v51, %v3651_v49  ;;  %v3559_v58 = vld [vmem:[#allocation18 + $0xa8] sm:$0xff]  ;;  %v3569_v1 = vld [vmem:[#allocation18 + $0xf8] sm:$0xff] }
0x1083   :  { %v7530_v60 = vpack.c.bf16 %v3644_v3, %v3636_v22  ;;  %v3552_v12 = vld [vmem:[#allocation18 + $0x70] sm:$0xff]  ;;  %v7538_v22 = vpack.c.bf16 %v3550_v17, %v3542_v47  ;;  %v3566_v3 = vld [vmem:[#allocation18 + $0xe0] sm:$0xff] }
0x1084   :  { %v7570_v16 = vpack.c.bf16 %v3552_v12, %v3544_v37  ;;  %v3622_v17 = vld [vmem:[#allocation18 + $0x2a0] sm:$0xff] }
0x1085   :  { %7483 = vmatpush1.bf16.msra.mxu0 %v7482_v13  ;;  %7515 = vmatpush1.bf16.msra.mxu1 %v7514_v44  ;;  %v3653_v13 = vld [vmem:[#allocation18 + $0x398] sm:$0xff] }
0x1086   :  { %7485 = vmatprep.subr.bf16.mxu0 %v7484_v46  ;;  %7517 = vmatprep.subr.bf16.mxu1 %v7516_v63  ;;  %v7532_v44 = vpack.c.bf16 %v3661_v24, %v3653_v13  ;;  %v3543_v46 = vld [vmem:[#allocation18 + $0x28] sm:$0xff]  ;;  %v3553_v63 = vld [vmem:[#allocation18 + $0x78] sm:$0xff] }
0x1087   :  { %v7536_v39 = vpack.c.bf16 %v3551_v40, %v3543_v46  ;;  %v7568_v50 = vpack.c.bf16 %v3553_v63, %v3545_v42  ;;  %v3575_v13 = vld [vmem:[#allocation18 + $0x128] sm:$0xff]  ;;  %v3582_v46 = vld [vmem:[#allocation18 + $0x160] sm:$0xff]  ;;  %v3584_v63 = vld [vmem:[#allocation18 + $0x170] sm:$0xff] }
0x1088   :  { %v3583_v24 = vld [vmem:[#allocation18 + $0x168] sm:$0xff] }
0x1089   :  { %7487 = vmatpush1.bf16.msra.mxu0 %v7486_v4  ;;  %7519 = vmatpush1.bf16.msra.mxu1 %v7518_v56  ;;  %v7534_v4 = vpack.c.bf16 %v3660_v29, %v3652_v8  ;;  %v3574_v29 = vld [vmem:[#allocation18 + $0x120] sm:$0xff]  ;;  %v7544_v40 = vpack.c.bf16 %v3583_v24, %v3575_v13  ;;  %v3648_v13 = vld [vmem:[#allocation18 + $0x370] sm:$0xff]  ;;  %v3655_v24 = vld [vmem:[#allocation18 + $0x3a8] sm:$0xff] }
0x108a   :  { %7489 = vmatprep.subr.bf16.mxu0 %v7488_v23  ;;  %7521 = vmatprep.subr.bf16.mxu1 %v7520_v41 }
0x108d   :  { %7491 = vmatpush1.bf16.msra.mxu0 %v7490_v31  ;;  %7523 = vmatpush1.bf16.msra.mxu1 %v7522_v59 }
0x108e   :  { %7493 = vmatprep.subr.bf16.mxu0 %v7492_v25  ;;  %7525 = vmatprep.subr.bf16.mxu1 %v7524_v27 }
0x1091   :  { %7495 = vmatpush1.bf16.msra.mxu0 %v7494_v30  ;;  %7527 = vmatpush1.bf16.msra.mxu1 %v7526_v20 }
0x1092   :  { %7497 = vmatprep.subr.bf16.mxu0 %v7496_v53  ;;  %7529 = vmatprep.subr.bf16.mxu1 %v7528_v57  ;;  %v3567_v53 = vld [vmem:[#allocation18 + $0xe8] sm:$0xff]  ;;  %v3561_v57 = vld [vmem:[#allocation18 + $0xb8] sm:$0xff] }
0x1093   :  { %v7572_v51 = vpack.c.bf16 %v3569_v1, %v3561_v57  ;;  %v3639_v57 = vld [vmem:[#allocation18 + $0x328] sm:$0xff] }
0x1094   :  { %v3647_v1 = vld [vmem:[#allocation18 + $0x368] sm:$0xff] }
0x1095   :  { %7499 = vmatpush1.bf16.msra.mxu0 %v7498_v14  ;;  %7531 = vmatpush1.bf16.msra.mxu1 %v7530_v60  ;;  %v3558_v14 = vld [vmem:[#allocation18 + $0xa0] sm:$0xff]  ;;  %v3560_v60 = vld [vmem:[#allocation18 + $0xb0] sm:$0xff] }
0x1096   :  { %7501 = vmatprep.subr.bf16.mxu0 %v7500_v54  ;;  %7533 = vmatprep.subr.bf16.mxu1 %v7532_v44  ;;  %v3568_v54 = vld [vmem:[#allocation18 + $0xf0] sm:$0xff]  ;;  %v3585_v44 = vld [vmem:[#allocation18 + $0x178] sm:$0xff]  ;;  %v7542_v7 = vpack.c.bf16 %v3566_v3, %v3558_v14  ;;  %v3638_v3 = vld [vmem:[#allocation18 + $0x320] sm:$0xff] }
0x1097   :  { %v7574_v8 = vpack.c.bf16 %v3568_v54, %v3560_v60  ;;  %v7576_v42 = vpack.c.bf16 %v3585_v44, %v3577_v34  ;;  %v3640_v54 = vld [vmem:[#allocation18 + $0x330] sm:$0xff]  ;;  %v3663_v34 = vld [vmem:[#allocation18 + $0x3e8] sm:$0xff]  ;;  %v3657_v44 = vld [vmem:[#allocation18 + $0x3b8] sm:$0xff] }
0x1099   :  { %7503 = vmatpush1.bf16.msra.mxu0 %v7502_v55  ;;  %7535 = vmatpush1.bf16.msra.mxu1 %v7534_v4  ;;  %v3576_v55 = vld [vmem:[#allocation18 + $0x130] sm:$0xff]  ;;  %v3591_v4 = vld [vmem:[#allocation18 + $0x1a8] sm:$0xff] }
0x109a   :  { %7537 = vmatprep.subr.bf16.mxu0 %v7536_v39  ;;  %7569 = vmatprep.subr.bf16.mxu1 %v7568_v50  ;;  %v3599_v39 = vld [vmem:[#allocation18 + $0x1e8] sm:$0xff]  ;;  %v3593_v50 = vld [vmem:[#allocation18 + $0x1b8] sm:$0xff] }
0x114e   :  { %v3430_v56 = vpop.f32.mrb[38].mxu0  ;;  %v3501_v2 = vpop.f32.mrb[34].mxu1 }
0x114f   :  { %v3506_v9 = vrot.slane %v3430_v56, 2  ;;  %v3432_v15 = vpop.f32.mrb[39].mxu0  ;;  %v6503_v23 = vpop.f32.mrb[35].mxu1  ;;  %v3525_v48 = vadd.f32 %v7863_v18, %v3501_v2  ;;  %v3601_v56 = vld [vmem:[#allocation18 + $0x1f8] sm:$0xff]  ;;  %v7546_v2 = vpack.c.bf16 %v3582_v46, %v3574_v29  ;;  %v3606_v18 = vld [vmem:[#allocation18 + $0x220] sm:$0xff]  ;;  %v7594_v29 = vpack.c.bf16 %v3648_v13, %v3640_v54 }
0x1150   :  { %v3516_v43 = vrot.slane %v3432_v15, 2  ;;  %v3590_v15 = vld [vmem:[#allocation18 + $0x1a0] sm:$0xff] }
0x1151   :  { %v3508_v19 = vadd.f32 %v3506_v9, %v9263_v6  ;;  %v3527_v25 = vrot.slane %v3525_v48, 2  ;;  %v7578_v9 = vpack.c.bf16 %v3584_v63, %v3576_v55  ;;  %v3598_v23 = vld [vmem:[#allocation18 + $0x1e0] sm:$0xff]  ;;  %v3656_v63 = vld [vmem:[#allocation18 + $0x3b0] sm:$0xff] }
0x1152   :  { %v3518_v21 = vadd.f32 %v3516_v43, %v9268_v10  ;;  %v7548_v43 = vpack.c.bf16 %v3599_v39, %v3591_v4  ;;  %v3614_v48 = vld [vmem:[#allocation18 + $0x260] sm:$0xff]  ;;  %v3664_v4 = vld [vmem:[#allocation18 + $0x3f0] sm:$0xff] }
0x1153   :  { %v5605_v41 = vmul.f32 -1.442695, %v3508_v19  ;;  %v7580_v19 = vpack.c.bf16 %v3601_v56, %v3593_v50  ;;  %v3654_v46 = vld [vmem:[#allocation18 + $0x3a0] sm:$0xff]  ;;  %v7598_v50 = vpack.c.bf16 %v3664_v4, %v3656_v63 }
0x1154   :  { %v5606_v31 = vmul.f32 -1.442695, %v3518_v21  ;;  %v3592_v21 = vld [vmem:[#allocation18 + $0x1b0] sm:$0xff]  ;;  %v3662_v55 = vld [vmem:[#allocation18 + $0x3e0] sm:$0xff] }
0x1155   :  { %7836 = vpow2.f32 %v5605_v41  ;;  %v3600_v41 = vld [vmem:[#allocation18 + $0x1f0] sm:$0xff]  ;;  %v7566_v39 = vpack.c.bf16 %v3662_v55, %v3654_v46  ;;  %v9367_v56 = vld [vmem:[#allocation19] sm:$0xff] }
0x1156   :  { %7838 = vpow2.f32 %v5606_v31  ;;  %v3607_v31 = vld [vmem:[#allocation18 + $0x228] sm:$0xff] }
0x115f   :  { %v7837_v45 = vpop.eup %7836 }
0x1160   :  { %v7839_v38 = vpop.eup %7838  ;;  %v3512_v59 = vadd.f32 1.0, %v7837_v45  ;;  %v3615_v45 = vld [vmem:[#allocation18 + $0x268] sm:$0xff] }
0x1161   :  { %v3522_v52 = vadd.f32 1.0, %v7839_v38  ;;  %v3609_v38 = vld [vmem:[#allocation18 + $0x238] sm:$0xff] }
0x1162   :  { %7840 = vrcp.f32 %v3512_v59  ;;  %v3617_v59 = vld [vmem:[#allocation18 + $0x278] sm:$0xff] }
0x1163   :  { %7842 = vrcp.f32 %v3522_v52  ;;  %v7550_v52 = vpack.c.bf16 %v3598_v23, %v3590_v15  ;;  %v3679_v15 = vrot.slane %v9367_v56, %v8626_v33  ;;  %v3675_v23 = vrot.slane %v9367_v56, %v8629_v36 }
0x116c   :  { %v7841_v11 = vpop.eup %7840 }
0x116d   :  { %v7843_v61 = vpop.eup %7842  ;;  %v3529_v6 = vmul.f32 %v7841_v11, %v3527_v25  ;;  %v7552_v25 = vpack.c.bf16 %v3615_v45, %v3607_v31  ;;  %v7584_v11 = vpack.c.bf16 %v3617_v59, %v3609_v38 }
0x116e   :  { %v3536_v27 = vmul.f32 %v7843_v61, %v3534_v26  ;;  %v3532_v30 = vsub.f32 1.0, %v7843_v61  ;;  %v3608_v26 = vld [vmem:[#allocation18 + $0x230] sm:$0xff] }
0x116f   :  { %v3530_v10 = vadd.f32 %v3529_v6, %v9074_v62  ;;  %v7540_v62 = vpack.c.bf16 %v3567_v53, %v3559_v58  ;;  %v3616_v61 = vld [vmem:[#allocation18 + $0x270] sm:$0xff]  ;;  %v3623_v6 = vld [vmem:[#allocation18 + $0x2a8] sm:$0xff] }
0x1170   :  { %v7586_v47 = vpack.c.bf16 %v3616_v61, %v3608_v26  ;;  %v3624_v58 = vld [vmem:[#allocation18 + $0x2b0] sm:$0xff] }
0x1171   :  { %7844 = vtanh.f32 %v3530_v10  ;;  %v3625_v10 = vld [vmem:[#allocation18 + $0x2b8] sm:$0xff]  ;;  %v3632_v53 = vld [vmem:[#allocation18 + $0x2f0] sm:$0xff] }
0x1172   :  { %v7590_v14 = vpack.c.bf16 %v3632_v53, %v3624_v58 }
0x117b   :  { %v7845_v35 = vpop.eup %7844 }
0x117c   :  { %v3533_v20 = vmul.f32 %v7845_v35, %v3532_v30  ;;  %v3633_v30 = vld [vmem:[#allocation18 + $0x2f8] sm:$0xff]  ;;  %v7554_v35 = vpack.c.bf16 %v3614_v48, %v3606_v18 }
0x117d   :  { %v7588_v12 = vpack.c.bf16 %v3633_v30, %v3625_v10 }
0x117e   :  { %v3537_v5 = vadd.f32 %v3536_v27, %v3533_v20  ;;  %v3631_v27 = vld [vmem:[#allocation18 + $0x2e8] sm:$0xff]  ;;  %v3630_v20 = vld [vmem:[#allocation18 + $0x2e0] sm:$0xff] }
0x117f   :  { %v7556_v37 = vpack.c.bf16 %v3631_v27, %v3623_v6 }
0x1180   :  { %v9359_v49 = vrot.slane %v3537_v5, 6  ;;  %v3641_v5 = vld [vmem:[#allocation18 + $0x338] sm:$0xff] }
0x1182   :  { %3776 = vmatmul.mubr.f32.vlgmr.msra.gmra.mrb[40].mxu0 %v9359_v49  ;;  %3847 = vmatmul.mubr.f32.vlgmr.msra.gmra.mrb[36].mxu1 %v9359_v49 }
0x1183   :  { %7539 = vmatpush1.bf16.msra.mxu0 %v7538_v22  ;;  %7571 = vmatpush1.bf16.msra.mxu1 %v7570_v16  ;;  %v3649_v22 = vld [vmem:[#allocation18 + $0x378] sm:$0xff]  ;;  %v7558_v16 = vpack.c.bf16 %v3630_v20, %v3622_v17 }
0x1184   :  { %7541 = vmatprep.subr.bf16.mxu0 %v7540_v62  ;;  %7573 = vmatprep.subr.bf16.mxu1 %v7572_v51  ;;  %v3646_v62 = vld [vmem:[#allocation18 + $0x360] sm:$0xff]  ;;  %v7560_v51 = vpack.c.bf16 %v3647_v1, %v3639_v57  ;;  %v7592_v60 = vpack.c.bf16 %v3649_v22, %v3641_v5 }
0x1185   :  { %3917 = vmatprep.mubr.f32.mxu0 %v8207_v0  ;;  %3988 = vmatprep.mubr.f32.mxu1 %v8207_v0  ;;  %v7582_v0 = vpack.c.bf16 %v3600_v41, %v3592_v21 }
0x1187   :  { %7543 = vmatpush1.bf16.msra.mxu0 %v7542_v7  ;;  %7575 = vmatpush1.bf16.msra.mxu1 %v7574_v8  ;;  %v3665_v7 = vld [vmem:[#allocation18 + $0x3f8] sm:$0xff]  ;;  %v7562_v8 = vpack.c.bf16 %v3646_v62, %v3638_v3 }
0x1188   :  { %7545 = vmatprep.subr.bf16.mxu0 %v7544_v40  ;;  %7577 = vmatprep.subr.bf16.mxu1 %v7576_v42  ;;  %v7564_v40 = vpack.c.bf16 %v3663_v34, %v3655_v24  ;;  %v7596_v42 = vpack.c.bf16 %v3665_v7, %v3657_v44 }
0x118b   :  { %7547 = vmatpush1.bf16.msra.mxu0 %v7546_v2  ;;  %7579 = vmatpush1.bf16.msra.mxu1 %v7578_v9  ;;  %v9370_v2 = vsub.s32 3, %v8620_v28  ;;  %v3671_v9 = vrot.slane %v9367_v56, %v8623_v32 }
0x118c   :  { %7549 = vmatprep.subr.bf16.mxu0 %v7548_v43  ;;  %7581 = vmatprep.subr.bf16.mxu1 %v7580_v19 }
0x118d   :  { %v3683_v43 = vrot.slane %v9367_v56, %v9370_v2 }
0x118f   :  { %7551 = vmatpush1.bf16.msra.mxu0 %v7550_v52  ;;  %7583 = vmatpush1.bf16.msra.mxu1 %v7582_v0 }
0x1190   :  { %7553 = vmatprep.subr.bf16.mxu0 %v7552_v25  ;;  %7585 = vmatprep.subr.bf16.mxu1 %v7584_v11 }
0x1193   :  { %7555 = vmatpush1.bf16.msra.mxu0 %v7554_v35  ;;  %7587 = vmatpush1.bf16.msra.mxu1 %v7586_v47 }
0x1194   :  { %7557 = vmatprep.subr.bf16.mxu0 %v7556_v37  ;;  %7589 = vmatprep.subr.bf16.mxu1 %v7588_v12 }
0x1197   :  { %7559 = vmatpush1.bf16.msra.mxu0 %v7558_v16  ;;  %7591 = vmatpush1.bf16.msra.mxu1 %v7590_v14 }
0x1198   :  { %7561 = vmatprep.subr.bf16.mxu0 %v7560_v51  ;;  %7593 = vmatprep.subr.bf16.mxu1 %v7592_v60 }
0x119b   :  { %7563 = vmatpush1.bf16.msra.mxu0 %v7562_v8  ;;  %7595 = vmatpush1.bf16.msra.mxu1 %v7594_v29 }
0x119c   :  { %7565 = vmatprep.subr.bf16.mxu0 %v7564_v40  ;;  %7597 = vmatprep.subr.bf16.mxu1 %v7596_v42 }
0x119f   :  { %7567 = vmatpush1.bf16.msra.mxu0 %v7566_v39  ;;  %7599 = vmatpush1.bf16.msra.mxu1 %v7598_v50 }
0x11a2   :  { %3918 = vmatmul.mubr.f32.vlgmr.msra.gmra.mrb[42].mxu0 %v9359_v49  ;;  %3989 = vmatmul.mubr.f32.vlgmr.msra.gmra.mrb[38].mxu1 %v9359_v49 }
0x1255   :  { %v3777_v19 = vpop.f32.mrb[40].mxu0  ;;  %v3848_v21 = vpop.f32.mrb[36].mxu1 }
0x1256   :  { %v3778_v49 = vadd.f32 %v3777_v19, %v3671_v9  ;;  %v3849_v41 = vadd.f32 %v3848_v21, %v3679_v15  ;;  %v3779_v31 = vpop.f32.mrb[41].mxu0  ;;  %v3850_v45 = vpop.f32.mrb[37].mxu1  ;;  %v9405_v19 = vsub.s32 4, %v8620_v28  ;;  %v9408_v21 = vsub.s32 6, %v8620_v28 }
0x1257   :  { %v3780_v38 = vadd.f32 %v3779_v31, %v3675_v23  ;;  %v3851_v59 = vadd.f32 %v3850_v45, %v3683_v43  ;;  %v9411_v31 = vsub.s32 5, %v8620_v28  ;;  %v9414_v45 = vsub.s32 7, %v8620_v28 }
0x1258   :  { %v3995_v52 = vsel %vm1870_vm2, %v3778_v49, 0.0  ;;  %v4009_v0 = vsel %vm1870_vm2, %v3849_v41, 0.0 }
0x1259   :  { %v3996_v18 = vrot.slane %v3995_v52, 4  ;;  %v4010_v48 = vrot.slane %v4009_v0, 4  ;;  %v4002_v25 = vsel %vm1870_vm2, %v3780_v38, 0.0  ;;  %v4016_v11 = vsel %vm1870_vm2, %v3851_v59, 0.0 }
0x125a   :  { %v4003_v26 = vrot.slane %v4002_v25, 4  ;;  %v4017_v61 = vrot.slane %v4016_v11, 4 }
0x125b   :  { %v3997_v6 = vadd.f32 %v3996_v18, %v3995_v52  ;;  %v4011_v27 = vadd.f32 %v4010_v48, %v4009_v0 }
0x125c   :  { %v4004_v10 = vadd.f32 %v4003_v26, %v4002_v25  ;;  %v4018_v30 = vadd.f32 %v4017_v61, %v4016_v11  ;;  %v3687_v25 = vrot.slane %v9367_v56, %v9405_v19  ;;  %v3695_v11 = vrot.slane %v9367_v56, %v9408_v21 }
0x125d   :  { %v3998_v35 = vrot.slane %v3997_v6, 2  ;;  %v4012_v47 = vrot.slane %v4011_v27, 2 }
0x125e   :  { %v4005_v17 = vrot.slane %v4004_v10, 2  ;;  %v4019_v20 = vrot.slane %v4018_v30, 2 }
0x125f   :  { %v3999_v37 = vadd.f32 %v3998_v35, %v3997_v6  ;;  %v4013_v12 = vadd.f32 %v4012_v47, %v4011_v27  ;;  %v3691_v6 = vrot.slane %v9367_v56, %v9411_v31  ;;  %v3699_v27 = vrot.slane %v9367_v56, %v9414_v45 }
0x1260   :  { %v4006_v58 = vadd.f32 %v4005_v17, %v4004_v10  ;;  %v4020_v53 = vadd.f32 %v4019_v20, %v4018_v30 }
0x1261   :  { %v4000_v57 = vrot.slane %v3999_v37, 1  ;;  %v4014_v1 = vrot.slane %v4013_v12, 1 }
0x1262   :  { %v4007_v5 = vrot.slane %v4006_v58, 1  ;;  %v4021_v22 = vrot.slane %v4020_v53, 1 }
0x1263   :  { %v4001_v16 = vadd.f32 %v4000_v57, %v3999_v37  ;;  %v4015_v14 = vadd.f32 %v4014_v1, %v4013_v12 }
0x1264   :  { %v4008_v3 = vadd.f32 %v4007_v5, %v4006_v58  ;;  %v4022_v62 = vadd.f32 %v4021_v22, %v4020_v53 }
0x1265   :  { %v4052_v51 = vmul.f32 0.5, %v4001_v16  ;;  %v4054_v60 = vmul.f32 0.5, %v4015_v14 }
0x1266   :  { %v4053_v54 = vmul.f32 0.5, %v4008_v3  ;;  %v4055_v13 = vmul.f32 0.5, %v4022_v62 }
0x1267   :  { %v9384_v24 = vsub.f32 %v3778_v49, %v4052_v51  ;;  %v9386_v34 = vsub.f32 %v3849_v41, %v4054_v60 }
0x1268   :  { %v9388_v44 = vsub.f32 %v3780_v38, %v4053_v54  ;;  %v9390_v7 = vsub.f32 %v3851_v59, %v4055_v13 }
0x1269   :  { %v4068_v8 = vmul.f32 %v9384_v24, %v9384_v24  ;;  %v4070_v29 = vmul.f32 %v9386_v34, %v9386_v34 }
0x126a   :  { %v4069_v46 = vmul.f32 %v9388_v44, %v9388_v44  ;;  %v4071_v40 = vmul.f32 %v9390_v7, %v9390_v7 }
0x126b   :  { %v4076_v42 = vsel %vm1870_vm2, %v4068_v8, 0.0  ;;  %v4090_v55 = vsel %vm1870_vm2, %v4070_v29, 0.0 }
0x126c   :  { %v4077_v63 = vrot.slane %v4076_v42, 4  ;;  %v4091_v4 = vrot.slane %v4090_v55, 4  ;;  %v4083_v39 = vsel %vm1870_vm2, %v4069_v46, 0.0  ;;  %v4097_v50 = vsel %vm1870_vm2, %v4071_v40, 0.0 }
0x126d   :  { %v4084_v9 = vrot.slane %v4083_v39, 4  ;;  %v4098_v15 = vrot.slane %v4097_v50, 4 }
0x126e   :  { %v4078_v23 = vadd.f32 %v4077_v63, %v4076_v42  ;;  %v4092_v43 = vadd.f32 %v4091_v4, %v4090_v55 }
0x126f   :  { %v4085_v49 = vadd.f32 %v4084_v9, %v4083_v39  ;;  %v4099_v41 = vadd.f32 %v4098_v15, %v4097_v50 }
0x1270   :  { %v4079_v38 = vrot.slane %v4078_v23, 2  ;;  %v4093_v59 = vrot.slane %v4092_v43, 2 }
0x1271   :  { %v4086_v52 = vrot.slane %v4085_v49, 2  ;;  %v4100_v0 = vrot.slane %v4099_v41, 2 }
0x1272   :  { %v4080_v18 = vadd.f32 %v4079_v38, %v4078_v23  ;;  %v4094_v48 = vadd.f32 %v4093_v59, %v4092_v43 }
0x1273   :  { %v4087_v26 = vadd.f32 %v4086_v52, %v4085_v49  ;;  %v4101_v61 = vadd.f32 %v4100_v0, %v4099_v41  ;;  %v9434_v0 = vld [vmem:[#allocation21] sm:$0xff] }
0x1274   :  { %v4081_v10 = vrot.slane %v4080_v18, 1  ;;  %v4095_v30 = vrot.slane %v4094_v48, 1 }
0x1275   :  { %v4088_v35 = vrot.slane %v4087_v26, 1  ;;  %v4102_v47 = vrot.slane %v4101_v61, 1  ;;  %v3919_v17 = vpop.f32.mrb[42].mxu0  ;;  %v3990_v20 = vpop.f32.mrb[38].mxu1 }
0x1276   :  { %v4082_v37 = vadd.f32 %v4081_v10, %v4080_v18  ;;  %v4096_v12 = vadd.f32 %v4095_v30, %v4094_v48  ;;  %v3920_v58 = vadd.f32 %v3919_v17, %v3687_v25  ;;  %v3991_v53 = vadd.f32 %v3990_v20, %v3695_v11  ;;  %v3921_v57 = vpop.f32.mrb[43].mxu0  ;;  %v3992_v1 = vpop.f32.mrb[39].mxu1  ;;  %v9436_v25 = vld [vmem:[#allocation22] sm:$0xff] }
0x1277   :  { %v4089_v5 = vadd.f32 %v4088_v35, %v4087_v26  ;;  %v4103_v22 = vadd.f32 %v4102_v47, %v4101_v61  ;;  %v9424_v16 = vadd.f32 %v3921_v57, %v3691_v6  ;;  %v9426_v14 = vadd.f32 %v3992_v1, %v3699_v27 }
0x1278   :  { %v4132_v3 = vmul.f32 0.5, %v4082_v37  ;;  %v4134_v56 = vmul.f32 0.5, %v4096_v12  ;;  %v4023_v62 = vsel %vm1870_vm2, %v3920_v58, 0.0  ;;  %v4037_v51 = vsel %vm1870_vm2, %v3991_v53, 0.0 }
0x1279   :  { %v4133_v60 = vmul.f32 0.5, %v4089_v5  ;;  %v4135_v54 = vmul.f32 0.5, %v4103_v22  ;;  %v4024_v13 = vrot.slane %v4023_v62, 4  ;;  %v4038_v8 = vrot.slane %v4037_v51, 4 }
0x127a   :  { %v4140_v29 = vadd.f32 1e-05, %v4132_v3  ;;  %v4142_v46 = vadd.f32 1e-05, %v4134_v56  ;;  %v4030_v40 = vsel %vm1870_vm2, %v9424_v16, 0.0  ;;  %v4044_v42 = vsel %vm1870_vm2, %v9426_v14, 0.0 }
0x127b   :  { %v4141_v55 = vadd.f32 1e-05, %v4133_v60  ;;  %v4143_v63 = vadd.f32 1e-05, %v4135_v54  ;;  %v4025_v4 = vadd.f32 %v4024_v13, %v4023_v62  ;;  %v4039_v39 = vadd.f32 %v4038_v8, %v4037_v51 }
0x127c   :  { %7846 = vrsqrt.f32 %v4140_v29  ;;  %v4031_v50 = vrot.slane %v4030_v40, 4  ;;  %v4045_v9 = vrot.slane %v4044_v42, 4  ;;  %v4169_v27 = vrot.slane %v9434_v0, %v8623_v32 }
0x127d   :  { %7848 = vrsqrt.f32 %v4142_v46  ;;  %v4026_v15 = vrot.slane %v4025_v4, 2  ;;  %v4040_v23 = vrot.slane %v4039_v39, 2  ;;  %v4177_v10 = vrot.slane %v9434_v0, %v8626_v33 }
0x127e   :  { %7850 = vrsqrt.f32 %v4141_v55  ;;  %v4032_v43 = vadd.f32 %v4031_v50, %v4030_v40  ;;  %v4046_v49 = vadd.f32 %v4045_v9, %v4044_v42  ;;  %v4219_v47 = vrot.slane %v9436_v25, %v8623_v32 }
0x127f   :  { %7852 = vrsqrt.f32 %v4143_v63  ;;  %v4027_v41 = vadd.f32 %v4026_v15, %v4025_v4  ;;  %v4041_v38 = vadd.f32 %v4040_v23, %v4039_v39  ;;  %v4173_v17 = vrot.slane %v9434_v0, %v8629_v36 }
0x1280   :  { %v4033_v59 = vrot.slane %v4032_v43, 2  ;;  %v4047_v52 = vrot.slane %v4046_v49, 2  ;;  %v4227_v57 = vrot.slane %v9436_v25, %v8626_v33  ;;  %v4181_v1 = vrot.slane %v9434_v0, %v9370_v2 }
0x1281   :  { %v4028_v18 = vrot.slane %v4027_v41, 1  ;;  %v4042_v48 = vrot.slane %v4041_v38, 1  ;;  %v4223_v62 = vrot.slane %v9436_v25, %v8629_v36  ;;  %v4231_v8 = vrot.slane %v9436_v25, %v9370_v2 }
0x1282   :  { %v4034_v11 = vadd.f32 %v4033_v59, %v4032_v43  ;;  %v4048_v26 = vadd.f32 %v4047_v52, %v4046_v49 }
0x1283   :  { %v4029_v61 = vadd.f32 %v4028_v18, %v4027_v41  ;;  %v4043_v6 = vadd.f32 %v4042_v48, %v4041_v38 }
0x1284   :  { %v4035_v30 = vrot.slane %v4034_v11, 1  ;;  %v4049_v35 = vrot.slane %v4048_v26, 1 }
0x1285   :  { %v4056_v20 = vmul.f32 0.5, %v4029_v61  ;;  %v4058_v37 = vmul.f32 0.5, %v4043_v6 }
0x1286   :  { %v7847_v12 = vpop.eup %7846  ;;  %v4036_v5 = vadd.f32 %v4035_v30, %v4034_v11  ;;  %v4050_v22 = vadd.f32 %v4049_v35, %v4048_v26 }
0x1287   :  { %v7849_v3 = vpop.eup %7848  ;;  %v4156_v56 = vmul.f32 %v7847_v12, %v9384_v24  ;;  %v9453_v51 = vsub.f32 %v3920_v58, %v4056_v20  ;;  %v9455_v60 = vsub.f32 %v3991_v53, %v4058_v37 }
0x1288   :  { %v7851_v54 = vpop.eup %7850  ;;  %v4158_v13 = vmul.f32 %v7849_v3, %v9386_v34  ;;  %v4057_v29 = vmul.f32 0.5, %v4036_v5  ;;  %v4059_v46 = vmul.f32 0.5, %v4050_v22 }
0x1289   :  { %v7853_v40 = vpop.eup %7852  ;;  %v4206_v42 = vmul.f32 %v4169_v27, %v4156_v56  ;;  %v4157_v55 = vmul.f32 %v7851_v54, %v9388_v44  ;;  %v4072_v24 = vmul.f32 %v9453_v51, %v9453_v51  ;;  %v4074_v58 = vmul.f32 %v9455_v60, %v9455_v60 }
0x128a   :  { %v4208_v53 = vmul.f32 %v4177_v10, %v4158_v13  ;;  %v4159_v63 = vmul.f32 %v7853_v40, %v9390_v7  ;;  %v9467_v34 = vsub.f32 %v9424_v16, %v4057_v29  ;;  %v9470_v4 = vsub.f32 %v9426_v14, %v4059_v46 }
0x128b   :  { %v9472_v39 = vadd.f32 %v4219_v47, %v4206_v42  ;;  %v4207_v50 = vmul.f32 %v4173_v17, %v4157_v55  ;;  %v4104_v44 = vsel %vm1870_vm2, %v4072_v24, 0.0  ;;  %v4118_v9 = vsel %vm1870_vm2, %v4074_v58, 0.0 }
0x128c   :  { %v9476_v15 = vadd.f32 %v4227_v57, %v4208_v53  ;;  %v4209_v23 = vmul.f32 %v4181_v1, %v4159_v63  ;;  %v4105_v43 = vrot.slane %v4104_v44, 4  ;;  %v4119_v49 = vrot.slane %v4118_v9, 4 }
0x128d   :  { %v4264_v7 = vmax.f32 %v9472_v39, 0.0  ;;  %v9479_v41 = vadd.f32 %v4223_v62, %v4207_v50  ;;  %v4073_v16 = vmul.f32 %v9467_v34, %v9467_v34  ;;  %v4075_v14 = vmul.f32 %v9470_v4, %v9470_v4 }
0x128e   :  { %v4266_v38 = vmax.f32 %v9476_v15, 0.0  ;;  %v9486_v59 = vadd.f32 %v4231_v8, %v4209_v23  ;;  %v4106_v52 = vadd.f32 %v4105_v43, %v4104_v44  ;;  %v4120_v18 = vadd.f32 %v4119_v49, %v4118_v9 }
0x128f   :  { %v4265_v48 = vmax.f32 %v9479_v41, 0.0  ;;  %v4111_v11 = vsel %vm1870_vm2, %v4073_v16, 0.0  ;;  %v4125_v26 = vsel %vm1870_vm2, %v4075_v14, 0.0  ;;  %v4185_v63 = vrot.slane %v9434_v0, %v9405_v19 }
0x1290   :  { %v4267_v61 = vmax.f32 %v9486_v59, 0.0  ;;  %v4107_v6 = vrot.slane %v4106_v52, 2  ;;  %v4121_v27 = vrot.slane %v4120_v18, 2  ;;  %v4112_v10 = vrot.slane %v4111_v11, 4 }
0x1291   :  { %v4126_v30 = vrot.slane %v4125_v26, 4  ;;  %v4193_v44 = vrot.slane %v9434_v0, %v9408_v21  ;;  %v4235_v43 = vrot.slane %v9436_v25, %v9405_v19  ;;  %v4243_v16 = vrot.slane %v9436_v25, %v9408_v21 }
0x1292   :  { %v4108_v35 = vadd.f32 %v4107_v6, %v4106_v52  ;;  %v4122_v47 = vadd.f32 %v4121_v27, %v4120_v18  ;;  %v4113_v17 = vadd.f32 %v4112_v10, %v4111_v11  ;;  %v4189_v52 = vrot.slane %v9434_v0, %v9411_v31 }
0x1293   :  { %v4127_v20 = vadd.f32 %v4126_v30, %v4125_v26  ;;  %v4197_v26 = vrot.slane %v9434_v0, %v9414_v45 }
0x1294   :  { %v4109_v37 = vrot.slane %v4108_v35, 1  ;;  %v4123_v12 = vrot.slane %v4122_v47, 1  ;;  %v4114_v57 = vrot.slane %v4113_v17, 2 }
0x1295   :  { %v4128_v1 = vrot.slane %v4127_v20, 2 }
0x1296   :  { %v4110_v5 = vadd.f32 %v4109_v37, %v4108_v35  ;;  %v4124_v22 = vadd.f32 %v4123_v12, %v4122_v47  ;;  %v4115_v3 = vadd.f32 %v4114_v57, %v4113_v17  ;;  %v4247_v35 = vrot.slane %v9436_v25, %v9414_v45 }
0x1297   :  { %v4129_v56 = vadd.f32 %v4128_v1, %v4127_v20 }
0x1298   :  { %v4136_v62 = vmul.f32 0.5, %v4110_v5  ;;  %v4138_v54 = vmul.f32 0.5, %v4124_v22  ;;  %v4116_v13 = vrot.slane %v4115_v3, 1 }
0x1299   :  { %v4130_v8 = vrot.slane %v4129_v56, 1 }
0x129a   :  { %v4144_v29 = vadd.f32 1e-05, %v4136_v62  ;;  %v4146_v46 = vadd.f32 1e-05, %v4138_v54  ;;  %v4117_v40 = vadd.f32 %v4116_v13, %v4115_v3 }
0x129b   :  { %v4131_v42 = vadd.f32 %v4130_v8, %v4129_v56 }
0x129c   :  { %7854 = vrsqrt.f32 %v4144_v29  ;;  %v4137_v55 = vmul.f32 0.5, %v4117_v40 }
0x129d   :  { %7856 = vrsqrt.f32 %v4146_v46  ;;  %v4139_v24 = vmul.f32 0.5, %v4131_v42 }
0x129e   :  { %v4145_v58 = vadd.f32 1e-05, %v4137_v55 }
0x129f   :  { %v4147_v53 = vadd.f32 1e-05, %v4139_v24 }
0x12a0   :  { %7858 = vrsqrt.f32 %v4145_v58 }
0x12a1   :  { %7860 = vrsqrt.f32 %v4147_v53 }
0x12a6   :  { %v7855_v50 = vpop.eup %7854 }
0x12a7   :  { %v7857_v9 = vpop.eup %7856  ;;  %v4160_v23 = vmul.f32 %v7855_v50, %v9453_v51 }
0x12a8   :  { %v4162_v49 = vmul.f32 %v7857_v9, %v9455_v60  ;;  %v4239_v60 = vrot.slane %v9436_v25, %v9411_v31 }
0x12a9   :  { %v4210_v14 = vmul.f32 %v4185_v63, %v4160_v23 }
0x12aa   :  { %v7859_v18 = vpop.eup %7858  ;;  %v4212_v11 = vmul.f32 %v4193_v44, %v4162_v49 }
0x12ab   :  { %v7861_v6 = vpop.eup %7860  ;;  %v9506_v27 = vadd.f32 %v4235_v43, %v4210_v14  ;;  %v4161_v51 = vmul.f32 %v7859_v18, %v9467_v34 }
0x12ac   :  { %v9511_v10 = vadd.f32 %v4243_v16, %v4212_v11  ;;  %v4163_v30 = vmul.f32 %v7861_v6, %v9470_v4 }
0x12ad   :  { %v4268_v47 = vmax.f32 %v9506_v27, 0.0  ;;  %v4211_v17 = vmul.f32 %v4189_v52, %v4161_v51 }
0x12ae   :  { %v4270_v0 = vmax.f32 %v9511_v10, 0.0  ;;  %v4213_v20 = vmul.f32 %v4197_v26, %v4163_v30 }
0x12af   :  { %v9518_v37 = vadd.f32 %v4239_v60, %v4211_v17 }
0x12b0   :  { %v9520_v12 = vadd.f32 %v4247_v35, %v4213_v20 }
0x12b1   :  { %v4269_v34 = vmax.f32 %v9518_v37, 0.0 }
0x12b2   :  { %v4271_v57 = vmax.f32 %v9520_v12, 0.0 }
0x12b3   :  { %8186 = dma.done.wait [#allocation3], 65536 }
0x12b4   :  { %8187 = vsyncadd [#allocation3], 4294901760  ;;  %v9527_v25 = vpack.c.bf16 %v4265_v48, %v4265_v48  ;;  %v4285_v4 = vld [vmem:[#allocation2 + $0x8] sm:$0xff]  ;;  %v4287_v1 = vld [vmem:[#allocation2 + $0x18] sm:$0xff]  ;;  %s8219_s0 = smov [#allocation25]  }
0x12b5   :  { %v4284_v5 = vld [vmem:[#allocation2] sm:$0xff]  ;;  %4838 = vmatprep.subr.bf16.mxu0 %v4285_v4  ;;  %5002 = vmatprep.subr.bf16.mxu1 %v4287_v1  ;;  %v4286_v22 = vld [vmem:[#allocation2 + $0x10] sm:$0xff]  ;;  %v4293_v3 = vld [vmem:[#allocation2 + $0x48] sm:$0xff]  ;;  %s5546_s28 = sshll.u32 %s8219_s0, 4  ;;  %s5547_s28 = int_to_ptr.vmem [resolvable:$true] %s5546_s28 }
0x12b6   :  { %4870 = vmatprep.mubr.bf16.mxu0 %v9527_v25  ;;  %5034 = vmatprep.mubr.bf16.mxu1 %v9527_v25  ;;  %v4295_v56 = vld [vmem:[#allocation2 + $0x58] sm:$0xff]  ;;  %v4292_v41 = vld [vmem:[#allocation2 + $0x40] sm:$0xff]  ;;  %v4294_v62 = vld [vmem:[#allocation2 + $0x50] sm:$0xff]  ;;  %s8150_s2 = scalar_lea.vmem %s5547_s28, 256  ;;  %p8155_p7 = scmp.lt.s32.totalorder %s5547_s28, %s5547_s28 }
0x12b7   :  { %4839 = vmatpush1.bf16.msra.mxu0 %v4284_v5  ;;  %5003 = vmatpush1.bf16.msra.mxu1 %v4286_v22  ;;  %v4301_v48 = vld [vmem:[#allocation2 + $0x88] sm:$0xff]  ;;  %v4303_v54 = vld [vmem:[#allocation2 + $0x98] sm:$0xff]  ;;  %v4300_v13 = vld [vmem:[#allocation2 + $0x80] sm:$0xff]  ;;  %p8151_p6 = scmp.ne.s32.totalorder %s5547_s28, %s8150_s2  ;;  %p8156_p8 = scmp.lt.s32.totalorder %s8150_s2, %s8150_s2 }
0x12b8   :  { %4840 = vmatprep.subr.bf16.mxu0 %v4293_v3  ;;  %5004 = vmatprep.subr.bf16.mxu1 %v4295_v56  ;;  %v4302_v8 = vld [vmem:[#allocation2 + $0x90] sm:$0xff]  ;;  %v4309_v29 = vld [vmem:[#allocation2 + $0xc8] sm:$0xff]  ;;  %v4311_v46 = vld [vmem:[#allocation2 + $0xd8] sm:$0xff] }
0x12b9   :  { %v4308_v40 = vld [vmem:[#allocation2 + $0xc0] sm:$0xff]  ;;  %v4310_v42 = vld [vmem:[#allocation2 + $0xd0] sm:$0xff]  ;;  %v4317_v55 = vld [vmem:[#allocation2 + $0x108] sm:$0xff]  ;;  %p8157_p9 = por %p8156_p8, %p8155_p7 }
0x12ba   :  { %v4319_v24 = vld [vmem:[#allocation2 + $0x118] sm:$0xff]  ;;  %v4316_v58 = vld [vmem:[#allocation2 + $0x100] sm:$0xff]  ;;  %v4318_v53 = vld [vmem:[#allocation2 + $0x110] sm:$0xff] }
0x12bb   :  { %4841 = vmatpush1.bf16.msra.mxu0 %v4292_v41  ;;  %5005 = vmatpush1.bf16.msra.mxu1 %v4294_v62  ;;  %v4325_v63 = vld [vmem:[#allocation2 + $0x148] sm:$0xff]  ;;  %v4327_v50 = vld [vmem:[#allocation2 + $0x158] sm:$0xff]  ;;  %v4324_v44 = vld [vmem:[#allocation2 + $0x140] sm:$0xff]  ;;  %p8158_p10 = pnand %p8157_p9, %p8151_p6 }
0x12bc   :  { %4842 = vmatprep.subr.bf16.mxu0 %v4301_v48  ;;  %5006 = vmatprep.subr.bf16.mxu1 %v4303_v54  ;;  %v4326_v9 = vld [vmem:[#allocation2 + $0x150] sm:$0xff]  ;;  %v4333_v23 = vld [vmem:[#allocation2 + $0x188] sm:$0xff]  ;;  %v4335_v43 = vld [vmem:[#allocation2 + $0x198] sm:$0xff] }
0x12bd   :  { %v4332_v49 = vld [vmem:[#allocation2 + $0x180] sm:$0xff]  ;;  %v4334_v16 = vld [vmem:[#allocation2 + $0x190] sm:$0xff]  ;;  %v4341_v14 = vld [vmem:[#allocation2 + $0x1c8] sm:$0xff] }
0x12be   :  { %v4343_v52 = vld [vmem:[#allocation2 + $0x1d8] sm:$0xff]  ;;  %v4340_v18 = vld [vmem:[#allocation2 + $0x1c0] sm:$0xff]  ;;  %v4342_v11 = vld [vmem:[#allocation2 + $0x1d0] sm:$0xff] }
0x12bf   :  { %4843 = vmatpush1.bf16.msra.mxu0 %v4300_v13  ;;  %5007 = vmatpush1.bf16.msra.mxu1 %v4302_v8  ;;  %v4349_v26 = vld [vmem:[#allocation2 + $0x208] sm:$0xff]  ;;  %v4351_v6 = vld [vmem:[#allocation2 + $0x218] sm:$0xff]  ;;  %v4348_v51 = vld [vmem:[#allocation2 + $0x200] sm:$0xff] }
0x12c0   :  { %4844 = vmatprep.subr.bf16.mxu0 %v4309_v29  ;;  %5008 = vmatprep.subr.bf16.mxu1 %v4311_v46  ;;  %v4350_v60 = vld [vmem:[#allocation2 + $0x210] sm:$0xff]  ;;  %v4357_v30 = vld [vmem:[#allocation2 + $0x248] sm:$0xff]  ;;  %v4359_v35 = vld [vmem:[#allocation2 + $0x258] sm:$0xff] }
0x12c1   :  { %v4356_v17 = vld [vmem:[#allocation2 + $0x240] sm:$0xff]  ;;  %v4358_v20 = vld [vmem:[#allocation2 + $0x250] sm:$0xff]  ;;  %v4365_v4 = vld [vmem:[#allocation2 + $0x288] sm:$0xff] }
0x12c2   :  { %v4367_v1 = vld [vmem:[#allocation2 + $0x298] sm:$0xff]  ;;  %v4364_v5 = vld [vmem:[#allocation2 + $0x280] sm:$0xff]  ;;  %v4366_v22 = vld [vmem:[#allocation2 + $0x290] sm:$0xff] }
0x12c3   :  { %4845 = vmatpush1.bf16.msra.mxu0 %v4308_v40  ;;  %5009 = vmatpush1.bf16.msra.mxu1 %v4310_v42  ;;  %v4373_v3 = vld [vmem:[#allocation2 + $0x2c8] sm:$0xff]  ;;  %v4375_v56 = vld [vmem:[#allocation2 + $0x2d8] sm:$0xff]  ;;  %v4372_v41 = vld [vmem:[#allocation2 + $0x2c0] sm:$0xff] }
0x12c4   :  { %4846 = vmatprep.subr.bf16.mxu0 %v4317_v55  ;;  %5010 = vmatprep.subr.bf16.mxu1 %v4319_v24  ;;  %v4374_v62 = vld [vmem:[#allocation2 + $0x2d0] sm:$0xff]  ;;  %v4381_v48 = vld [vmem:[#allocation2 + $0x308] sm:$0xff]  ;;  %v4383_v54 = vld [vmem:[#allocation2 + $0x318] sm:$0xff] }
0x12c5   :  { %v4380_v13 = vld [vmem:[#allocation2 + $0x300] sm:$0xff]  ;;  %v4382_v8 = vld [vmem:[#allocation2 + $0x310] sm:$0xff]  ;;  %v4389_v29 = vld [vmem:[#allocation2 + $0x348] sm:$0xff] }
0x12c6   :  { %v4391_v46 = vld [vmem:[#allocation2 + $0x358] sm:$0xff]  ;;  %v4388_v40 = vld [vmem:[#allocation2 + $0x340] sm:$0xff]  ;;  %v4390_v42 = vld [vmem:[#allocation2 + $0x350] sm:$0xff] }
0x12c7   :  { %4847 = vmatpush1.bf16.msra.mxu0 %v4316_v58  ;;  %5011 = vmatpush1.bf16.msra.mxu1 %v4318_v53  ;;  %v4397_v55 = vld [vmem:[#allocation2 + $0x388] sm:$0xff]  ;;  %v4399_v24 = vld [vmem:[#allocation2 + $0x398] sm:$0xff]  ;;  %v4396_v58 = vld [vmem:[#allocation2 + $0x380] sm:$0xff] }
0x12c8   :  { %4848 = vmatprep.subr.bf16.mxu0 %v4325_v63  ;;  %5012 = vmatprep.subr.bf16.mxu1 %v4327_v50  ;;  %v4398_v53 = vld [vmem:[#allocation2 + $0x390] sm:$0xff]  ;;  %v4405_v63 = vld [vmem:[#allocation2 + $0x3c8] sm:$0xff]  ;;  %v4407_v50 = vld [vmem:[#allocation2 + $0x3d8] sm:$0xff] }
0x12c9   :  { %v4420_v39 = vld [vmem:[#allocation2 + $0x440] sm:$0xff] }
0x12ca   :  { %v4428_v59 = vld [vmem:[#allocation2 + $0x480] sm:$0xff] }
0x12cb   :  { %4849 = vmatpush1.bf16.msra.mxu0 %v4324_v44  ;;  %5013 = vmatpush1.bf16.msra.mxu1 %v4326_v9  ;;  %v4404_v44 = vld [vmem:[#allocation2 + $0x3c0] sm:$0xff]  ;;  %v4406_v9 = vld [vmem:[#allocation2 + $0x3d0] sm:$0xff] }
0x12cc   :  { %4850 = vmatprep.subr.bf16.mxu0 %v4333_v23  ;;  %5014 = vmatprep.subr.bf16.mxu1 %v4335_v43  ;;  %v4413_v23 = vld [vmem:[#allocation2 + $0x408] sm:$0xff]  ;;  %v4415_v43 = vld [vmem:[#allocation2 + $0x418] sm:$0xff]  ;;  %v4548_v15 = vld [vmem:[#allocation2 + $0x840] sm:$0xff] }
0x12cd   :  { %v4556_v37 = vld [vmem:[#allocation2 + $0x880] sm:$0xff] }
0x12ce   :  { %v4676_v27 = vld [vmem:[#allocation2 + $0xc40] sm:$0xff] }
0x12cf   :  { %4851 = vmatpush1.bf16.msra.mxu0 %v4332_v49  ;;  %5015 = vmatpush1.bf16.msra.mxu1 %v4334_v16  ;;  %v9534_v49 = vpack.c.bf16 %v4264_v7, %v4264_v7  ;;  %v4412_v16 = vld [vmem:[#allocation2 + $0x400] sm:$0xff]  ;;  %v4422_v7 = vld [vmem:[#allocation2 + $0x450] sm:$0xff] }
0x12d0   :  { %4852 = vmatprep.subr.bf16.mxu0 %v4341_v14  ;;  %5016 = vmatprep.subr.bf16.mxu1 %v4343_v52  ;;  %v4414_v14 = vld [vmem:[#allocation2 + $0x410] sm:$0xff]  ;;  %v4421_v52 = vld [vmem:[#allocation2 + $0x448] sm:$0xff]  ;;  %v4684_v12 = vld [vmem:[#allocation2 + $0xc80] sm:$0xff] }
0x12d1   :  { %v4296_v10 = vld [vmem:[#allocation2 + $0x60] sm:$0xff] }
0x12d3   :  { %4853 = vmatpush1.bf16.msra.mxu0 %v4340_v18  ;;  %5017 = vmatpush1.bf16.msra.mxu1 %v4342_v11  ;;  %v4423_v18 = vld [vmem:[#allocation2 + $0x458] sm:$0xff]  ;;  %v9539_v11 = vpack.c.bf16 %v4267_v61, %v4267_v61  ;;  %v4430_v61 = vld [vmem:[#allocation2 + $0x490] sm:$0xff] }
0x12d4   :  { %4854 = vmatprep.subr.bf16.mxu0 %v4349_v26  ;;  %5018 = vmatprep.subr.bf16.mxu1 %v4351_v6  ;;  %v4429_v26 = vld [vmem:[#allocation2 + $0x488] sm:$0xff]  ;;  %v4431_v6 = vld [vmem:[#allocation2 + $0x498] sm:$0xff] }
0x12d7   :  { %4855 = vmatpush1.bf16.msra.mxu0 %v4348_v51  ;;  %5019 = vmatpush1.bf16.msra.mxu1 %v4350_v60  ;;  %v4437_v51 = vld [vmem:[#allocation2 + $0x4c8] sm:$0xff]  ;;  %v4439_v60 = vld [vmem:[#allocation2 + $0x4d8] sm:$0xff] }
0x12d8   :  { %4856 = vmatprep.subr.bf16.mxu0 %v4357_v30  ;;  %5020 = vmatprep.subr.bf16.mxu1 %v4359_v35  ;;  %v4436_v30 = vld [vmem:[#allocation2 + $0x4c0] sm:$0xff]  ;;  %v4438_v35 = vld [vmem:[#allocation2 + $0x4d0] sm:$0xff] }
0x12db   :  { %4857 = vmatpush1.bf16.msra.mxu0 %v4356_v17  ;;  %5021 = vmatpush1.bf16.msra.mxu1 %v4358_v20  ;;  %v4445_v17 = vld [vmem:[#allocation2 + $0x508] sm:$0xff]  ;;  %v4447_v20 = vld [vmem:[#allocation2 + $0x518] sm:$0xff] }
0x12dc   :  { %4858 = vmatprep.subr.bf16.mxu0 %v4365_v4  ;;  %5022 = vmatprep.subr.bf16.mxu1 %v4367_v1  ;;  %v4444_v4 = vld [vmem:[#allocation2 + $0x500] sm:$0xff]  ;;  %v4446_v1 = vld [vmem:[#allocation2 + $0x510] sm:$0xff] }
0x12df   :  { %4859 = vmatpush1.bf16.msra.mxu0 %v4364_v5  ;;  %5023 = vmatpush1.bf16.msra.mxu1 %v4366_v22  ;;  %v4453_v5 = vld [vmem:[#allocation2 + $0x548] sm:$0xff]  ;;  %v4455_v22 = vld [vmem:[#allocation2 + $0x558] sm:$0xff] }
0x12e0   :  { %4860 = vmatprep.subr.bf16.mxu0 %v4373_v3  ;;  %5024 = vmatprep.subr.bf16.mxu1 %v4375_v56  ;;  %v4452_v3 = vld [vmem:[#allocation2 + $0x540] sm:$0xff]  ;;  %v4454_v56 = vld [vmem:[#allocation2 + $0x550] sm:$0xff] }
0x12e3   :  { %4861 = vmatpush1.bf16.msra.mxu0 %v4372_v41  ;;  %5025 = vmatpush1.bf16.msra.mxu1 %v4374_v62  ;;  %v4461_v41 = vld [vmem:[#allocation2 + $0x588] sm:$0xff]  ;;  %v4463_v62 = vld [vmem:[#allocation2 + $0x598] sm:$0xff] }
0x12e4   :  { %4862 = vmatprep.subr.bf16.mxu0 %v4381_v48  ;;  %5026 = vmatprep.subr.bf16.mxu1 %v4383_v54  ;;  %v4460_v48 = vld [vmem:[#allocation2 + $0x580] sm:$0xff]  ;;  %v4462_v54 = vld [vmem:[#allocation2 + $0x590] sm:$0xff] }
0x12e7   :  { %4863 = vmatpush1.bf16.msra.mxu0 %v4380_v13  ;;  %5027 = vmatpush1.bf16.msra.mxu1 %v4382_v8  ;;  %v4469_v13 = vld [vmem:[#allocation2 + $0x5c8] sm:$0xff]  ;;  %v4471_v8 = vld [vmem:[#allocation2 + $0x5d8] sm:$0xff] }
0x12e8   :  { %4864 = vmatprep.subr.bf16.mxu0 %v4389_v29  ;;  %5028 = vmatprep.subr.bf16.mxu1 %v4391_v46  ;;  %v4468_v29 = vld [vmem:[#allocation2 + $0x5c0] sm:$0xff]  ;;  %v4470_v46 = vld [vmem:[#allocation2 + $0x5d0] sm:$0xff] }
0x12eb   :  { %4865 = vmatpush1.bf16.msra.mxu0 %v4388_v40  ;;  %5029 = vmatpush1.bf16.msra.mxu1 %v4390_v42  ;;  %v4477_v40 = vld [vmem:[#allocation2 + $0x608] sm:$0xff]  ;;  %v4479_v42 = vld [vmem:[#allocation2 + $0x618] sm:$0xff] }
0x12ec   :  { %4866 = vmatprep.subr.bf16.mxu0 %v4397_v55  ;;  %5030 = vmatprep.subr.bf16.mxu1 %v4399_v24  ;;  %v4476_v55 = vld [vmem:[#allocation2 + $0x600] sm:$0xff]  ;;  %v4478_v24 = vld [vmem:[#allocation2 + $0x610] sm:$0xff] }
0x12ef   :  { %4867 = vmatpush1.bf16.msra.mxu0 %v4396_v58  ;;  %5031 = vmatpush1.bf16.msra.mxu1 %v4398_v53  ;;  %v4485_v58 = vld [vmem:[#allocation2 + $0x648] sm:$0xff]  ;;  %v4487_v53 = vld [vmem:[#allocation2 + $0x658] sm:$0xff] }
0x12f0   :  { %4868 = vmatprep.subr.bf16.mxu0 %v4405_v63  ;;  %5032 = vmatprep.subr.bf16.mxu1 %v4407_v50  ;;  %v4484_v63 = vld [vmem:[#allocation2 + $0x640] sm:$0xff]  ;;  %v4486_v50 = vld [vmem:[#allocation2 + $0x650] sm:$0xff] }
0x12f3   :  { %4869 = vmatpush1.bf16.msra.mxu0 %v4404_v44  ;;  %5033 = vmatpush1.bf16.msra.mxu1 %v4406_v9  ;;  %v4493_v44 = vld [vmem:[#allocation2 + $0x688] sm:$0xff]  ;;  %v4495_v9 = vld [vmem:[#allocation2 + $0x698] sm:$0xff] }
0x12f4   :  { %4879 = vmatprep.subr.bf16.mxu0 %v4413_v23  ;;  %5043 = vmatprep.subr.bf16.mxu1 %v4415_v43  ;;  %v4492_v23 = vld [vmem:[#allocation2 + $0x680] sm:$0xff]  ;;  %v4494_v43 = vld [vmem:[#allocation2 + $0x690] sm:$0xff] }
0x12f6   :  { %4871 = vmatmul.mubr.bf16.vlgmr.msra.gmra.mrb[44].mxu0 %v9534_v49  ;;  %5035 = vmatmul.mubr.bf16.vlgmr.msra.gmra.mrb[40].mxu1 %v9534_v49 }
0x12f7   :  { %4880 = vmatpush1.bf16.msra.mxu0 %v4412_v16  ;;  %5044 = vmatpush1.bf16.msra.mxu1 %v4414_v14  ;;  %v4501_v16 = vld [vmem:[#allocation2 + $0x6c8] sm:$0xff]  ;;  %v4503_v14 = vld [vmem:[#allocation2 + $0x6d8] sm:$0xff] }
0x12f8   :  { %4881 = vmatprep.subr.bf16.mxu0 %v4421_v52  ;;  %5045 = vmatprep.subr.bf16.mxu1 %v4423_v18  ;;  %v4500_v52 = vld [vmem:[#allocation2 + $0x6c0] sm:$0xff]  ;;  %v4502_v18 = vld [vmem:[#allocation2 + $0x6d0] sm:$0xff] }
0x12f9   :  { %4911 = vmatprep.mubr.bf16.mxu0 %v9539_v11  ;;  %5075 = vmatprep.mubr.bf16.mxu1 %v9539_v11 }
0x12fb   :  { %4882 = vmatpush1.bf16.msra.mxu0 %v4420_v39  ;;  %5046 = vmatpush1.bf16.msra.mxu1 %v4422_v7  ;;  %v4509_v39 = vld [vmem:[#allocation2 + $0x708] sm:$0xff]  ;;  %v4511_v7 = vld [vmem:[#allocation2 + $0x718] sm:$0xff] }
0x12fc   :  { %4883 = vmatprep.subr.bf16.mxu0 %v4429_v26  ;;  %5047 = vmatprep.subr.bf16.mxu1 %v4431_v6  ;;  %v4508_v26 = vld [vmem:[#allocation2 + $0x700] sm:$0xff]  ;;  %v4510_v6 = vld [vmem:[#allocation2 + $0x710] sm:$0xff] }
0x12ff   :  { %4884 = vmatpush1.bf16.msra.mxu0 %v4428_v59  ;;  %5048 = vmatpush1.bf16.msra.mxu1 %v4430_v61  ;;  %v4517_v59 = vld [vmem:[#allocation2 + $0x748] sm:$0xff]  ;;  %v4519_v61 = vld [vmem:[#allocation2 + $0x758] sm:$0xff] }
0x1300   :  { %4885 = vmatprep.subr.bf16.mxu0 %v4437_v51  ;;  %5049 = vmatprep.subr.bf16.mxu1 %v4439_v60  ;;  %v4516_v51 = vld [vmem:[#allocation2 + $0x740] sm:$0xff]  ;;  %v4518_v60 = vld [vmem:[#allocation2 + $0x750] sm:$0xff] }
0x1303   :  { %4886 = vmatpush1.bf16.msra.mxu0 %v4436_v30  ;;  %5050 = vmatpush1.bf16.msra.mxu1 %v4438_v35  ;;  %v4525_v30 = vld [vmem:[#allocation2 + $0x788] sm:$0xff]  ;;  %v4527_v35 = vld [vmem:[#allocation2 + $0x798] sm:$0xff] }
0x1304   :  { %4887 = vmatprep.subr.bf16.mxu0 %v4445_v17  ;;  %5051 = vmatprep.subr.bf16.mxu1 %v4447_v20  ;;  %v4524_v17 = vld [vmem:[#allocation2 + $0x780] sm:$0xff]  ;;  %v4526_v20 = vld [vmem:[#allocation2 + $0x790] sm:$0xff] }
0x1307   :  { %4888 = vmatpush1.bf16.msra.mxu0 %v4444_v4  ;;  %5052 = vmatpush1.bf16.msra.mxu1 %v4446_v1  ;;  %v4533_v4 = vld [vmem:[#allocation2 + $0x7c8] sm:$0xff]  ;;  %v4535_v1 = vld [vmem:[#allocation2 + $0x7d8] sm:$0xff] }
0x1308   :  { %4889 = vmatprep.subr.bf16.mxu0 %v4453_v5  ;;  %5053 = vmatprep.subr.bf16.mxu1 %v4455_v22  ;;  %v4532_v5 = vld [vmem:[#allocation2 + $0x7c0] sm:$0xff]  ;;  %v4534_v22 = vld [vmem:[#allocation2 + $0x7d0] sm:$0xff] }
0x130b   :  { %4890 = vmatpush1.bf16.msra.mxu0 %v4452_v3  ;;  %5054 = vmatpush1.bf16.msra.mxu1 %v4454_v56  ;;  %v4541_v3 = vld [vmem:[#allocation2 + $0x808] sm:$0xff]  ;;  %v4543_v56 = vld [vmem:[#allocation2 + $0x818] sm:$0xff] }
0x130c   :  { %4891 = vmatprep.subr.bf16.mxu0 %v4461_v41  ;;  %5055 = vmatprep.subr.bf16.mxu1 %v4463_v62  ;;  %v9548_v41 = vpack.c.bf16 %v4266_v38, %v4266_v38  ;;  %v4540_v62 = vld [vmem:[#allocation2 + $0x800] sm:$0xff]  ;;  %v4550_v38 = vld [vmem:[#allocation2 + $0x850] sm:$0xff] }
0x130f   :  { %4892 = vmatpush1.bf16.msra.mxu0 %v4460_v48  ;;  %5056 = vmatpush1.bf16.msra.mxu1 %v4462_v54  ;;  %v4542_v48 = vld [vmem:[#allocation2 + $0x810] sm:$0xff]  ;;  %v4549_v54 = vld [vmem:[#allocation2 + $0x848] sm:$0xff] }
0x1310   :  { %4893 = vmatprep.subr.bf16.mxu0 %v4469_v13  ;;  %5057 = vmatprep.subr.bf16.mxu1 %v4471_v8  ;;  %v4551_v13 = vld [vmem:[#allocation2 + $0x858] sm:$0xff]  ;;  %v9553_v8 = vpack.c.bf16 %v4269_v34, %v4269_v34  ;;  %v4558_v34 = vld [vmem:[#allocation2 + $0x890] sm:$0xff] }
0x1313   :  { %4894 = vmatpush1.bf16.msra.mxu0 %v4468_v29  ;;  %5058 = vmatpush1.bf16.msra.mxu1 %v4470_v46  ;;  %v4557_v29 = vld [vmem:[#allocation2 + $0x888] sm:$0xff]  ;;  %v4559_v46 = vld [vmem:[#allocation2 + $0x898] sm:$0xff] }
0x1314   :  { %4895 = vmatprep.subr.bf16.mxu0 %v4477_v40  ;;  %5059 = vmatprep.subr.bf16.mxu1 %v4479_v42  ;;  %v4565_v40 = vld [vmem:[#allocation2 + $0x8c8] sm:$0xff]  ;;  %v4567_v42 = vld [vmem:[#allocation2 + $0x8d8] sm:$0xff] }
0x1317   :  { %4896 = vmatpush1.bf16.msra.mxu0 %v4476_v55  ;;  %5060 = vmatpush1.bf16.msra.mxu1 %v4478_v24  ;;  %v4564_v55 = vld [vmem:[#allocation2 + $0x8c0] sm:$0xff]  ;;  %v4566_v24 = vld [vmem:[#allocation2 + $0x8d0] sm:$0xff] }
0x1318   :  { %4897 = vmatprep.subr.bf16.mxu0 %v4485_v58  ;;  %5061 = vmatprep.subr.bf16.mxu1 %v4487_v53  ;;  %v4573_v58 = vld [vmem:[#allocation2 + $0x908] sm:$0xff]  ;;  %v4575_v53 = vld [vmem:[#allocation2 + $0x918] sm:$0xff] }
0x131b   :  { %4898 = vmatpush1.bf16.msra.mxu0 %v4484_v63  ;;  %5062 = vmatpush1.bf16.msra.mxu1 %v4486_v50  ;;  %v4572_v63 = vld [vmem:[#allocation2 + $0x900] sm:$0xff]  ;;  %v4574_v50 = vld [vmem:[#allocation2 + $0x910] sm:$0xff] }
0x131c   :  { %4899 = vmatprep.subr.bf16.mxu0 %v4493_v44  ;;  %5063 = vmatprep.subr.bf16.mxu1 %v4495_v9  ;;  %v4581_v44 = vld [vmem:[#allocation2 + $0x948] sm:$0xff]  ;;  %v4583_v9 = vld [vmem:[#allocation2 + $0x958] sm:$0xff] }
0x131f   :  { %4900 = vmatpush1.bf16.msra.mxu0 %v4492_v23  ;;  %5064 = vmatpush1.bf16.msra.mxu1 %v4494_v43  ;;  %v4580_v23 = vld [vmem:[#allocation2 + $0x940] sm:$0xff]  ;;  %v4582_v43 = vld [vmem:[#allocation2 + $0x950] sm:$0xff] }
0x1320   :  { %4901 = vmatprep.subr.bf16.mxu0 %v4501_v16  ;;  %5065 = vmatprep.subr.bf16.mxu1 %v4503_v14  ;;  %v4589_v16 = vld [vmem:[#allocation2 + $0x988] sm:$0xff]  ;;  %v4591_v14 = vld [vmem:[#allocation2 + $0x998] sm:$0xff] }
0x1323   :  { %4902 = vmatpush1.bf16.msra.mxu0 %v4500_v52  ;;  %5066 = vmatpush1.bf16.msra.mxu1 %v4502_v18  ;;  %v4588_v52 = vld [vmem:[#allocation2 + $0x980] sm:$0xff]  ;;  %v4590_v18 = vld [vmem:[#allocation2 + $0x990] sm:$0xff] }
0x1324   :  { %4903 = vmatprep.subr.bf16.mxu0 %v4509_v39  ;;  %5067 = vmatprep.subr.bf16.mxu1 %v4511_v7  ;;  %v4597_v39 = vld [vmem:[#allocation2 + $0x9c8] sm:$0xff]  ;;  %v4599_v7 = vld [vmem:[#allocation2 + $0x9d8] sm:$0xff] }
0x1327   :  { %4904 = vmatpush1.bf16.msra.mxu0 %v4508_v26  ;;  %5068 = vmatpush1.bf16.msra.mxu1 %v4510_v6  ;;  %v4596_v26 = vld [vmem:[#allocation2 + $0x9c0] sm:$0xff]  ;;  %v4598_v6 = vld [vmem:[#allocation2 + $0x9d0] sm:$0xff] }
0x1328   :  { %4905 = vmatprep.subr.bf16.mxu0 %v4517_v59  ;;  %5069 = vmatprep.subr.bf16.mxu1 %v4519_v61  ;;  %v4605_v59 = vld [vmem:[#allocation2 + $0xa08] sm:$0xff]  ;;  %v4607_v61 = vld [vmem:[#allocation2 + $0xa18] sm:$0xff] }
0x132b   :  { %4906 = vmatpush1.bf16.msra.mxu0 %v4516_v51  ;;  %5070 = vmatpush1.bf16.msra.mxu1 %v4518_v60  ;;  %v4604_v51 = vld [vmem:[#allocation2 + $0xa00] sm:$0xff]  ;;  %v4606_v60 = vld [vmem:[#allocation2 + $0xa10] sm:$0xff] }
0x132c   :  { %4907 = vmatprep.subr.bf16.mxu0 %v4525_v30  ;;  %5071 = vmatprep.subr.bf16.mxu1 %v4527_v35  ;;  %v4613_v30 = vld [vmem:[#allocation2 + $0xa48] sm:$0xff]  ;;  %v4615_v35 = vld [vmem:[#allocation2 + $0xa58] sm:$0xff] }
0x132f   :  { %4908 = vmatpush1.bf16.msra.mxu0 %v4524_v17  ;;  %5072 = vmatpush1.bf16.msra.mxu1 %v4526_v20  ;;  %v4612_v17 = vld [vmem:[#allocation2 + $0xa40] sm:$0xff]  ;;  %v4614_v20 = vld [vmem:[#allocation2 + $0xa50] sm:$0xff] }
0x1330   :  { %4909 = vmatprep.subr.bf16.mxu0 %v4533_v4  ;;  %5073 = vmatprep.subr.bf16.mxu1 %v4535_v1  ;;  %v4621_v4 = vld [vmem:[#allocation2 + $0xa88] sm:$0xff]  ;;  %v4623_v1 = vld [vmem:[#allocation2 + $0xa98] sm:$0xff] }
0x1333   :  { %4910 = vmatpush1.bf16.msra.mxu0 %v4532_v5  ;;  %5074 = vmatpush1.bf16.msra.mxu1 %v4534_v22  ;;  %v4620_v5 = vld [vmem:[#allocation2 + $0xa80] sm:$0xff]  ;;  %v4622_v22 = vld [vmem:[#allocation2 + $0xa90] sm:$0xff] }
0x1334   :  { %4920 = vmatprep.subr.bf16.mxu0 %v4541_v3  ;;  %5084 = vmatprep.subr.bf16.mxu1 %v4543_v56  ;;  %v4629_v3 = vld [vmem:[#allocation2 + $0xac8] sm:$0xff]  ;;  %v4631_v56 = vld [vmem:[#allocation2 + $0xad8] sm:$0xff] }
0x1336   :  { %4912 = vmatmul.mubr.bf16.vlgmr.msra.gmra.mrb[44].mxu0 %v9548_v41  ;;  %5076 = vmatmul.mubr.bf16.vlgmr.msra.gmra.mrb[40].mxu1 %v9548_v41 }
0x1337   :  { %4921 = vmatpush1.bf16.msra.mxu0 %v4540_v62  ;;  %5085 = vmatpush1.bf16.msra.mxu1 %v4542_v48  ;;  %v4628_v62 = vld [vmem:[#allocation2 + $0xac0] sm:$0xff]  ;;  %v4630_v48 = vld [vmem:[#allocation2 + $0xad0] sm:$0xff] }
0x1338   :  { %4922 = vmatprep.subr.bf16.mxu0 %v4549_v54  ;;  %5086 = vmatprep.subr.bf16.mxu1 %v4551_v13  ;;  %v4637_v54 = vld [vmem:[#allocation2 + $0xb08] sm:$0xff]  ;;  %v4639_v13 = vld [vmem:[#allocation2 + $0xb18] sm:$0xff] }
0x1339   :  { %4952 = vmatprep.mubr.bf16.mxu0 %v9553_v8  ;;  %5116 = vmatprep.mubr.bf16.mxu1 %v9553_v8 }
0x133b   :  { %4923 = vmatpush1.bf16.msra.mxu0 %v4548_v15  ;;  %5087 = vmatpush1.bf16.msra.mxu1 %v4550_v38  ;;  %v4636_v15 = vld [vmem:[#allocation2 + $0xb00] sm:$0xff]  ;;  %v4638_v38 = vld [vmem:[#allocation2 + $0xb10] sm:$0xff] }
0x133c   :  { %4924 = vmatprep.subr.bf16.mxu0 %v4557_v29  ;;  %5088 = vmatprep.subr.bf16.mxu1 %v4559_v46  ;;  %v4645_v29 = vld [vmem:[#allocation2 + $0xb48] sm:$0xff]  ;;  %v4647_v46 = vld [vmem:[#allocation2 + $0xb58] sm:$0xff] }
0x133f   :  { %4925 = vmatpush1.bf16.msra.mxu0 %v4556_v37  ;;  %5089 = vmatpush1.bf16.msra.mxu1 %v4558_v34  ;;  %v4644_v37 = vld [vmem:[#allocation2 + $0xb40] sm:$0xff]  ;;  %v4646_v34 = vld [vmem:[#allocation2 + $0xb50] sm:$0xff] }
0x1340   :  { %4926 = vmatprep.subr.bf16.mxu0 %v4565_v40  ;;  %5090 = vmatprep.subr.bf16.mxu1 %v4567_v42  ;;  %v4653_v40 = vld [vmem:[#allocation2 + $0xb88] sm:$0xff]  ;;  %v4655_v42 = vld [vmem:[#allocation2 + $0xb98] sm:$0xff] }
0x1343   :  { %4927 = vmatpush1.bf16.msra.mxu0 %v4564_v55  ;;  %5091 = vmatpush1.bf16.msra.mxu1 %v4566_v24  ;;  %v4652_v55 = vld [vmem:[#allocation2 + $0xb80] sm:$0xff]  ;;  %v4654_v24 = vld [vmem:[#allocation2 + $0xb90] sm:$0xff] }
0x1344   :  { %4928 = vmatprep.subr.bf16.mxu0 %v4573_v58  ;;  %5092 = vmatprep.subr.bf16.mxu1 %v4575_v53  ;;  %v4661_v58 = vld [vmem:[#allocation2 + $0xbc8] sm:$0xff]  ;;  %v4663_v53 = vld [vmem:[#allocation2 + $0xbd8] sm:$0xff] }
0x1347   :  { %4929 = vmatpush1.bf16.msra.mxu0 %v4572_v63  ;;  %5093 = vmatpush1.bf16.msra.mxu1 %v4574_v50  ;;  %v4660_v63 = vld [vmem:[#allocation2 + $0xbc0] sm:$0xff]  ;;  %v4662_v50 = vld [vmem:[#allocation2 + $0xbd0] sm:$0xff] }
0x1348   :  { %4930 = vmatprep.subr.bf16.mxu0 %v4581_v44  ;;  %5094 = vmatprep.subr.bf16.mxu1 %v4583_v9  ;;  %v4669_v44 = vld [vmem:[#allocation2 + $0xc08] sm:$0xff]  ;;  %v4671_v9 = vld [vmem:[#allocation2 + $0xc18] sm:$0xff] }
0x134b   :  { %4931 = vmatpush1.bf16.msra.mxu0 %v4580_v23  ;;  %5095 = vmatpush1.bf16.msra.mxu1 %v4582_v43  ;;  %v9562_v23 = vpack.c.bf16 %v4268_v47, %v4268_v47  ;;  %v4668_v43 = vld [vmem:[#allocation2 + $0xc00] sm:$0xff]  ;;  %v4678_v47 = vld [vmem:[#allocation2 + $0xc50] sm:$0xff] }
0x134c   :  { %4932 = vmatprep.subr.bf16.mxu0 %v4589_v16  ;;  %5096 = vmatprep.subr.bf16.mxu1 %v4591_v14  ;;  %v4670_v16 = vld [vmem:[#allocation2 + $0xc10] sm:$0xff]  ;;  %v4677_v14 = vld [vmem:[#allocation2 + $0xc48] sm:$0xff] }
0x134f   :  { %4933 = vmatpush1.bf16.msra.mxu0 %v4588_v52  ;;  %5097 = vmatpush1.bf16.msra.mxu1 %v4590_v18  ;;  %v4679_v52 = vld [vmem:[#allocation2 + $0xc58] sm:$0xff]  ;;  %v9567_v18 = vpack.c.bf16 %v4271_v57, %v4271_v57  ;;  %v4686_v57 = vld [vmem:[#allocation2 + $0xc90] sm:$0xff] }
0x1350   :  { %4934 = vmatprep.subr.bf16.mxu0 %v4597_v39  ;;  %5098 = vmatprep.subr.bf16.mxu1 %v4599_v7  ;;  %v4685_v39 = vld [vmem:[#allocation2 + $0xc88] sm:$0xff]  ;;  %v4687_v7 = vld [vmem:[#allocation2 + $0xc98] sm:$0xff] }
0x1353   :  { %4935 = vmatpush1.bf16.msra.mxu0 %v4596_v26  ;;  %5099 = vmatpush1.bf16.msra.mxu1 %v4598_v6  ;;  %v4693_v26 = vld [vmem:[#allocation2 + $0xcc8] sm:$0xff]  ;;  %v4695_v6 = vld [vmem:[#allocation2 + $0xcd8] sm:$0xff] }
0x1354   :  { %4936 = vmatprep.subr.bf16.mxu0 %v4605_v59  ;;  %5100 = vmatprep.subr.bf16.mxu1 %v4607_v61  ;;  %v4692_v59 = vld [vmem:[#allocation2 + $0xcc0] sm:$0xff]  ;;  %v4694_v61 = vld [vmem:[#allocation2 + $0xcd0] sm:$0xff] }
0x1357   :  { %4937 = vmatpush1.bf16.msra.mxu0 %v4604_v51  ;;  %5101 = vmatpush1.bf16.msra.mxu1 %v4606_v60  ;;  %v4701_v51 = vld [vmem:[#allocation2 + $0xd08] sm:$0xff]  ;;  %v4703_v60 = vld [vmem:[#allocation2 + $0xd18] sm:$0xff] }
0x1358   :  { %4938 = vmatprep.subr.bf16.mxu0 %v4613_v30  ;;  %5102 = vmatprep.subr.bf16.mxu1 %v4615_v35  ;;  %v4700_v30 = vld [vmem:[#allocation2 + $0xd00] sm:$0xff]  ;;  %v4702_v35 = vld [vmem:[#allocation2 + $0xd10] sm:$0xff] }
0x135b   :  { %4939 = vmatpush1.bf16.msra.mxu0 %v4612_v17  ;;  %5103 = vmatpush1.bf16.msra.mxu1 %v4614_v20  ;;  %v4709_v17 = vld [vmem:[#allocation2 + $0xd48] sm:$0xff]  ;;  %v4711_v20 = vld [vmem:[#allocation2 + $0xd58] sm:$0xff] }
0x135c   :  { %4940 = vmatprep.subr.bf16.mxu0 %v4621_v4  ;;  %5104 = vmatprep.subr.bf16.mxu1 %v4623_v1  ;;  %v4708_v4 = vld [vmem:[#allocation2 + $0xd40] sm:$0xff]  ;;  %v4710_v1 = vld [vmem:[#allocation2 + $0xd50] sm:$0xff] }
0x135f   :  { %4941 = vmatpush1.bf16.msra.mxu0 %v4620_v5  ;;  %5105 = vmatpush1.bf16.msra.mxu1 %v4622_v22  ;;  %v4717_v5 = vld [vmem:[#allocation2 + $0xd88] sm:$0xff]  ;;  %v4719_v22 = vld [vmem:[#allocation2 + $0xd98] sm:$0xff] }
0x1360   :  { %4942 = vmatprep.subr.bf16.mxu0 %v4629_v3  ;;  %5106 = vmatprep.subr.bf16.mxu1 %v4631_v56  ;;  %v4716_v3 = vld [vmem:[#allocation2 + $0xd80] sm:$0xff]  ;;  %v4718_v56 = vld [vmem:[#allocation2 + $0xd90] sm:$0xff] }
0x1363   :  { %4943 = vmatpush1.bf16.msra.mxu0 %v4628_v62  ;;  %5107 = vmatpush1.bf16.msra.mxu1 %v4630_v48  ;;  %v4725_v62 = vld [vmem:[#allocation2 + $0xdc8] sm:$0xff]  ;;  %v4727_v48 = vld [vmem:[#allocation2 + $0xdd8] sm:$0xff] }
0x1364   :  { %4944 = vmatprep.subr.bf16.mxu0 %v4637_v54  ;;  %5108 = vmatprep.subr.bf16.mxu1 %v4639_v13  ;;  %v4724_v54 = vld [vmem:[#allocation2 + $0xdc0] sm:$0xff]  ;;  %v4726_v13 = vld [vmem:[#allocation2 + $0xdd0] sm:$0xff] }
0x1367   :  { %4945 = vmatpush1.bf16.msra.mxu0 %v4636_v15  ;;  %5109 = vmatpush1.bf16.msra.mxu1 %v4638_v38  ;;  %v4733_v15 = vld [vmem:[#allocation2 + $0xe08] sm:$0xff]  ;;  %v4735_v38 = vld [vmem:[#allocation2 + $0xe18] sm:$0xff] }
0x1368   :  { %4946 = vmatprep.subr.bf16.mxu0 %v4645_v29  ;;  %5110 = vmatprep.subr.bf16.mxu1 %v4647_v46  ;;  %v4732_v29 = vld [vmem:[#allocation2 + $0xe00] sm:$0xff]  ;;  %v4734_v46 = vld [vmem:[#allocation2 + $0xe10] sm:$0xff] }
0x136b   :  { %4947 = vmatpush1.bf16.msra.mxu0 %v4644_v37  ;;  %5111 = vmatpush1.bf16.msra.mxu1 %v4646_v34  ;;  %v4741_v37 = vld [vmem:[#allocation2 + $0xe48] sm:$0xff]  ;;  %v4743_v34 = vld [vmem:[#allocation2 + $0xe58] sm:$0xff] }
0x136c   :  { %4948 = vmatprep.subr.bf16.mxu0 %v4653_v40  ;;  %5112 = vmatprep.subr.bf16.mxu1 %v4655_v42  ;;  %v4740_v40 = vld [vmem:[#allocation2 + $0xe40] sm:$0xff]  ;;  %v4742_v42 = vld [vmem:[#allocation2 + $0xe50] sm:$0xff] }
0x136f   :  { %4949 = vmatpush1.bf16.msra.mxu0 %v4652_v55  ;;  %5113 = vmatpush1.bf16.msra.mxu1 %v4654_v24  ;;  %v4749_v55 = vld [vmem:[#allocation2 + $0xe88] sm:$0xff]  ;;  %v4751_v24 = vld [vmem:[#allocation2 + $0xe98] sm:$0xff] }
0x1370   :  { %4950 = vmatprep.subr.bf16.mxu0 %v4661_v58  ;;  %5114 = vmatprep.subr.bf16.mxu1 %v4663_v53  ;;  %v4748_v58 = vld [vmem:[#allocation2 + $0xe80] sm:$0xff]  ;;  %v4750_v53 = vld [vmem:[#allocation2 + $0xe90] sm:$0xff] }
0x1373   :  { %4951 = vmatpush1.bf16.msra.mxu0 %v4660_v63  ;;  %5115 = vmatpush1.bf16.msra.mxu1 %v4662_v50  ;;  %v4757_v63 = vld [vmem:[#allocation2 + $0xec8] sm:$0xff]  ;;  %v4759_v50 = vld [vmem:[#allocation2 + $0xed8] sm:$0xff] }
0x1374   :  { %4961 = vmatprep.subr.bf16.mxu0 %v4669_v44  ;;  %5125 = vmatprep.subr.bf16.mxu1 %v4671_v9  ;;  %v4756_v44 = vld [vmem:[#allocation2 + $0xec0] sm:$0xff]  ;;  %v4758_v9 = vld [vmem:[#allocation2 + $0xed0] sm:$0xff] }
0x1376   :  { %4953 = vmatmul.mubr.bf16.vlgmr.msra.gmra.mrb[44].mxu0 %v9562_v23  ;;  %5117 = vmatmul.mubr.bf16.vlgmr.msra.gmra.mrb[40].mxu1 %v9562_v23 }
0x1377   :  { %4962 = vmatpush1.bf16.msra.mxu0 %v4668_v43  ;;  %5126 = vmatpush1.bf16.msra.mxu1 %v4670_v16  ;;  %v4765_v43 = vld [vmem:[#allocation2 + $0xf08] sm:$0xff]  ;;  %v4767_v16 = vld [vmem:[#allocation2 + $0xf18] sm:$0xff] }
0x1378   :  { %4963 = vmatprep.subr.bf16.mxu0 %v4677_v14  ;;  %5127 = vmatprep.subr.bf16.mxu1 %v4679_v52  ;;  %v4764_v14 = vld [vmem:[#allocation2 + $0xf00] sm:$0xff]  ;;  %v4766_v52 = vld [vmem:[#allocation2 + $0xf10] sm:$0xff] }
0x1379   :  { %4993 = vmatprep.mubr.bf16.mxu0 %v9567_v18  ;;  %5157 = vmatprep.mubr.bf16.mxu1 %v9567_v18 }
0x137b   :  { %4964 = vmatpush1.bf16.msra.mxu0 %v4676_v27  ;;  %5128 = vmatpush1.bf16.msra.mxu1 %v4678_v47  ;;  %v4773_v27 = vld [vmem:[#allocation2 + $0xf48] sm:$0xff]  ;;  %v4775_v47 = vld [vmem:[#allocation2 + $0xf58] sm:$0xff] }
0x137c   :  { %4965 = vmatprep.subr.bf16.mxu0 %v4685_v39  ;;  %5129 = vmatprep.subr.bf16.mxu1 %v4687_v7  ;;  %v4772_v39 = vld [vmem:[#allocation2 + $0xf40] sm:$0xff]  ;;  %v4774_v7 = vld [vmem:[#allocation2 + $0xf50] sm:$0xff] }
0x137f   :  { %4966 = vmatpush1.bf16.msra.mxu0 %v4684_v12  ;;  %5130 = vmatpush1.bf16.msra.mxu1 %v4686_v57  ;;  %v4781_v12 = vld [vmem:[#allocation2 + $0xf88] sm:$0xff]  ;;  %v4783_v57 = vld [vmem:[#allocation2 + $0xf98] sm:$0xff] }
0x1380   :  { %4967 = vmatprep.subr.bf16.mxu0 %v4693_v26  ;;  %5131 = vmatprep.subr.bf16.mxu1 %v4695_v6  ;;  %v4780_v26 = vld [vmem:[#allocation2 + $0xf80] sm:$0xff]  ;;  %v4782_v6 = vld [vmem:[#allocation2 + $0xf90] sm:$0xff] }
0x1383   :  { %4968 = vmatpush1.bf16.msra.mxu0 %v4692_v59  ;;  %5132 = vmatpush1.bf16.msra.mxu1 %v4694_v61  ;;  %v4789_v59 = vld [vmem:[#allocation2 + $0xfc8] sm:$0xff]  ;;  %v4791_v61 = vld [vmem:[#allocation2 + $0xfd8] sm:$0xff] }
0x1384   :  { %4969 = vmatprep.subr.bf16.mxu0 %v4701_v51  ;;  %5133 = vmatprep.subr.bf16.mxu1 %v4703_v60  ;;  %v4788_v51 = vld [vmem:[#allocation2 + $0xfc0] sm:$0xff]  ;;  %v4790_v60 = vld [vmem:[#allocation2 + $0xfd0] sm:$0xff] }
0x1387   :  { %4970 = vmatpush1.bf16.msra.mxu0 %v4700_v30  ;;  %5134 = vmatpush1.bf16.msra.mxu1 %v4702_v35  ;;  %v4289_v30 = vld [vmem:[#allocation2 + $0x28] sm:$0xff]  ;;  %v4291_v35 = vld [vmem:[#allocation2 + $0x38] sm:$0xff] }
0x1388   :  { %4971 = vmatprep.subr.bf16.mxu0 %v4709_v17  ;;  %5135 = vmatprep.subr.bf16.mxu1 %v4711_v20  ;;  %v9576_v17 = vpack.c.bf16 %v4270_v0, %v4270_v0  ;;  %v4288_v20 = vld [vmem:[#allocation2 + $0x20] sm:$0xff]  ;;  %v4305_v0 = vld [vmem:[#allocation2 + $0xa8] sm:$0xff] }
0x138b   :  { %4972 = vmatpush1.bf16.msra.mxu0 %v4708_v4  ;;  %5136 = vmatpush1.bf16.msra.mxu1 %v4710_v1  ;;  %v4290_v4 = vld [vmem:[#allocation2 + $0x30] sm:$0xff]  ;;  %v4297_v1 = vld [vmem:[#allocation2 + $0x68] sm:$0xff] }
0x138c   :  { %4973 = vmatprep.subr.bf16.mxu0 %v4717_v5  ;;  %5137 = vmatprep.subr.bf16.mxu1 %v4719_v22  ;;  %v4299_v5 = vld [vmem:[#allocation2 + $0x78] sm:$0xff]  ;;  %v4298_v22 = vld [vmem:[#allocation2 + $0x70] sm:$0xff] }
0x138f   :  { %4974 = vmatpush1.bf16.msra.mxu0 %v4716_v3  ;;  %5138 = vmatpush1.bf16.msra.mxu1 %v4718_v56  ;;  %v4307_v3 = vld [vmem:[#allocation2 + $0xb8] sm:$0xff]  ;;  %v4304_v56 = vld [vmem:[#allocation2 + $0xa0] sm:$0xff] }
0x1390   :  { %4975 = vmatprep.subr.bf16.mxu0 %v4725_v62  ;;  %5139 = vmatprep.subr.bf16.mxu1 %v4727_v48  ;;  %v4306_v62 = vld [vmem:[#allocation2 + $0xb0] sm:$0xff]  ;;  %v4313_v48 = vld [vmem:[#allocation2 + $0xe8] sm:$0xff] }
0x1393   :  { %4976 = vmatpush1.bf16.msra.mxu0 %v4724_v54  ;;  %5140 = vmatpush1.bf16.msra.mxu1 %v4726_v13  ;;  %v4315_v54 = vld [vmem:[#allocation2 + $0xf8] sm:$0xff]  ;;  %v4312_v13 = vld [vmem:[#allocation2 + $0xe0] sm:$0xff] }
0x1394   :  { %4977 = vmatprep.subr.bf16.mxu0 %v4733_v15  ;;  %5141 = vmatprep.subr.bf16.mxu1 %v4735_v38  ;;  %v4314_v15 = vld [vmem:[#allocation2 + $0xf0] sm:$0xff]  ;;  %v4321_v38 = vld [vmem:[#allocation2 + $0x128] sm:$0xff] }
0x1397   :  { %4978 = vmatpush1.bf16.msra.mxu0 %v4732_v29  ;;  %5142 = vmatpush1.bf16.msra.mxu1 %v4734_v46  ;;  %v4323_v29 = vld [vmem:[#allocation2 + $0x138] sm:$0xff]  ;;  %v4322_v46 = vld [vmem:[#allocation2 + $0x130] sm:$0xff] }
0x1398   :  { %4979 = vmatprep.subr.bf16.mxu0 %v4741_v37  ;;  %5143 = vmatprep.subr.bf16.mxu1 %v4743_v34  ;;  %v4329_v37 = vld [vmem:[#allocation2 + $0x168] sm:$0xff]  ;;  %v4331_v34 = vld [vmem:[#allocation2 + $0x178] sm:$0xff] }
0x139b   :  { %4980 = vmatpush1.bf16.msra.mxu0 %v4740_v40  ;;  %5144 = vmatpush1.bf16.msra.mxu1 %v4742_v42  ;;  %v4328_v40 = vld [vmem:[#allocation2 + $0x160] sm:$0xff]  ;;  %v4330_v42 = vld [vmem:[#allocation2 + $0x170] sm:$0xff] }
0x139c   :  { %4981 = vmatprep.subr.bf16.mxu0 %v4749_v55  ;;  %5145 = vmatprep.subr.bf16.mxu1 %v4751_v24  ;;  %v4337_v55 = vld [vmem:[#allocation2 + $0x1a8] sm:$0xff]  ;;  %v4339_v24 = vld [vmem:[#allocation2 + $0x1b8] sm:$0xff] }
0x139f   :  { %4982 = vmatpush1.bf16.msra.mxu0 %v4748_v58  ;;  %5146 = vmatpush1.bf16.msra.mxu1 %v4750_v53  ;;  %v4336_v58 = vld [vmem:[#allocation2 + $0x1a0] sm:$0xff]  ;;  %v4338_v53 = vld [vmem:[#allocation2 + $0x1b0] sm:$0xff] }
0x13a0   :  { %4983 = vmatprep.subr.bf16.mxu0 %v4757_v63  ;;  %5147 = vmatprep.subr.bf16.mxu1 %v4759_v50  ;;  %v4345_v63 = vld [vmem:[#allocation2 + $0x1e8] sm:$0xff]  ;;  %v4347_v50 = vld [vmem:[#allocation2 + $0x1f8] sm:$0xff] }
0x13a3   :  { %4984 = vmatpush1.bf16.msra.mxu0 %v4756_v44  ;;  %5148 = vmatpush1.bf16.msra.mxu1 %v4758_v9  ;;  %v4344_v44 = vld [vmem:[#allocation2 + $0x1e0] sm:$0xff]  ;;  %v4346_v9 = vld [vmem:[#allocation2 + $0x1f0] sm:$0xff] }
0x13a4   :  { %4985 = vmatprep.subr.bf16.mxu0 %v4765_v43  ;;  %5149 = vmatprep.subr.bf16.mxu1 %v4767_v16  ;;  %v4353_v43 = vld [vmem:[#allocation2 + $0x228] sm:$0xff]  ;;  %v4355_v16 = vld [vmem:[#allocation2 + $0x238] sm:$0xff] }
0x13a7   :  { %4986 = vmatpush1.bf16.msra.mxu0 %v4764_v14  ;;  %5150 = vmatpush1.bf16.msra.mxu1 %v4766_v52  ;;  %v4352_v14 = vld [vmem:[#allocation2 + $0x220] sm:$0xff]  ;;  %v4354_v52 = vld [vmem:[#allocation2 + $0x230] sm:$0xff] }
0x13a8   :  { %4987 = vmatprep.subr.bf16.mxu0 %v4773_v27  ;;  %5151 = vmatprep.subr.bf16.mxu1 %v4775_v47  ;;  %v4361_v27 = vld [vmem:[#allocation2 + $0x268] sm:$0xff]  ;;  %v4363_v47 = vld [vmem:[#allocation2 + $0x278] sm:$0xff] }
0x13ab   :  { %4988 = vmatpush1.bf16.msra.mxu0 %v4772_v39  ;;  %5152 = vmatpush1.bf16.msra.mxu1 %v4774_v7  ;;  %v4360_v39 = vld [vmem:[#allocation2 + $0x260] sm:$0xff]  ;;  %v4362_v7 = vld [vmem:[#allocation2 + $0x270] sm:$0xff] }
0x13ac   :  { %4989 = vmatprep.subr.bf16.mxu0 %v4781_v12  ;;  %5153 = vmatprep.subr.bf16.mxu1 %v4783_v57  ;;  %v4369_v12 = vld [vmem:[#allocation2 + $0x2a8] sm:$0xff]  ;;  %v4371_v57 = vld [vmem:[#allocation2 + $0x2b8] sm:$0xff] }
0x13af   :  { %4990 = vmatpush1.bf16.msra.mxu0 %v4780_v26  ;;  %5154 = vmatpush1.bf16.msra.mxu1 %v4782_v6  ;;  %v4368_v26 = vld [vmem:[#allocation2 + $0x2a0] sm:$0xff]  ;;  %v4370_v6 = vld [vmem:[#allocation2 + $0x2b0] sm:$0xff] }
0x13b0   :  { %4991 = vmatprep.subr.bf16.mxu0 %v4789_v59  ;;  %5155 = vmatprep.subr.bf16.mxu1 %v4791_v61  ;;  %v4377_v59 = vld [vmem:[#allocation2 + $0x2e8] sm:$0xff]  ;;  %v4379_v61 = vld [vmem:[#allocation2 + $0x2f8] sm:$0xff] }
0x13b3   :  { %4992 = vmatpush1.bf16.msra.mxu0 %v4788_v51  ;;  %5156 = vmatpush1.bf16.msra.mxu1 %v4790_v60  ;;  %v4376_v51 = vld [vmem:[#allocation2 + $0x2e0] sm:$0xff]  ;;  %v4378_v60 = vld [vmem:[#allocation2 + $0x2f0] sm:$0xff] }
0x13b4   :  { %5166 = vmatprep.subr.bf16.mxu0 %v4289_v30  ;;  %5330 = vmatprep.subr.bf16.mxu1 %v4291_v35  ;;  %v4385_v30 = vld [vmem:[#allocation2 + $0x328] sm:$0xff]  ;;  %v4387_v35 = vld [vmem:[#allocation2 + $0x338] sm:$0xff] }
0x13b6   :  { %4994 = vmatmul.mubr.bf16.vlgmr.msra.gmra.mrb[44].mxu0 %v9576_v17  ;;  %5158 = vmatmul.mubr.bf16.vlgmr.msra.gmra.mrb[40].mxu1 %v9576_v17 }
0x13b7   :  { %5167 = vmatpush1.bf16.msra.mxu0 %v4288_v20  ;;  %5331 = vmatpush1.bf16.msra.mxu1 %v4290_v4  ;;  %v4384_v20 = vld [vmem:[#allocation2 + $0x320] sm:$0xff]  ;;  %v4386_v4 = vld [vmem:[#allocation2 + $0x330] sm:$0xff] }
0x13b8   :  { %5168 = vmatprep.subr.bf16.mxu0 %v4297_v1  ;;  %5332 = vmatprep.subr.bf16.mxu1 %v4299_v5  ;;  %v4393_v1 = vld [vmem:[#allocation2 + $0x368] sm:$0xff]  ;;  %v4395_v5 = vld [vmem:[#allocation2 + $0x378] sm:$0xff] }
0x13b9   :  { %5198 = vmatprep.mubr.bf16.mxu0 %v9527_v25  ;;  %5362 = vmatprep.mubr.bf16.mxu1 %v9527_v25  ;;  %v4320_v25 = vld [vmem:[#allocation2 + $0x120] sm:$0xff] }
0x13bb   :  { %5169 = vmatpush1.bf16.msra.mxu0 %v4296_v10  ;;  %5333 = vmatpush1.bf16.msra.mxu1 %v4298_v22  ;;  %v4392_v10 = vld [vmem:[#allocation2 + $0x360] sm:$0xff]  ;;  %v4394_v22 = vld [vmem:[#allocation2 + $0x370] sm:$0xff] }
0x13bc   :  { %5170 = vmatprep.subr.bf16.mxu0 %v4305_v0  ;;  %5334 = vmatprep.subr.bf16.mxu1 %v4307_v3  ;;  %v4401_v0 = vld [vmem:[#allocation2 + $0x3a8] sm:$0xff]  ;;  %v4403_v3 = vld [vmem:[#allocation2 + $0x3b8] sm:$0xff] }
0x13bf   :  { %5171 = vmatpush1.bf16.msra.mxu0 %v4304_v56  ;;  %5335 = vmatpush1.bf16.msra.mxu1 %v4306_v62  ;;  %v4400_v56 = vld [vmem:[#allocation2 + $0x3a0] sm:$0xff]  ;;  %v4402_v62 = vld [vmem:[#allocation2 + $0x3b0] sm:$0xff] }
0x13c0   :  { %5172 = vmatprep.subr.bf16.mxu0 %v4313_v48  ;;  %5336 = vmatprep.subr.bf16.mxu1 %v4315_v54  ;;  %v4409_v48 = vld [vmem:[#allocation2 + $0x3e8] sm:$0xff]  ;;  %v4411_v54 = vld [vmem:[#allocation2 + $0x3f8] sm:$0xff] }
0x13c3   :  { %5173 = vmatpush1.bf16.msra.mxu0 %v4312_v13  ;;  %5337 = vmatpush1.bf16.msra.mxu1 %v4314_v15  ;;  %v4408_v13 = vld [vmem:[#allocation2 + $0x3e0] sm:$0xff]  ;;  %v4410_v15 = vld [vmem:[#allocation2 + $0x3f0] sm:$0xff] }
0x13c4   :  { %5174 = vmatprep.subr.bf16.mxu0 %v4321_v38  ;;  %5338 = vmatprep.subr.bf16.mxu1 %v4323_v29  ;;  %v4417_v38 = vld [vmem:[#allocation2 + $0x428] sm:$0xff]  ;;  %v4419_v29 = vld [vmem:[#allocation2 + $0x438] sm:$0xff] }
0x13c7   :  { %5175 = vmatpush1.bf16.msra.mxu0 %v4320_v25  ;;  %5339 = vmatpush1.bf16.msra.mxu1 %v4322_v46  ;;  %v4416_v25 = vld [vmem:[#allocation2 + $0x420] sm:$0xff]  ;;  %v4418_v46 = vld [vmem:[#allocation2 + $0x430] sm:$0xff] }
0x13c8   :  { %5176 = vmatprep.subr.bf16.mxu0 %v4329_v37  ;;  %5340 = vmatprep.subr.bf16.mxu1 %v4331_v34  ;;  %v4425_v37 = vld [vmem:[#allocation2 + $0x468] sm:$0xff]  ;;  %v4427_v34 = vld [vmem:[#allocation2 + $0x478] sm:$0xff] }
0x13cb   :  { %5177 = vmatpush1.bf16.msra.mxu0 %v4328_v40  ;;  %5341 = vmatpush1.bf16.msra.mxu1 %v4330_v42  ;;  %v4424_v40 = vld [vmem:[#allocation2 + $0x460] sm:$0xff]  ;;  %v4426_v42 = vld [vmem:[#allocation2 + $0x470] sm:$0xff] }
0x13cc   :  { %5178 = vmatprep.subr.bf16.mxu0 %v4337_v55  ;;  %5342 = vmatprep.subr.bf16.mxu1 %v4339_v24  ;;  %v4433_v55 = vld [vmem:[#allocation2 + $0x4a8] sm:$0xff]  ;;  %v4435_v24 = vld [vmem:[#allocation2 + $0x4b8] sm:$0xff] }
0x13cf   :  { %5179 = vmatpush1.bf16.msra.mxu0 %v4336_v58  ;;  %5343 = vmatpush1.bf16.msra.mxu1 %v4338_v53  ;;  %v4432_v58 = vld [vmem:[#allocation2 + $0x4a0] sm:$0xff]  ;;  %v4434_v53 = vld [vmem:[#allocation2 + $0x4b0] sm:$0xff] }
0x13d0   :  { %5180 = vmatprep.subr.bf16.mxu0 %v4345_v63  ;;  %5344 = vmatprep.subr.bf16.mxu1 %v4347_v50  ;;  %v4441_v63 = vld [vmem:[#allocation2 + $0x4e8] sm:$0xff]  ;;  %v4440_v50 = vld [vmem:[#allocation2 + $0x4e0] sm:$0xff] }
0x13d3   :  { %5181 = vmatpush1.bf16.msra.mxu0 %v4344_v44  ;;  %5345 = vmatpush1.bf16.msra.mxu1 %v4346_v9  ;;  %v4442_v44 = vld [vmem:[#allocation2 + $0x4f0] sm:$0xff]  ;;  %v4449_v9 = vld [vmem:[#allocation2 + $0x528] sm:$0xff] }
0x13d4   :  { %5182 = vmatprep.subr.bf16.mxu0 %v4353_v43  ;;  %5346 = vmatprep.subr.bf16.mxu1 %v4355_v16  ;;  %v4451_v43 = vld [vmem:[#allocation2 + $0x538] sm:$0xff]  ;;  %v4450_v16 = vld [vmem:[#allocation2 + $0x530] sm:$0xff] }
0x13d7   :  { %5183 = vmatpush1.bf16.msra.mxu0 %v4352_v14  ;;  %5347 = vmatpush1.bf16.msra.mxu1 %v4354_v52  ;;  %v4457_v14 = vld [vmem:[#allocation2 + $0x568] sm:$0xff]  ;;  %v4459_v52 = vld [vmem:[#allocation2 + $0x578] sm:$0xff] }
0x13d8   :  { %5184 = vmatprep.subr.bf16.mxu0 %v4361_v27  ;;  %5348 = vmatprep.subr.bf16.mxu1 %v4363_v47  ;;  %v4456_v27 = vld [vmem:[#allocation2 + $0x560] sm:$0xff]  ;;  %v4458_v47 = vld [vmem:[#allocation2 + $0x570] sm:$0xff] }
0x13db   :  { %5185 = vmatpush1.bf16.msra.mxu0 %v4360_v39  ;;  %5349 = vmatpush1.bf16.msra.mxu1 %v4362_v7  ;;  %v4465_v39 = vld [vmem:[#allocation2 + $0x5a8] sm:$0xff]  ;;  %v4467_v7 = vld [vmem:[#allocation2 + $0x5b8] sm:$0xff] }
0x13dc   :  { %5186 = vmatprep.subr.bf16.mxu0 %v4369_v12  ;;  %5350 = vmatprep.subr.bf16.mxu1 %v4371_v57  ;;  %v4464_v12 = vld [vmem:[#allocation2 + $0x5a0] sm:$0xff]  ;;  %v4466_v57 = vld [vmem:[#allocation2 + $0x5b0] sm:$0xff] }
0x13df   :  { %5187 = vmatpush1.bf16.msra.mxu0 %v4368_v26  ;;  %5351 = vmatpush1.bf16.msra.mxu1 %v4370_v6  ;;  %v4473_v26 = vld [vmem:[#allocation2 + $0x5e8] sm:$0xff]  ;;  %v4475_v6 = vld [vmem:[#allocation2 + $0x5f8] sm:$0xff] }
0x13e0   :  { %5188 = vmatprep.subr.bf16.mxu0 %v4377_v59  ;;  %5352 = vmatprep.subr.bf16.mxu1 %v4379_v61  ;;  %v4472_v59 = vld [vmem:[#allocation2 + $0x5e0] sm:$0xff]  ;;  %v4474_v61 = vld [vmem:[#allocation2 + $0x5f0] sm:$0xff] }
0x13e3   :  { %5189 = vmatpush1.bf16.msra.mxu0 %v4376_v51  ;;  %5353 = vmatpush1.bf16.msra.mxu1 %v4378_v60  ;;  %v4481_v51 = vld [vmem:[#allocation2 + $0x628] sm:$0xff]  ;;  %v4483_v60 = vld [vmem:[#allocation2 + $0x638] sm:$0xff] }
0x13e4   :  { %5190 = vmatprep.subr.bf16.mxu0 %v4385_v30  ;;  %5354 = vmatprep.subr.bf16.mxu1 %v4387_v35  ;;  %v4480_v30 = vld [vmem:[#allocation2 + $0x620] sm:$0xff]  ;;  %v4482_v35 = vld [vmem:[#allocation2 + $0x630] sm:$0xff] }
0x13e7   :  { %5191 = vmatpush1.bf16.msra.mxu0 %v4384_v20  ;;  %5355 = vmatpush1.bf16.msra.mxu1 %v4386_v4  ;;  %v4489_v20 = vld [vmem:[#allocation2 + $0x668] sm:$0xff]  ;;  %v4491_v4 = vld [vmem:[#allocation2 + $0x678] sm:$0xff] }
0x13e8   :  { %5192 = vmatprep.subr.bf16.mxu0 %v4393_v1  ;;  %5356 = vmatprep.subr.bf16.mxu1 %v4395_v5  ;;  %v4488_v1 = vld [vmem:[#allocation2 + $0x660] sm:$0xff]  ;;  %v4490_v5 = vld [vmem:[#allocation2 + $0x670] sm:$0xff] }
0x13eb   :  { %5193 = vmatpush1.bf16.msra.mxu0 %v4392_v10  ;;  %5357 = vmatpush1.bf16.msra.mxu1 %v4394_v22  ;;  %v4497_v10 = vld [vmem:[#allocation2 + $0x6a8] sm:$0xff]  ;;  %v4499_v22 = vld [vmem:[#allocation2 + $0x6b8] sm:$0xff] }
0x13ec   :  { %5194 = vmatprep.subr.bf16.mxu0 %v4401_v0  ;;  %5358 = vmatprep.subr.bf16.mxu1 %v4403_v3  ;;  %v4496_v0 = vld [vmem:[#allocation2 + $0x6a0] sm:$0xff]  ;;  %v4498_v3 = vld [vmem:[#allocation2 + $0x6b0] sm:$0xff] }
0x13ef   :  { %5195 = vmatpush1.bf16.msra.mxu0 %v4400_v56  ;;  %5359 = vmatpush1.bf16.msra.mxu1 %v4402_v62  ;;  %v4505_v56 = vld [vmem:[#allocation2 + $0x6e8] sm:$0xff]  ;;  %v4507_v62 = vld [vmem:[#allocation2 + $0x6f8] sm:$0xff] }
0x13f0   :  { %5196 = vmatprep.subr.bf16.mxu0 %v4409_v48  ;;  %5360 = vmatprep.subr.bf16.mxu1 %v4411_v54  ;;  %v4504_v48 = vld [vmem:[#allocation2 + $0x6e0] sm:$0xff]  ;;  %v4506_v54 = vld [vmem:[#allocation2 + $0x6f0] sm:$0xff] }
0x13f3   :  { %5197 = vmatpush1.bf16.msra.mxu0 %v4408_v13  ;;  %5361 = vmatpush1.bf16.msra.mxu1 %v4410_v15  ;;  %v4513_v13 = vld [vmem:[#allocation2 + $0x728] sm:$0xff]  ;;  %v4515_v15 = vld [vmem:[#allocation2 + $0x738] sm:$0xff] }
0x13f4   :  { %5207 = vmatprep.subr.bf16.mxu0 %v4417_v38  ;;  %5371 = vmatprep.subr.bf16.mxu1 %v4419_v29  ;;  %v4512_v38 = vld [vmem:[#allocation2 + $0x720] sm:$0xff]  ;;  %v4514_v29 = vld [vmem:[#allocation2 + $0x730] sm:$0xff] }
0x13f6   :  { %5199 = vmatmul.mubr.bf16.vlgmr.msra.gmra.mrb[48].mxu0 %v9534_v49  ;;  %5363 = vmatmul.mubr.bf16.vlgmr.msra.gmra.mrb[44].mxu1 %v9534_v49  ;;  %v4443_v49 = vld [vmem:[#allocation2 + $0x4f8] sm:$0xff] }
0x13f7   :  { %5208 = vmatpush1.bf16.msra.mxu0 %v4416_v25  ;;  %5372 = vmatpush1.bf16.msra.mxu1 %v4418_v46  ;;  %v4521_v25 = vld [vmem:[#allocation2 + $0x768] sm:$0xff]  ;;  %v4523_v46 = vld [vmem:[#allocation2 + $0x778] sm:$0xff] }
0x13f8   :  { %5209 = vmatprep.subr.bf16.mxu0 %v4425_v37  ;;  %5373 = vmatprep.subr.bf16.mxu1 %v4427_v34  ;;  %v4520_v37 = vld [vmem:[#allocation2 + $0x760] sm:$0xff]  ;;  %v4522_v34 = vld [vmem:[#allocation2 + $0x770] sm:$0xff] }
0x13f9   :  { %5239 = vmatprep.mubr.bf16.mxu0 %v9539_v11  ;;  %5403 = vmatprep.mubr.bf16.mxu1 %v9539_v11  ;;  %v4448_v11 = vld [vmem:[#allocation2 + $0x520] sm:$0xff] }
0x13fb   :  { %5210 = vmatpush1.bf16.msra.mxu0 %v4424_v40  ;;  %5374 = vmatpush1.bf16.msra.mxu1 %v4426_v42  ;;  %v4529_v40 = vld [vmem:[#allocation2 + $0x7a8] sm:$0xff]  ;;  %v4531_v42 = vld [vmem:[#allocation2 + $0x7b8] sm:$0xff] }
0x13fc   :  { %5211 = vmatprep.subr.bf16.mxu0 %v4433_v55  ;;  %5375 = vmatprep.subr.bf16.mxu1 %v4435_v24  ;;  %v4528_v55 = vld [vmem:[#allocation2 + $0x7a0] sm:$0xff]  ;;  %v4530_v24 = vld [vmem:[#allocation2 + $0x7b0] sm:$0xff] }
0x13ff   :  { %5212 = vmatpush1.bf16.msra.mxu0 %v4432_v58  ;;  %5376 = vmatpush1.bf16.msra.mxu1 %v4434_v53  ;;  %v4537_v58 = vld [vmem:[#allocation2 + $0x7e8] sm:$0xff]  ;;  %v4539_v53 = vld [vmem:[#allocation2 + $0x7f8] sm:$0xff] }
0x1400   :  { %5213 = vmatprep.subr.bf16.mxu0 %v4441_v63  ;;  %5377 = vmatprep.subr.bf16.mxu1 %v4443_v49  ;;  %v4536_v63 = vld [vmem:[#allocation2 + $0x7e0] sm:$0xff]  ;;  %v4538_v49 = vld [vmem:[#allocation2 + $0x7f0] sm:$0xff] }
0x1403   :  { %5214 = vmatpush1.bf16.msra.mxu0 %v4440_v50  ;;  %5378 = vmatpush1.bf16.msra.mxu1 %v4442_v44  ;;  %v4545_v50 = vld [vmem:[#allocation2 + $0x828] sm:$0xff]  ;;  %v4547_v44 = vld [vmem:[#allocation2 + $0x838] sm:$0xff] }
0x1404   :  { %5215 = vmatprep.subr.bf16.mxu0 %v4449_v9  ;;  %5379 = vmatprep.subr.bf16.mxu1 %v4451_v43  ;;  %v4544_v9 = vld [vmem:[#allocation2 + $0x820] sm:$0xff]  ;;  %v4546_v43 = vld [vmem:[#allocation2 + $0x830] sm:$0xff] }
0x1407   :  { %5216 = vmatpush1.bf16.msra.mxu0 %v4448_v11  ;;  %5380 = vmatpush1.bf16.msra.mxu1 %v4450_v16  ;;  %v4553_v11 = vld [vmem:[#allocation2 + $0x868] sm:$0xff]  ;;  %v4555_v16 = vld [vmem:[#allocation2 + $0x878] sm:$0xff] }
0x1408   :  { %5217 = vmatprep.subr.bf16.mxu0 %v4457_v14  ;;  %5381 = vmatprep.subr.bf16.mxu1 %v4459_v52  ;;  %v4552_v14 = vld [vmem:[#allocation2 + $0x860] sm:$0xff]  ;;  %v4554_v52 = vld [vmem:[#allocation2 + $0x870] sm:$0xff] }
0x140b   :  { %5218 = vmatpush1.bf16.msra.mxu0 %v4456_v27  ;;  %5382 = vmatpush1.bf16.msra.mxu1 %v4458_v47  ;;  %v4561_v27 = vld [vmem:[#allocation2 + $0x8a8] sm:$0xff]  ;;  %v4563_v47 = vld [vmem:[#allocation2 + $0x8b8] sm:$0xff] }
0x140c   :  { %5219 = vmatprep.subr.bf16.mxu0 %v4465_v39  ;;  %5383 = vmatprep.subr.bf16.mxu1 %v4467_v7  ;;  %v4560_v39 = vld [vmem:[#allocation2 + $0x8a0] sm:$0xff]  ;;  %v4562_v7 = vld [vmem:[#allocation2 + $0x8b0] sm:$0xff] }
0x140f   :  { %5220 = vmatpush1.bf16.msra.mxu0 %v4464_v12  ;;  %5384 = vmatpush1.bf16.msra.mxu1 %v4466_v57  ;;  %v4569_v12 = vld [vmem:[#allocation2 + $0x8e8] sm:$0xff]  ;;  %v4568_v57 = vld [vmem:[#allocation2 + $0x8e0] sm:$0xff] }
0x1410   :  { %5221 = vmatprep.subr.bf16.mxu0 %v4473_v26  ;;  %5385 = vmatprep.subr.bf16.mxu1 %v4475_v6  ;;  %v4570_v26 = vld [vmem:[#allocation2 + $0x8f0] sm:$0xff]  ;;  %v4577_v6 = vld [vmem:[#allocation2 + $0x928] sm:$0xff] }
0x1413   :  { %5222 = vmatpush1.bf16.msra.mxu0 %v4472_v59  ;;  %5386 = vmatpush1.bf16.msra.mxu1 %v4474_v61  ;;  %v4579_v59 = vld [vmem:[#allocation2 + $0x938] sm:$0xff]  ;;  %v4578_v61 = vld [vmem:[#allocation2 + $0x930] sm:$0xff] }
0x1414   :  { %5223 = vmatprep.subr.bf16.mxu0 %v4481_v51  ;;  %5387 = vmatprep.subr.bf16.mxu1 %v4483_v60  ;;  %v4585_v51 = vld [vmem:[#allocation2 + $0x968] sm:$0xff]  ;;  %v4587_v60 = vld [vmem:[#allocation2 + $0x978] sm:$0xff] }
0x1417   :  { %5224 = vmatpush1.bf16.msra.mxu0 %v4480_v30  ;;  %5388 = vmatpush1.bf16.msra.mxu1 %v4482_v35  ;;  %v4584_v30 = vld [vmem:[#allocation2 + $0x960] sm:$0xff]  ;;  %v4586_v35 = vld [vmem:[#allocation2 + $0x970] sm:$0xff] }
0x1418   :  { %5225 = vmatprep.subr.bf16.mxu0 %v4489_v20  ;;  %5389 = vmatprep.subr.bf16.mxu1 %v4491_v4  ;;  %v4593_v20 = vld [vmem:[#allocation2 + $0x9a8] sm:$0xff]  ;;  %v4595_v4 = vld [vmem:[#allocation2 + $0x9b8] sm:$0xff] }
0x141b   :  { %5226 = vmatpush1.bf16.msra.mxu0 %v4488_v1  ;;  %5390 = vmatpush1.bf16.msra.mxu1 %v4490_v5  ;;  %v4592_v1 = vld [vmem:[#allocation2 + $0x9a0] sm:$0xff]  ;;  %v4594_v5 = vld [vmem:[#allocation2 + $0x9b0] sm:$0xff] }
0x141c   :  { %5227 = vmatprep.subr.bf16.mxu0 %v4497_v10  ;;  %5391 = vmatprep.subr.bf16.mxu1 %v4499_v22  ;;  %v4601_v10 = vld [vmem:[#allocation2 + $0x9e8] sm:$0xff]  ;;  %v4603_v22 = vld [vmem:[#allocation2 + $0x9f8] sm:$0xff] }
0x141f   :  { %5228 = vmatpush1.bf16.msra.mxu0 %v4496_v0  ;;  %5392 = vmatpush1.bf16.msra.mxu1 %v4498_v3  ;;  %v4600_v0 = vld [vmem:[#allocation2 + $0x9e0] sm:$0xff]  ;;  %v4602_v3 = vld [vmem:[#allocation2 + $0x9f0] sm:$0xff] }
0x1420   :  { %5229 = vmatprep.subr.bf16.mxu0 %v4505_v56  ;;  %5393 = vmatprep.subr.bf16.mxu1 %v4507_v62  ;;  %v4609_v56 = vld [vmem:[#allocation2 + $0xa28] sm:$0xff]  ;;  %v4611_v62 = vld [vmem:[#allocation2 + $0xa38] sm:$0xff] }
0x1423   :  { %5230 = vmatpush1.bf16.msra.mxu0 %v4504_v48  ;;  %5394 = vmatpush1.bf16.msra.mxu1 %v4506_v54  ;;  %v4608_v48 = vld [vmem:[#allocation2 + $0xa20] sm:$0xff]  ;;  %v4610_v54 = vld [vmem:[#allocation2 + $0xa30] sm:$0xff] }
0x1424   :  { %5231 = vmatprep.subr.bf16.mxu0 %v4513_v13  ;;  %5395 = vmatprep.subr.bf16.mxu1 %v4515_v15  ;;  %v4617_v13 = vld [vmem:[#allocation2 + $0xa68] sm:$0xff]  ;;  %v4619_v15 = vld [vmem:[#allocation2 + $0xa78] sm:$0xff] }
0x1427   :  { %5232 = vmatpush1.bf16.msra.mxu0 %v4512_v38  ;;  %5396 = vmatpush1.bf16.msra.mxu1 %v4514_v29  ;;  %v4616_v38 = vld [vmem:[#allocation2 + $0xa60] sm:$0xff]  ;;  %v4618_v29 = vld [vmem:[#allocation2 + $0xa70] sm:$0xff] }
0x1428   :  { %5233 = vmatprep.subr.bf16.mxu0 %v4521_v25  ;;  %5397 = vmatprep.subr.bf16.mxu1 %v4523_v46  ;;  %v4625_v25 = vld [vmem:[#allocation2 + $0xaa8] sm:$0xff]  ;;  %v4627_v46 = vld [vmem:[#allocation2 + $0xab8] sm:$0xff] }
0x142b   :  { %5234 = vmatpush1.bf16.msra.mxu0 %v4520_v37  ;;  %5398 = vmatpush1.bf16.msra.mxu1 %v4522_v34  ;;  %v4624_v37 = vld [vmem:[#allocation2 + $0xaa0] sm:$0xff]  ;;  %v4626_v34 = vld [vmem:[#allocation2 + $0xab0] sm:$0xff] }
0x142c   :  { %5235 = vmatprep.subr.bf16.mxu0 %v4529_v40  ;;  %5399 = vmatprep.subr.bf16.mxu1 %v4531_v42  ;;  %v4633_v40 = vld [vmem:[#allocation2 + $0xae8] sm:$0xff]  ;;  %v4635_v42 = vld [vmem:[#allocation2 + $0xaf8] sm:$0xff] }
0x142f   :  { %5236 = vmatpush1.bf16.msra.mxu0 %v4528_v55  ;;  %5400 = vmatpush1.bf16.msra.mxu1 %v4530_v24  ;;  %v4632_v55 = vld [vmem:[#allocation2 + $0xae0] sm:$0xff]  ;;  %v4634_v24 = vld [vmem:[#allocation2 + $0xaf0] sm:$0xff] }
0x1430   :  { %5237 = vmatprep.subr.bf16.mxu0 %v4537_v58  ;;  %5401 = vmatprep.subr.bf16.mxu1 %v4539_v53  ;;  %v4641_v58 = vld [vmem:[#allocation2 + $0xb28] sm:$0xff]  ;;  %v4643_v53 = vld [vmem:[#allocation2 + $0xb38] sm:$0xff] }
0x1433   :  { %5238 = vmatpush1.bf16.msra.mxu0 %v4536_v63  ;;  %5402 = vmatpush1.bf16.msra.mxu1 %v4538_v49  ;;  %v4640_v63 = vld [vmem:[#allocation2 + $0xb20] sm:$0xff]  ;;  %v4642_v49 = vld [vmem:[#allocation2 + $0xb30] sm:$0xff] }
0x1434   :  { %5248 = vmatprep.subr.bf16.mxu0 %v4545_v50  ;;  %5412 = vmatprep.subr.bf16.mxu1 %v4547_v44  ;;  %v4649_v50 = vld [vmem:[#allocation2 + $0xb68] sm:$0xff]  ;;  %v4651_v44 = vld [vmem:[#allocation2 + $0xb78] sm:$0xff] }
0x1436   :  { %5240 = vmatmul.mubr.bf16.vlgmr.msra.gmra.mrb[48].mxu0 %v9548_v41  ;;  %5404 = vmatmul.mubr.bf16.vlgmr.msra.gmra.mrb[44].mxu1 %v9548_v41  ;;  %v4571_v41 = vld [vmem:[#allocation2 + $0x8f8] sm:$0xff] }
0x1437   :  { %5249 = vmatpush1.bf16.msra.mxu0 %v4544_v9  ;;  %5413 = vmatpush1.bf16.msra.mxu1 %v4546_v43  ;;  %v4648_v9 = vld [vmem:[#allocation2 + $0xb60] sm:$0xff]  ;;  %v4650_v43 = vld [vmem:[#allocation2 + $0xb70] sm:$0xff] }
0x1438   :  { %5250 = vmatprep.subr.bf16.mxu0 %v4553_v11  ;;  %5414 = vmatprep.subr.bf16.mxu1 %v4555_v16  ;;  %v4657_v11 = vld [vmem:[#allocation2 + $0xba8] sm:$0xff]  ;;  %v4659_v16 = vld [vmem:[#allocation2 + $0xbb8] sm:$0xff] }
0x1439   :  { %5280 = vmatprep.mubr.bf16.mxu0 %v9553_v8  ;;  %5444 = vmatprep.mubr.bf16.mxu1 %v9553_v8  ;;  %v4576_v8 = vld [vmem:[#allocation2 + $0x920] sm:$0xff] }
0x143b   :  { %5251 = vmatpush1.bf16.msra.mxu0 %v4552_v14  ;;  %5415 = vmatpush1.bf16.msra.mxu1 %v4554_v52  ;;  %v4656_v14 = vld [vmem:[#allocation2 + $0xba0] sm:$0xff]  ;;  %v4658_v52 = vld [vmem:[#allocation2 + $0xbb0] sm:$0xff] }
0x143c   :  { %5252 = vmatprep.subr.bf16.mxu0 %v4561_v27  ;;  %5416 = vmatprep.subr.bf16.mxu1 %v4563_v47  ;;  %v4665_v27 = vld [vmem:[#allocation2 + $0xbe8] sm:$0xff]  ;;  %v4667_v47 = vld [vmem:[#allocation2 + $0xbf8] sm:$0xff] }
0x143f   :  { %5253 = vmatpush1.bf16.msra.mxu0 %v4560_v39  ;;  %5417 = vmatpush1.bf16.msra.mxu1 %v4562_v7  ;;  %v4664_v39 = vld [vmem:[#allocation2 + $0xbe0] sm:$0xff]  ;;  %v4666_v7 = vld [vmem:[#allocation2 + $0xbf0] sm:$0xff] }
0x1440   :  { %5254 = vmatprep.subr.bf16.mxu0 %v4569_v12  ;;  %5418 = vmatprep.subr.bf16.mxu1 %v4571_v41  ;;  %v4673_v12 = vld [vmem:[#allocation2 + $0xc28] sm:$0xff]  ;;  %v4675_v41 = vld [vmem:[#allocation2 + $0xc38] sm:$0xff] }
0x1443   :  { %5255 = vmatpush1.bf16.msra.mxu0 %v4568_v57  ;;  %5419 = vmatpush1.bf16.msra.mxu1 %v4570_v26  ;;  %v4672_v57 = vld [vmem:[#allocation2 + $0xc20] sm:$0xff]  ;;  %v4674_v26 = vld [vmem:[#allocation2 + $0xc30] sm:$0xff] }
0x1444   :  { %5256 = vmatprep.subr.bf16.mxu0 %v4577_v6  ;;  %5420 = vmatprep.subr.bf16.mxu1 %v4579_v59  ;;  %v4681_v6 = vld [vmem:[#allocation2 + $0xc68] sm:$0xff]  ;;  %v4683_v59 = vld [vmem:[#allocation2 + $0xc78] sm:$0xff] }
0x1447   :  { %5257 = vmatpush1.bf16.msra.mxu0 %v4576_v8  ;;  %5421 = vmatpush1.bf16.msra.mxu1 %v4578_v61  ;;  %v4680_v8 = vld [vmem:[#allocation2 + $0xc60] sm:$0xff]  ;;  %v4682_v61 = vld [vmem:[#allocation2 + $0xc70] sm:$0xff] }
0x1448   :  { %5258 = vmatprep.subr.bf16.mxu0 %v4585_v51  ;;  %5422 = vmatprep.subr.bf16.mxu1 %v4587_v60  ;;  %v4689_v51 = vld [vmem:[#allocation2 + $0xca8] sm:$0xff]  ;;  %v4691_v60 = vld [vmem:[#allocation2 + $0xcb8] sm:$0xff] }
0x144b   :  { %5259 = vmatpush1.bf16.msra.mxu0 %v4584_v30  ;;  %5423 = vmatpush1.bf16.msra.mxu1 %v4586_v35  ;;  %v4688_v30 = vld [vmem:[#allocation2 + $0xca0] sm:$0xff]  ;;  %v4690_v35 = vld [vmem:[#allocation2 + $0xcb0] sm:$0xff] }
0x144c   :  { %5260 = vmatprep.subr.bf16.mxu0 %v4593_v20  ;;  %5424 = vmatprep.subr.bf16.mxu1 %v4595_v4  ;;  %v4697_v20 = vld [vmem:[#allocation2 + $0xce8] sm:$0xff]  ;;  %v4696_v4 = vld [vmem:[#allocation2 + $0xce0] sm:$0xff] }
0x144f   :  { %5261 = vmatpush1.bf16.msra.mxu0 %v4592_v1  ;;  %5425 = vmatpush1.bf16.msra.mxu1 %v4594_v5  ;;  %v4698_v1 = vld [vmem:[#allocation2 + $0xcf0] sm:$0xff]  ;;  %v4705_v5 = vld [vmem:[#allocation2 + $0xd28] sm:$0xff] }
0x1450   :  { %5262 = vmatprep.subr.bf16.mxu0 %v4601_v10  ;;  %5426 = vmatprep.subr.bf16.mxu1 %v4603_v22  ;;  %v4707_v10 = vld [vmem:[#allocation2 + $0xd38] sm:$0xff] }
0x1451   :  { %v9594_v22 = vld [vmem:[#allocation24] sm:$0xff] }
0x1453   :  { %5263 = vmatpush1.bf16.msra.mxu0 %v4600_v0  ;;  %5427 = vmatpush1.bf16.msra.mxu1 %v4602_v3  ;;  %v4704_v3 = vld [vmem:[#allocation2 + $0xd20] sm:$0xff] }
0x1454   :  { %5264 = vmatprep.subr.bf16.mxu0 %v4609_v56  ;;  %5428 = vmatprep.subr.bf16.mxu1 %v4611_v62  ;;  %v4706_v56 = vld [vmem:[#allocation2 + $0xd30] sm:$0xff]  ;;  %v4713_v62 = vld [vmem:[#allocation2 + $0xd68] sm:$0xff] }
0x1457   :  { %5265 = vmatpush1.bf16.msra.mxu0 %v4608_v48  ;;  %5429 = vmatpush1.bf16.msra.mxu1 %v4610_v54  ;;  %v4715_v48 = vld [vmem:[#allocation2 + $0xd78] sm:$0xff]  ;;  %v4801_v54 = vrot.slane %v9594_v22, %v8623_v32 }
0x1458   :  { %5266 = vmatprep.subr.bf16.mxu0 %v4617_v13  ;;  %5430 = vmatprep.subr.bf16.mxu1 %v4619_v15  ;;  %v4809_v13 = vrot.slane %v9594_v22, %v8626_v33  ;;  %v4805_v15 = vrot.slane %v9594_v22, %v8629_v36  ;;  %v4723_v32 = vld [vmem:[#allocation2 + $0xdb8] sm:$0xff] }
0x145b   :  { %5267 = vmatpush1.bf16.msra.mxu0 %v4616_v38  ;;  %5431 = vmatpush1.bf16.msra.mxu1 %v4618_v29  ;;  %v4813_v29 = vrot.slane %v9594_v22, %v9370_v2 }
0x145c   :  { %5268 = vmatprep.subr.bf16.mxu0 %v4625_v25  ;;  %5432 = vmatprep.subr.bf16.mxu1 %v4627_v46  ;;  %v4712_v25 = vld [vmem:[#allocation2 + $0xd60] sm:$0xff]  ;;  %v4714_v46 = vld [vmem:[#allocation2 + $0xd70] sm:$0xff] }
0x145f   :  { %5269 = vmatpush1.bf16.msra.mxu0 %v4624_v37  ;;  %5433 = vmatpush1.bf16.msra.mxu1 %v4626_v34 }
0x1460   :  { %5270 = vmatprep.subr.bf16.mxu0 %v4633_v40  ;;  %5434 = vmatprep.subr.bf16.mxu1 %v4635_v42  ;;  %v4721_v40 = vld [vmem:[#allocation2 + $0xda8] sm:$0xff] }
0x1463   :  { %5271 = vmatpush1.bf16.msra.mxu0 %v4632_v55  ;;  %5435 = vmatpush1.bf16.msra.mxu1 %v4634_v24 }
0x1464   :  { %5272 = vmatprep.subr.bf16.mxu0 %v4641_v58  ;;  %5436 = vmatprep.subr.bf16.mxu1 %v4643_v53 }
0x1467   :  { %5273 = vmatpush1.bf16.msra.mxu0 %v4640_v63  ;;  %5437 = vmatpush1.bf16.msra.mxu1 %v4642_v49 }
0x1468   :  { %5274 = vmatprep.subr.bf16.mxu0 %v4649_v50  ;;  %5438 = vmatprep.subr.bf16.mxu1 %v4651_v44  ;;  %v4720_v44 = vld [vmem:[#allocation2 + $0xda0] sm:$0xff] }
0x146b   :  { %5275 = vmatpush1.bf16.msra.mxu0 %v4648_v9  ;;  %5439 = vmatpush1.bf16.msra.mxu1 %v4650_v43  ;;  %v4722_v9 = vld [vmem:[#allocation2 + $0xdb0] sm:$0xff] }
0x146c   :  { %5276 = vmatprep.subr.bf16.mxu0 %v4657_v11  ;;  %5440 = vmatprep.subr.bf16.mxu1 %v4659_v16  ;;  %v4729_v16 = vld [vmem:[#allocation2 + $0xde8] sm:$0xff] }
0x146f   :  { %5277 = vmatpush1.bf16.msra.mxu0 %v4656_v14  ;;  %5441 = vmatpush1.bf16.msra.mxu1 %v4658_v52  ;;  %v4731_v14 = vld [vmem:[#allocation2 + $0xdf8] sm:$0xff] }
0x1470   :  { %5278 = vmatprep.subr.bf16.mxu0 %v4665_v27  ;;  %5442 = vmatprep.subr.bf16.mxu1 %v4667_v47  ;;  %v4728_v27 = vld [vmem:[#allocation2 + $0xde0] sm:$0xff]  ;;  %v4730_v47 = vld [vmem:[#allocation2 + $0xdf0] sm:$0xff] }
0x1473   :  { %5279 = vmatpush1.bf16.msra.mxu0 %v4664_v39  ;;  %5443 = vmatpush1.bf16.msra.mxu1 %v4666_v7  ;;  %v4737_v39 = vld [vmem:[#allocation2 + $0xe28] sm:$0xff]  ;;  %v4739_v7 = vld [vmem:[#allocation2 + $0xe38] sm:$0xff] }
0x1474   :  { %5289 = vmatprep.subr.bf16.mxu0 %v4673_v12  ;;  %5453 = vmatprep.subr.bf16.mxu1 %v4675_v41  ;;  %v4736_v41 = vld [vmem:[#allocation2 + $0xe20] sm:$0xff] }
0x1476   :  { %5281 = vmatmul.mubr.bf16.vlgmr.msra.gmra.mrb[48].mxu0 %v9562_v23  ;;  %5445 = vmatmul.mubr.bf16.vlgmr.msra.gmra.mrb[44].mxu1 %v9562_v23  ;;  %v4699_v23 = vld [vmem:[#allocation2 + $0xcf8] sm:$0xff] }
0x1477   :  { %5290 = vmatpush1.bf16.msra.mxu0 %v4672_v57  ;;  %5454 = vmatpush1.bf16.msra.mxu1 %v4674_v26  ;;  %v4738_v57 = vld [vmem:[#allocation2 + $0xe30] sm:$0xff]  ;;  %v4745_v26 = vld [vmem:[#allocation2 + $0xe68] sm:$0xff] }
0x1478   :  { %5291 = vmatprep.subr.bf16.mxu0 %v4681_v6  ;;  %5455 = vmatprep.subr.bf16.mxu1 %v4683_v59  ;;  %v4747_v6 = vld [vmem:[#allocation2 + $0xe78] sm:$0xff]  ;;  %v4744_v59 = vld [vmem:[#allocation2 + $0xe60] sm:$0xff] }
0x1479   :  { %5321 = vmatprep.mubr.bf16.mxu0 %v9567_v18  ;;  %5485 = vmatprep.mubr.bf16.mxu1 %v9567_v18  ;;  %v8218_v18 = vmov 1983009808  }
0x147a   :  { %v5505_v0 = vunpack.c.l.s4 %v8218_v18  ;;  %v4770_v18 = vld [vmem:[#allocation2 + $0xf30] sm:$0xff] }
0x147b   :  { %5292 = vmatpush1.bf16.msra.mxu0 %v4680_v8  ;;  %5456 = vmatpush1.bf16.msra.mxu1 %v4682_v61  ;;  %v4746_v8 = vld [vmem:[#allocation2 + $0xe70] sm:$0xff]  ;;  %v4753_v61 = vld [vmem:[#allocation2 + $0xea8] sm:$0xff] }
0x147c   :  { %5293 = vmatprep.subr.bf16.mxu0 %v4689_v51  ;;  %5457 = vmatprep.subr.bf16.mxu1 %v4691_v60  ;;  %v5506_v38 = vunpack.c.0.s8 %v5505_v0  ;;  %v4755_v51 = vld [vmem:[#allocation2 + $0xeb8] sm:$0xff]  ;;  %v4752_v60 = vld [vmem:[#allocation2 + $0xea0] sm:$0xff]  ;;  %v4777_v0 = vld [vmem:[#allocation2 + $0xf68] sm:$0xff] }
0x147e   :  { %v9605_v53 = vsub.s32 %v5506_v38, %v8620_v28  ;;  %v4793_v38 = vld [vmem:[#allocation2 + $0xfe8] sm:$0xff] }
0x147f   :  { %5294 = vmatpush1.bf16.msra.mxu0 %v4688_v30  ;;  %5458 = vmatpush1.bf16.msra.mxu1 %v4690_v35  ;;  %v4754_v30 = vld [vmem:[#allocation2 + $0xeb0] sm:$0xff]  ;;  %v4761_v35 = vld [vmem:[#allocation2 + $0xee8] sm:$0xff] }
0x1480   :  { %5295 = vmatprep.subr.bf16.mxu0 %v4697_v20  ;;  %5459 = vmatprep.subr.bf16.mxu1 %v4699_v23  ;;  %v4763_v20 = vld [vmem:[#allocation2 + $0xef8] sm:$0xff]  ;;  %v4760_v23 = vld [vmem:[#allocation2 + $0xee0] sm:$0xff] }
0x1483   :  { %5296 = vmatpush1.bf16.msra.mxu0 %v4696_v4  ;;  %5460 = vmatpush1.bf16.msra.mxu1 %v4698_v1  ;;  %v4762_v4 = vld [vmem:[#allocation2 + $0xef0] sm:$0xff]  ;;  %v4769_v1 = vld [vmem:[#allocation2 + $0xf28] sm:$0xff] }
0x1484   :  { %5297 = vmatprep.subr.bf16.mxu0 %v4705_v5  ;;  %5461 = vmatprep.subr.bf16.mxu1 %v4707_v10  ;;  %v4771_v5 = vld [vmem:[#allocation2 + $0xf38] sm:$0xff]  ;;  %v4768_v10 = vld [vmem:[#allocation2 + $0xf20] sm:$0xff] }
0x1487   :  { %5298 = vmatpush1.bf16.msra.mxu0 %v4704_v3  ;;  %5462 = vmatpush1.bf16.msra.mxu1 %v4706_v56  ;;  %v4779_v3 = vld [vmem:[#allocation2 + $0xf78] sm:$0xff]  ;;  %v4776_v56 = vld [vmem:[#allocation2 + $0xf60] sm:$0xff] }
0x1488   :  { %5299 = vmatprep.subr.bf16.mxu0 %v4713_v62  ;;  %5463 = vmatprep.subr.bf16.mxu1 %v4715_v48  ;;  %v4778_v62 = vld [vmem:[#allocation2 + $0xf70] sm:$0xff]  ;;  %v4785_v48 = vld [vmem:[#allocation2 + $0xfa8] sm:$0xff] }
0x1489   :  { %v4995_v37 = vpop.f32.mrb[44].mxu0  ;;  %v5159_v34 = vpop.f32.mrb[40].mxu1 }
0x148a   :  { %v7600_v42 = vadd.f32 %v4995_v37, %v4801_v54  ;;  %v7602_v55 = vadd.f32 %v5159_v34, %v4809_v13  ;;  %v4997_v33 = vpop.f32.mrb[45].mxu0  ;;  %v5161_v24 = vpop.f32.mrb[41].mxu1  ;;  %v4787_v54 = vld [vmem:[#allocation2 + $0xfb8] sm:$0xff]  ;;  %v4784_v13 = vld [vmem:[#allocation2 + $0xfa0] sm:$0xff]  ;;  %v4817_v37 = vrot.slane %v9594_v22, %v9405_v19  ;;  %v4825_v34 = vrot.slane %v9594_v22, %v9408_v21 }
0x148b   :  { %v7601_v58 = vadd.f32 %v4997_v33, %v4805_v15  ;;  %v7603_v36 = vadd.f32 %v5161_v24, %v4813_v29  ;;  %v4999_v63 = vpop.f32.mrb[46].mxu0  ;;  %v5163_v49 = vpop.f32.mrb[42].mxu1  ;;  %5300 = vmatpush1.bf16.msra.mxu0 %v4712_v25  ;;  %5464 = vmatpush1.bf16.msra.mxu1 %v4714_v46  ;;  %v4786_v15 = vld [vmem:[#allocation2 + $0xfb0] sm:$0xff]  ;;  %v4795_v29 = vld [vmem:[#allocation2 + $0xff8] sm:$0xff]  ;;  %v4792_v25 = vld [vmem:[#allocation2 + $0xfe0] sm:$0xff] }
0x148c   :  { %v5000_v2 = vpop.f32.mrb[47].mxu0  ;;  %v5164_v50 = vpop.f32.mrb[43].mxu1  ;;  %5301 = vmatprep.subr.bf16.mxu0 %v4721_v40  ;;  %5465 = vmatprep.subr.bf16.mxu1 %v4723_v32  ;;  %v4794_v46 = vld [vmem:[#allocation2 + $0xff0] sm:$0xff]  ;;  %v4821_v40 = vrot.slane %v9594_v22, %v9411_v31  ;;  %v4829_v32 = vrot.slane %v9594_v22, %v9414_v45 }
0x148d   :  { %v5502_v43 = vcombine.low %v7600_v42, %v7601_v58  ;;  %v5503_v11 = vcombine.low %v7602_v55, %v7603_v36 }
0x148f   :  { %v5510_v52 = vrot.slane %v5502_v43, %v9605_v53  ;;  %v5517_v28 = vrot.slane %v5503_v11, %v9605_v53  ;;  %5302 = vmatpush1.bf16.msra.mxu0 %v4720_v44  ;;  %5466 = vmatpush1.bf16.msra.mxu1 %v4722_v9 }
0x1490   :  { %5303 = vmatprep.subr.bf16.mxu0 %v4729_v16  ;;  %5467 = vmatprep.subr.bf16.mxu1 %v4731_v14 }
0x1491   :  { %v5518_v12 = vcombine.low %v5510_v52, %v5517_v28 }
0x1493   :  { %5304 = vmatpush1.bf16.msra.mxu0 %v4728_v27  ;;  %5468 = vmatpush1.bf16.msra.mxu1 %v4730_v47  ;;  %5538 = vst [vmem:[#allocation25] sm:$0xff] %v5518_v12 }
0x1494   :  { %5305 = vmatprep.subr.bf16.mxu0 %v4737_v39  ;;  %5469 = vmatprep.subr.bf16.mxu1 %v4739_v7 }
0x1497   :  { %5306 = vmatpush1.bf16.msra.mxu0 %v4736_v41  ;;  %5470 = vmatpush1.bf16.msra.mxu1 %v4738_v57 }
0x1498   :  { %5307 = vmatprep.subr.bf16.mxu0 %v4745_v26  ;;  %5471 = vmatprep.subr.bf16.mxu1 %v4747_v6 }
0x149b   :  { %5308 = vmatpush1.bf16.msra.mxu0 %v4744_v59  ;;  %5472 = vmatpush1.bf16.msra.mxu1 %v4746_v8 }
0x149c   :  { %5309 = vmatprep.subr.bf16.mxu0 %v4753_v61  ;;  %5473 = vmatprep.subr.bf16.mxu1 %v4755_v51 }
0x149f   :  { %5310 = vmatpush1.bf16.msra.mxu0 %v4752_v60  ;;  %5474 = vmatpush1.bf16.msra.mxu1 %v4754_v30 }
0x14a0   :  { %5311 = vmatprep.subr.bf16.mxu0 %v4761_v35  ;;  %5475 = vmatprep.subr.bf16.mxu1 %v4763_v20 }
0x14a3   :  { %5312 = vmatpush1.bf16.msra.mxu0 %v4760_v23  ;;  %5476 = vmatpush1.bf16.msra.mxu1 %v4762_v4 }
0x14a4   :  { %5313 = vmatprep.subr.bf16.mxu0 %v4769_v1  ;;  %5477 = vmatprep.subr.bf16.mxu1 %v4771_v5 }
0x14a7   :  { %5314 = vmatpush1.bf16.msra.mxu0 %v4768_v10  ;;  %5478 = vmatpush1.bf16.msra.mxu1 %v4770_v18 }
0x14a8   :  { %5315 = vmatprep.subr.bf16.mxu0 %v4777_v0  ;;  %5479 = vmatprep.subr.bf16.mxu1 %v4779_v3 }
0x14ab   :  { %5316 = vmatpush1.bf16.msra.mxu0 %v4776_v56  ;;  %5480 = vmatpush1.bf16.msra.mxu1 %v4778_v62 }
0x14ac   :  { %5317 = vmatprep.subr.bf16.mxu0 %v4785_v48  ;;  %5481 = vmatprep.subr.bf16.mxu1 %v4787_v54 }
0x14af   :  { %5318 = vmatpush1.bf16.msra.mxu0 %v4784_v13  ;;  %5482 = vmatpush1.bf16.msra.mxu1 %v4786_v15 }
0x14b0   :  { %5319 = vmatprep.subr.bf16.mxu0 %v4793_v38  ;;  %5483 = vmatprep.subr.bf16.mxu1 %v4795_v29 }
0x14b3   :  { %5320 = vmatpush1.bf16.msra.mxu0 %v4792_v25  ;;  %5484 = vmatpush1.bf16.msra.mxu1 %v4794_v46 }
0x14b6   :  { %5322 = vmatmul.mubr.bf16.vlgmr.msra.gmra.mrb[48].mxu0 %v9576_v17  ;;  %5486 = vmatmul.mubr.bf16.vlgmr.msra.gmra.mrb[44].mxu1 %v9576_v17 }
0x1589   :  { %v5323_v42 = vpop.f32.mrb[48].mxu0  ;;  %v5487_v55 = vpop.f32.mrb[44].mxu1 }
0x158a   :  { %v7604_v33 = vadd.f32 %v5323_v42, %v4817_v37  ;;  %v7606_v24 = vadd.f32 %v5487_v55, %v4825_v34  ;;  %v5325_v58 = vpop.f32.mrb[49].mxu0  ;;  %v5489_v36 = vpop.f32.mrb[45].mxu1 }
0x158b   :  { %v7605_v63 = vadd.f32 %v5325_v58, %v4821_v40  ;;  %v7607_v17 = vadd.f32 %v5489_v36, %v4829_v32  ;;  %v5327_v49 = vpop.f32.mrb[50].mxu0  ;;  %v5491_v2 = vpop.f32.mrb[46].mxu1 }
0x158c   :  { %v5328_v19 = vpop.f32.mrb[51].mxu0  ;;  %v5492_v50 = vpop.f32.mrb[47].mxu1 }
0x158d   :  { %v5519_v44 = vcombine.low %v7604_v33, %v7605_v63  ;;  %v5520_v21 = vcombine.low %v7606_v24, %v7607_v17 }
0x158f   :  { %v5527_v31 = vrot.slane %v5519_v44, %v9605_v53  ;;  %v5534_v45 = vrot.slane %v5520_v21, %v9605_v53 }
0x1591   :  { %v5535_v22 = vcombine.low %v5527_v31, %v5534_v45 }
0x1593   :  { %5539 = vst [vmem:[#allocation25 + $0x8] sm:$0xff] %v5535_v22 }
0x1594   :  { %8161 = shalt.err (!%p8158_p10)
}
0x1595   :  { %s8162_s21 = scalar_lea.hbm %s9648_s15, 256 }
0x1596   :  { %p8163_p11 = scmp.ne.s32.totalorder %s9648_s15, %s8162_s21  ;;  %p8166_p12 = scmp.lt.u32.totalorder %s8162_s21, %s9648_s15 }
0x1598   :  { %p8168_p13 = pnand %p8166_p12, %p8163_p11 }
0x159a   :  { %8171 = shalt.err (!%p8168_p13)
}
0x159b   :  { %5549 = dma.vmem_to_hbm [thread:$0]  %s5547_s28, 256, %s9648_s15, [#allocation6]  }
0x159c   :  { %8188 = dma.done.wait [#allocation6], 256  }
0x159d   :  { %8189 = vsyncadd [#allocation6], 4294967040 }
0x159e   :  { %5553 = vsyncpa [#allocation5], 1 }
0x159f   :  { %5554 = vsyncpa [#allocation8], 1 }
0x15a0   :  { %5555 = vsyncpa [#allocation11], 1 }
0x15a1   :  { %5556 = vsyncpa [#allocation14], 1 }
0x15a2   :  { %5557 = vsyncpa [#allocation17], 1 }
0x15a3   :  { %5558 = vsyncpa [#allocation20], 1 }
0x15a4   :  { %5559 = vsyncpa [#allocation23], 1 }
0x15a5   :  { %5560 = vsyncpa [#allocation6], 1 }
0x15a6   :  { %5561 = vsyncmov [#allocation3] }
0x15a9   :  { %s5562_s10 = vpop.sfrf %5561 }
0x15aa   :  { %p5607_p0 = scmp.ne.s32.totalorder %s5562_s10, 0 }
0x15ac   :  { %5566 = shalt.err (%p5607_p0)  }

</bundles_post_ra>
